<compile_context>
chip_gen: v6e
topology: v6e:2x2x1
jax: 0.10.0
libtpu: 0.0.40
codegen_flags: <defaults>
</compile_context>

<pallas_src>
import functools

import jax
import jax.numpy as jnp
from jax.experimental import pallas as pl
from jax.experimental.pallas import tpu as pltpu


def _round_up(x, m):
    return ((x + m - 1) // m) * m


# ----------------------------------------------------------------------------
# Fused kernel factory (whole network, lane-dense transposed layout)
# ----------------------------------------------------------------------------
def _make_kernel(meta, N, H, W, MPpad):
    HP, WP = H + 2, W + 2
    MP = N * HP * WP
    assert MPpad >= MP
    # 3x3 tap offsets (dy-major, dx-minor) as deltas in the flat padded grid.
    # Tap `off` is realized as a circular lane roll by -off; interior output
    # lanes live in [WP+1, MP-WP-2] so every tap read stays inside [0, MP):
    TAPS = [dy * WP + dx for dy in (-1, 0, 1) for dx in (-1, 0, 1)]
    assert WP + 1 >= max(abs(t) for t in TAPS)        # min interior lane >= max |tap|
    assert (MP - WP - 2) + max(TAPS) < MPpad          # max interior lane + max tap in range

    off_small, off_big, off_sh = meta["off_small"], meta["off_big"], meta["off_shift"]
    half, num_blocks = meta["half"], meta["num_blocks"]
    for _, (_, _, c) in off_big.items():
        assert c == 9 * half                          # pre-flattened 3x3 weights

    def kernel(cols_ref, mask_ref, pool_ref, wS_ref, wB_ref, sh_ref,
               fcw_ref, fcb_ref, o_ref):
        # Interior-lane mask broadcast ONCE; every masked activation has
        # `half` channels, so one broadcast covers all uses.
        mask_half = jnp.broadcast_to(mask_ref[...], (half, MPpad))

        def w_small(name):                            # (Cout, K) bf16, scale folded
            off, r, c = off_small[name]
            return wS_ref[off:off + r, :c]

        def w_big(name):                              # (Cout, 9*half) bf16
            off, r, c = off_big[name]
            return wB_ref[off:off + r, :c]

        def shift(name):                              # (Cout, 1) f32 (BN shift + bias)
            off, r, _ = off_sh[name]
            return sh_ref[off:off + r, :]

        def conv1x1(x_bf, name, masked=False):
            # x_bf: (Cin, MPpad) bf16.  out = ReLU(W @ x + shift) [* mask]
            out = jnp.dot(w_small(name), x_bf, preferred_element_type=jnp.float32)
            out = jnp.maximum(out + shift(name), 0.0)
            return out * mask_half if masked else out

        def conv3x3(x_f32, name, residual=None):
            # x_f32: (half, MPpad) f32, zero outside interior lanes (masked).
            taps = [x_f32 if off == 0 else
                    pltpu.roll(x_f32, shift=(-off) % MPpad, axis=1)
                    for off in TAPS]
            x9 = jnp.concatenate(taps, axis=0).astype(jnp.bfloat16)   # (9*half, MPpad)
            out = jnp.dot(w_big(name), x9, preferred_element_type=jnp.float32)
            out = out + shift(name)
            if residual is not None:
                out = out + residual
            # Masked: these outputs feed further 3x3 convs / the residual
            # chain, so the zero-border invariant must be preserved.
            return jnp.maximum(out, 0.0) * mask_half

        def csp_layer(h_f32, li):
            h_bf = h_f32.astype(jnp.bfloat16)          # cast once, reuse for both splits
            p1 = conv1x1(h_bf, f"l{li}.part1")         # never feeds a 3x3 -> no mask
            p2 = conv1x1(h_bf, f"l{li}.part2", masked=True)
            for bi in range(num_blocks):               # TinyBlocks (residual)
                t = conv3x3(p2, f"l{li}.b{bi}.conv1")
                p2 = conv3x3(t, f"l{li}.b{bi}.conv2", residual=p2)
            # transition 1x1 on concat(p1, p2): channels are sublanes, so the
            # concat is a cheap tile-aligned stack -> one K=2*half matmul.
            cat = jnp.concatenate([p1, p2], axis=0).astype(jnp.bfloat16)
            return conv1x1(cat, f"l{li}.trans")        # border lanes re-zeroed downstream

        h = conv1x1(cols_ref[...].astype(jnp.bfloat16), "patchify")
        h = csp_layer(h, 0)
        h = csp_layer(h, 1)
        h = csp_layer(h, 2)                            # (out_ch, MPpad) f32

        # Head: per-image average pool (pool map only weights interior lanes,
        # single bf16 MXU pass), then Linear + sigmoid.
        pooled = jnp.dot(h.astype(jnp.bfloat16), pool_ref[...],
                         preferred_element_type=jnp.float32)          # (out_ch, N)
        logits = jnp.sum(pooled * fcw_ref[...], axis=0, keepdims=True) + fcb_ref[...]
        o_ref[...] = jax.nn.sigmoid(logits)

    return kernel


# ----------------------------------------------------------------------------
# Plain-JAX glue: patch extraction + mask/pool constants (pure layout work)
# ----------------------------------------------------------------------------
def _prep_inputs(x_nchw, patch, MPpad):
    """cols (K, MPpad) f32, interior mask (1, MPpad) f32, pool map (MPpad, N) bf16."""
    N, Cin, Hin, Win = x_nchw.shape
    H, W = Hin // patch, Win // patch
    HP, WP = H + 2, W + 2
    MP = N * HP * WP
    K = patch * patch * Cin
    # Non-overlapping p x p patches -> K columns; K ordering is
    # (patch_row, patch_col, in_channel).  Mirror this when porting real
    # PyTorch Conv2d(k=p, stride=p) weights.
    x = jnp.transpose(x_nchw, (0, 2, 3, 1)).reshape(N, H, patch, W, patch, Cin)
    x = jnp.transpose(x, (0, 1, 3, 2, 4, 5)).reshape(N, H, W, K)
    padded = jnp.zeros((N, HP, WP, K), x.dtype).at[:, 1:H + 1, 1:W + 1, :].set(x)
    cols = jnp.pad(padded.reshape(MP, K).T, ((0, 0), (0, MPpad - MP)))

    r = jnp.arange(MPpad)
    xp, yp, img = r % WP, (r // WP) % HP, r // (HP * WP)
    interior = (xp >= 1) & (xp <= W) & (yp >= 1) & (yp <= H) & (r < MP)
    mask = interior.astype(jnp.float32).reshape(1, MPpad)
    pool = interior[:, None] & (img[:, None] == jnp.arange(N)[None, :])
    pool = (pool.astype(jnp.float32) / float(H * W)).astype(jnp.bfloat16)
    return cols, mask, pool


# ----------------------------------------------------------------------------
# Deterministic parameter construction (conv + eval-mode BN folded)
# ----------------------------------------------------------------------------
def _make_conv_bn(key, c_out, k):
    """Conv weight (c_out, k) with BN scale folded in (bf16) + f32 shift."""
    kw, kb, kg, kbe, km, kv = jax.random.split(key, 6)
    w = 0.1 * jax.random.normal(kw, (c_out, k), jnp.float32)
    bias = 0.05 * jax.random.normal(kb, (c_out,), jnp.float32)
    gamma = 1.0 + 0.1 * jax.random.normal(kg, (c_out,), jnp.float32)
    beta = 0.05 * jax.random.normal(kbe, (c_out,), jnp.float32)
    mean = 0.05 * jax.random.normal(km, (c_out,), jnp.float32)
    var = 1.0 + 0.1 * jnp.abs(jax.random.normal(kv, (c_out,), jnp.float32))
    scale = gamma / jnp.sqrt(var + 1e-5)
    shift = beta - mean * scale + bias * scale
    return dict(w=(w * scale[:, None]).astype(jnp.bfloat16),   # scale folded into weight
                shift=shift.reshape(c_out, 1).astype(jnp.float32))


def init_params(key, in_ch, hid, out_ch, patch, num_blocks):
    keys = iter(jax.random.split(key, 64))
    params = {"patchify": _make_conv_bn(next(keys), hid, patch * patch * in_ch)}

    def make_csp(cin, cout):
        h2 = cin // 2
        return dict(
            part1=_make_conv_bn(next(keys), h2, cin),
            part2=_make_conv_bn(next(keys), h2, cin),
            # 3x3 weights pre-flattened to (Cout, 9*Cin); K ordering is
            # tap-major (dy, dx), channel-minor -- matches the kernel's taps.
            blocks=[dict(conv1=_make_conv_bn(next(keys), h2, 9 * h2),
                         conv2=_make_conv_bn(next(keys), h2, 9 * h2))
                    for _ in range(num_blocks)],
            trans=_make_conv_bn(next(keys), cout, cin),
        )

    params["layer1"] = make_csp(hid, hid)
    params["layer2"] = make_csp(hid, hid)
    params["layer3"] = make_csp(hid, out_ch)
    # nn.Linear(out_ch, 1): stored as the (out_ch, 1) column W^T + bias.
    params["fc_w"] = 0.1 * jax.random.normal(next(keys), (out_ch, 1), jnp.float32)
    params["fc_b"] = 0.05 * jax.random.normal(next(keys), (1, 1), jnp.float32)
    return params


# ----------------------------------------------------------------------------
# Parameter packing: 3 slabs + fc  ->  8 kernel operands / 8 entry DMAs
# ----------------------------------------------------------------------------
def _pack(named, width, dtype):
    """Stack 2-D blocks row-wise; rows padded to multiples of 8 (aligned reads)."""
    chunks, offs, cur = [], {}, 0
    for name, arr in named:
        arr = arr.astype(dtype)
        r, c = arr.shape
        rp = _round_up(r, 8)
        chunks.append(jnp.zeros((rp, width), dtype).at[:r, :c].set(arr))
        offs[name] = (cur, r, c)
        cur += rp
    return jnp.concatenate(chunks, axis=0), offs


def pack_params(params):
    layers = [params["layer1"], params["layer2"], params["layer3"]]
    num_blocks = len(layers[0]["blocks"])
    half = layers[0]["part1"]["w"].shape[0]

    small, big, shifts = [("patchify", params["patchify"]["w"])], [], \
        [("patchify", params["patchify"]["shift"])]
    for li, lp in enumerate(layers):
        for nm in ("part1", "part2"):
            small.append((f"l{li}.{nm}", lp[nm]["w"]))
            shifts.append((f"l{li}.{nm}", lp[nm]["shift"]))
        for bi, bp in enumerate(lp["blocks"]):
            for nm in ("conv1", "conv2"):
                big.append((f"l{li}.b{bi}.{nm}", bp[nm]["w"]))
                shifts.append((f"l{li}.b{bi}.{nm}", bp[nm]["shift"]))
        small.append((f"l{li}.trans", lp["trans"]["w"]))
        shifts.append((f"l{li}.trans", lp["trans"]["shift"]))

    wS, offS = _pack(small, max(a.shape[1] for _, a in small), jnp.bfloat16)
    wB, offB = _pack(big, max(a.shape[1] for _, a in big), jnp.bfloat16)
    sh, offsh = _pack(shifts, 1, jnp.float32)

    packed = dict(w_small=wS, w_big=wB, shifts=sh,
                  fc_w=params["fc_w"], fc_b=params["fc_b"])
    meta = dict(off_small=offS, off_big=offB, off_shift=offsh,
                half=half, num_blocks=num_blocks)
    return packed, meta


# ----------------------------------------------------------------------------
# Forward pass: one pallas_call for the whole network
# ----------------------------------------------------------------------------
def tinyvad_forward(packed, x, *, meta, patch):
    N, _, Hin, Win = x.shape
    H, W = Hin // patch, Win // patch
    MP = N * (H + 2) * (W + 2)
    MPpad = _round_up(MP, 128)                          # spatial grid -> lanes
    cols, mask, pool = _prep_inputs(x, patch, MPpad)
    kernel = _make_kernel(meta, N, H, W, MPpad)
    out = pl.pallas_call(
        kernel,
        out_shape=jax.ShapeDtypeStruct((1, N), jnp.float32),
        # grid=() : single invocation, everything resident in VMEM / vregs.
    )(cols, mask, pool, packed["w_small"], packed["w_big"], packed["shifts"],
      packed["fc_w"], packed["fc_b"])
    return out.reshape(N, 1)


# ----------------------------------------------------------------------------
if __name__ == "__main__":
    in_ch, hid, out_ch, patch, num_blocks = 4, 16, 32, 2, 2
    key = jax.random.PRNGKey(0)
    pkey, xkey = jax.random.split(key)
    params = init_params(pkey, in_ch, hid, out_ch, patch, num_blocks)
    packed, meta = pack_params(params)
    x = jax.random.normal(xkey, (2, in_ch, 16, 16), jnp.float32)   # NCHW input

    fwd = jax.jit(functools.partial(tinyvad_forward, meta=meta, patch=patch))
    y = jax.block_until_ready(fwd(packed, x))
    assert y.shape == (2, 1)
    assert bool(jnp.all(jnp.isfinite(y)))
    assert bool(jnp.all((y >= 0.0) & (y <= 1.0)))
    print("KERNEL_OK")
</pallas_src>

<mosaic_0001>
module attributes {stable_mosaic.version = 11 : i64} {
  func.func @kernel(%arg0: memref<16x256xf32, #tpu.memory_space<vmem>>, %arg1: memref<1x256xf32, #tpu.memory_space<vmem>>, %arg2: memref<256x2xbf16, #tpu.memory_space<vmem>>, %arg3: memref<128x16xbf16, #tpu.memory_space<vmem>>, %arg4: memref<96x72xbf16, #tpu.memory_space<vmem>>, %arg5: memref<224x1xf32, #tpu.memory_space<vmem>>, %arg6: memref<32x1xf32, #tpu.memory_space<vmem>>, %arg7: memref<1x1xf32, #tpu.memory_space<vmem>>, %arg8: memref<1x2xf32, #tpu.memory_space<vmem>>) attributes {dimension_semantics = [], scalar_prefetch = 0 : i64, scratch_operands = 0 : i64, tpu.core_type = #tpu.core_type<tc>} {
    %c0 = arith.constant 0 : index
    %c0_0 = arith.constant 0 : index
    %0 = vector.load %arg1[%c0, %c0_0] : memref<1x256xf32, #tpu.memory_space<vmem>>, vector<1x256xf32>
    %1 = vector.shape_cast %0 : vector<1x256xf32> to vector<1x256xf32>
    %2 = vector.broadcast %1 : vector<1x256xf32> to vector<8x256xf32>
    %c0_1 = arith.constant 0 : index
    %c0_2 = arith.constant 0 : index
    %3 = vector.load %arg0[%c0_1, %c0_2] : memref<16x256xf32, #tpu.memory_space<vmem>>, vector<16x256xf32>
    %4 = arith.truncf %3 : vector<16x256xf32> to vector<16x256xbf16>
    %c0_3 = arith.constant 0 : index
    %c0_4 = arith.constant 0 : index
    %5 = vector.load %arg3[%c0_3, %c0_4] : memref<128x16xbf16, #tpu.memory_space<vmem>>, vector<16x16xbf16>
    %cst = arith.constant dense<0.000000e+00> : vector<16x256xf32>
    %6 = tpu.matmul %5, %4, %cst {dimension_numbers = #tpu.dot_dimension_numbers<[1], [0], [0], [1], [0, 0, 1, 1], [], []>} : vector<16x16xbf16>, vector<16x256xbf16>, vector<16x256xf32> -> vector<16x256xf32>
    %c0_5 = arith.constant 0 : index
    %c0_6 = arith.constant 0 : index
    %7 = vector.load %arg5[%c0_5, %c0_6] : memref<224x1xf32, #tpu.memory_space<vmem>>, vector<16x1xf32>
    %8 = vector.broadcast %7 : vector<16x1xf32> to vector<16x256xf32>
    %9 = arith.addf %6, %8 : vector<16x256xf32>
    %cst_7 = arith.constant 0.000000e+00 : f32
    %10 = vector.broadcast %cst_7 : f32 to vector<16x256xf32>
    %11 = arith.maximumf %9, %10 : vector<16x256xf32>
    %12 = arith.truncf %11 : vector<16x256xf32> to vector<16x256xbf16>
    %c16 = arith.constant 16 : index
    %c0_8 = arith.constant 0 : index
    %13 = vector.load %arg3[%c16, %c0_8] : memref<128x16xbf16, #tpu.memory_space<vmem>>, vector<8x16xbf16>
    %cst_9 = arith.constant dense<0.000000e+00> : vector<8x256xf32>
    %14 = tpu.matmul %13, %12, %cst_9 {dimension_numbers = #tpu.dot_dimension_numbers<[1], [0], [0], [1], [0, 0, 1, 1], [], []>} : vector<8x16xbf16>, vector<16x256xbf16>, vector<8x256xf32> -> vector<8x256xf32>
    %c16_10 = arith.constant 16 : index
    %c0_11 = arith.constant 0 : index
    %15 = vector.load %arg5[%c16_10, %c0_11] : memref<224x1xf32, #tpu.memory_space<vmem>>, vector<8x1xf32>
    %16 = vector.broadcast %15 : vector<8x1xf32> to vector<8x256xf32>
    %17 = arith.addf %14, %16 : vector<8x256xf32>
    %cst_12 = arith.constant 0.000000e+00 : f32
    %18 = vector.broadcast %cst_12 : f32 to vector<8x256xf32>
    %19 = arith.maximumf %17, %18 : vector<8x256xf32>
    %c24 = arith.constant 24 : index
    %c0_13 = arith.constant 0 : index
    %20 = vector.load %arg3[%c24, %c0_13] : memref<128x16xbf16, #tpu.memory_space<vmem>>, vector<8x16xbf16>
    %cst_14 = arith.constant dense<0.000000e+00> : vector<8x256xf32>
    %21 = tpu.matmul %20, %12, %cst_14 {dimension_numbers = #tpu.dot_dimension_numbers<[1], [0], [0], [1], [0, 0, 1, 1], [], []>} : vector<8x16xbf16>, vector<16x256xbf16>, vector<8x256xf32> -> vector<8x256xf32>
    %c24_15 = arith.constant 24 : index
    %c0_16 = arith.constant 0 : index
    %22 = vector.load %arg5[%c24_15, %c0_16] : memref<224x1xf32, #tpu.memory_space<vmem>>, vector<8x1xf32>
    %23 = vector.broadcast %22 : vector<8x1xf32> to vector<8x256xf32>
    %24 = arith.addf %21, %23 : vector<8x256xf32>
    %cst_17 = arith.constant 0.000000e+00 : f32
    %25 = vector.broadcast %cst_17 : f32 to vector<8x256xf32>
    %26 = arith.maximumf %24, %25 : vector<8x256xf32>
    %27 = arith.mulf %26, %2 : vector<8x256xf32>
    %c11_i32 = arith.constant 11 : i32
    %28 = tpu.dynamic_rotate %27 by %c11_i32 dim 1 : vector<8x256xf32>, i32 -> vector<8x256xf32>
    %c10_i32 = arith.constant 10 : i32
    %29 = tpu.dynamic_rotate %27 by %c10_i32 dim 1 : vector<8x256xf32>, i32 -> vector<8x256xf32>
    %c9_i32 = arith.constant 9 : i32
    %30 = tpu.dynamic_rotate %27 by %c9_i32 dim 1 : vector<8x256xf32>, i32 -> vector<8x256xf32>
    %c1_i32 = arith.constant 1 : i32
    %31 = tpu.dynamic_rotate %27 by %c1_i32 dim 1 : vector<8x256xf32>, i32 -> vector<8x256xf32>
    %c255_i32 = arith.constant 255 : i32
    %32 = tpu.dynamic_rotate %27 by %c255_i32 dim 1 : vector<8x256xf32>, i32 -> vector<8x256xf32>
    %c247_i32 = arith.constant 247 : i32
    %33 = tpu.dynamic_rotate %27 by %c247_i32 dim 1 : vector<8x256xf32>, i32 -> vector<8x256xf32>
    %c246_i32 = arith.constant 246 : i32
    %34 = tpu.dynamic_rotate %27 by %c246_i32 dim 1 : vector<8x256xf32>, i32 -> vector<8x256xf32>
    %c245_i32 = arith.constant 245 : i32
    %35 = tpu.dynamic_rotate %27 by %c245_i32 dim 1 : vector<8x256xf32>, i32 -> vector<8x256xf32>
    %36 = tpu.concatenate %28, %29, %30, %31, %27, %32, %33, %34, %35 in 0 : vector<8x256xf32>, vector<8x256xf32>, vector<8x256xf32>, vector<8x256xf32>, vector<8x256xf32>, vector<8x256xf32>, vector<8x256xf32>, vector<8x256xf32>, vector<8x256xf32> -> vector<72x256xf32>
    %37 = arith.truncf %36 : vector<72x256xf32> to vector<72x256xbf16>
    %c0_18 = arith.constant 0 : index
    %c0_19 = arith.constant 0 : index
    %38 = vector.load %arg4[%c0_18, %c0_19] : memref<96x72xbf16, #tpu.memory_space<vmem>>, vector<8x72xbf16>
    %cst_20 = arith.constant dense<0.000000e+00> : vector<8x256xf32>
    %39 = tpu.matmul %38, %37, %cst_20 {dimension_numbers = #tpu.dot_dimension_numbers<[1], [0], [0], [1], [0, 0, 1, 1], [], []>} : vector<8x72xbf16>, vector<72x256xbf16>, vector<8x256xf32> -> vector<8x256xf32>
    %c32 = arith.constant 32 : index
    %c0_21 = arith.constant 0 : index
    %40 = vector.load %arg5[%c32, %c0_21] : memref<224x1xf32, #tpu.memory_space<vmem>>, vector<8x1xf32>
    %41 = vector.broadcast %40 : vector<8x1xf32> to vector<8x256xf32>
    %42 = arith.addf %39, %41 : vector<8x256xf32>
    %cst_22 = arith.constant 0.000000e+00 : f32
    %43 = vector.broadcast %cst_22 : f32 to vector<8x256xf32>
    %44 = arith.maximumf %42, %43 : vector<8x256xf32>
    %45 = arith.mulf %44, %2 : vector<8x256xf32>
    %c11_i32_23 = arith.constant 11 : i32
    %46 = tpu.dynamic_rotate %45 by %c11_i32_23 dim 1 : vector<8x256xf32>, i32 -> vector<8x256xf32>
    %c10_i32_24 = arith.constant 10 : i32
    %47 = tpu.dynamic_rotate %45 by %c10_i32_24 dim 1 : vector<8x256xf32>, i32 -> vector<8x256xf32>
    %c9_i32_25 = arith.constant 9 : i32
    %48 = tpu.dynamic_rotate %45 by %c9_i32_25 dim 1 : vector<8x256xf32>, i32 -> vector<8x256xf32>
    %c1_i32_26 = arith.constant 1 : i32
    %49 = tpu.dynamic_rotate %45 by %c1_i32_26 dim 1 : vector<8x256xf32>, i32 -> vector<8x256xf32>
    %c255_i32_27 = arith.constant 255 : i32
    %50 = tpu.dynamic_rotate %45 by %c255_i32_27 dim 1 : vector<8x256xf32>, i32 -> vector<8x256xf32>
    %c247_i32_28 = arith.constant 247 : i32
    %51 = tpu.dynamic_rotate %45 by %c247_i32_28 dim 1 : vector<8x256xf32>, i32 -> vector<8x256xf32>
    %c246_i32_29 = arith.constant 246 : i32
    %52 = tpu.dynamic_rotate %45 by %c246_i32_29 dim 1 : vector<8x256xf32>, i32 -> vector<8x256xf32>
    %c245_i32_30 = arith.constant 245 : i32
    %53 = tpu.dynamic_rotate %45 by %c245_i32_30 dim 1 : vector<8x256xf32>, i32 -> vector<8x256xf32>
    %54 = tpu.concatenate %46, %47, %48, %49, %45, %50, %51, %52, %53 in 0 : vector<8x256xf32>, vector<8x256xf32>, vector<8x256xf32>, vector<8x256xf32>, vector<8x256xf32>, vector<8x256xf32>, vector<8x256xf32>, vector<8x256xf32>, vector<8x256xf32> -> vector<72x256xf32>
    %55 = arith.truncf %54 : vector<72x256xf32> to vector<72x256xbf16>
    %c8 = arith.constant 8 : index
    %c0_31 = arith.constant 0 : index
    %56 = vector.load %arg4[%c8, %c0_31] : memref<96x72xbf16, #tpu.memory_space<vmem>>, vector<8x72xbf16>
    %cst_32 = arith.constant dense<0.000000e+00> : vector<8x256xf32>
    %57 = tpu.matmul %56, %55, %cst_32 {dimension_numbers = #tpu.dot_dimension_numbers<[1], [0], [0], [1], [0, 0, 1, 1], [], []>} : vector<8x72xbf16>, vector<72x256xbf16>, vector<8x256xf32> -> vector<8x256xf32>
    %c40 = arith.constant 40 : index
    %c0_33 = arith.constant 0 : index
    %58 = vector.load %arg5[%c40, %c0_33] : memref<224x1xf32, #tpu.memory_space<vmem>>, vector<8x1xf32>
    %59 = vector.broadcast %58 : vector<8x1xf32> to vector<8x256xf32>
    %60 = arith.addf %57, %59 : vector<8x256xf32>
    %61 = arith.addf %60, %27 : vector<8x256xf32>
    %cst_34 = arith.constant 0.000000e+00 : f32
    %62 = vector.broadcast %cst_34 : f32 to vector<8x256xf32>
    %63 = arith.maximumf %61, %62 : vector<8x256xf32>
    %64 = arith.mulf %63, %2 : vector<8x256xf32>
    %c11_i32_35 = arith.constant 11 : i32
    %65 = tpu.dynamic_rotate %64 by %c11_i32_35 dim 1 : vector<8x256xf32>, i32 -> vector<8x256xf32>
    %c10_i32_36 = arith.constant 10 : i32
    %66 = tpu.dynamic_rotate %64 by %c10_i32_36 dim 1 : vector<8x256xf32>, i32 -> vector<8x256xf32>
    %c9_i32_37 = arith.constant 9 : i32
    %67 = tpu.dynamic_rotate %64 by %c9_i32_37 dim 1 : vector<8x256xf32>, i32 -> vector<8x256xf32>
    %c1_i32_38 = arith.constant 1 : i32
    %68 = tpu.dynamic_rotate %64 by %c1_i32_38 dim 1 : vector<8x256xf32>, i32 -> vector<8x256xf32>
    %c255_i32_39 = arith.constant 255 : i32
    %69 = tpu.dynamic_rotate %64 by %c255_i32_39 dim 1 : vector<8x256xf32>, i32 -> vector<8x256xf32>
    %c247_i32_40 = arith.constant 247 : i32
    %70 = tpu.dynamic_rotate %64 by %c247_i32_40 dim 1 : vector<8x256xf32>, i32 -> vector<8x256xf32>
    %c246_i32_41 = arith.constant 246 : i32
    %71 = tpu.dynamic_rotate %64 by %c246_i32_41 dim 1 : vector<8x256xf32>, i32 -> vector<8x256xf32>
    %c245_i32_42 = arith.constant 245 : i32
    %72 = tpu.dynamic_rotate %64 by %c245_i32_42 dim 1 : vector<8x256xf32>, i32 -> vector<8x256xf32>
    %73 = tpu.concatenate %65, %66, %67, %68, %64, %69, %70, %71, %72 in 0 : vector<8x256xf32>, vector<8x256xf32>, vector<8x256xf32>, vector<8x256xf32>, vector<8x256xf32>, vector<8x256xf32>, vector<8x256xf32>, vector<8x256xf32>, vector<8x256xf32> -> vector<72x256xf32>
    %74 = arith.truncf %73 : vector<72x256xf32> to vector<72x256xbf16>
    %c16_43 = arith.constant 16 : index
    %c0_44 = arith.constant 0 : index
    %75 = vector.load %arg4[%c16_43, %c0_44] : memref<96x72xbf16, #tpu.memory_space<vmem>>, vector<8x72xbf16>
    %cst_45 = arith.constant dense<0.000000e+00> : vector<8x256xf32>
    %76 = tpu.matmul %75, %74, %cst_45 {dimension_numbers = #tpu.dot_dimension_numbers<[1], [0], [0], [1], [0, 0, 1, 1], [], []>} : vector<8x72xbf16>, vector<72x256xbf16>, vector<8x256xf32> -> vector<8x256xf32>
    %c48 = arith.constant 48 : index
    %c0_46 = arith.constant 0 : index
    %77 = vector.load %arg5[%c48, %c0_46] : memref<224x1xf32, #tpu.memory_space<vmem>>, vector<8x1xf32>
    %78 = vector.broadcast %77 : vector<8x1xf32> to vector<8x256xf32>
    %79 = arith.addf %76, %78 : vector<8x256xf32>
    %cst_47 = arith.constant 0.000000e+00 : f32
    %80 = vector.broadcast %cst_47 : f32 to vector<8x256xf32>
    %81 = arith.maximumf %79, %80 : vector<8x256xf32>
    %82 = arith.mulf %81, %2 : vector<8x256xf32>
    %c11_i32_48 = arith.constant 11 : i32
    %83 = tpu.dynamic_rotate %82 by %c11_i32_48 dim 1 : vector<8x256xf32>, i32 -> vector<8x256xf32>
    %c10_i32_49 = arith.constant 10 : i32
    %84 = tpu.dynamic_rotate %82 by %c10_i32_49 dim 1 : vector<8x256xf32>, i32 -> vector<8x256xf32>
    %c9_i32_50 = arith.constant 9 : i32
    %85 = tpu.dynamic_rotate %82 by %c9_i32_50 dim 1 : vector<8x256xf32>, i32 -> vector<8x256xf32>
    %c1_i32_51 = arith.constant 1 : i32
    %86 = tpu.dynamic_rotate %82 by %c1_i32_51 dim 1 : vector<8x256xf32>, i32 -> vector<8x256xf32>
    %c255_i32_52 = arith.constant 255 : i32
    %87 = tpu.dynamic_rotate %82 by %c255_i32_52 dim 1 : vector<8x256xf32>, i32 -> vector<8x256xf32>
    %c247_i32_53 = arith.constant 247 : i32
    %88 = tpu.dynamic_rotate %82 by %c247_i32_53 dim 1 : vector<8x256xf32>, i32 -> vector<8x256xf32>
    %c246_i32_54 = arith.constant 246 : i32
    %89 = tpu.dynamic_rotate %82 by %c246_i32_54 dim 1 : vector<8x256xf32>, i32 -> vector<8x256xf32>
    %c245_i32_55 = arith.constant 245 : i32
    %90 = tpu.dynamic_rotate %82 by %c245_i32_55 dim 1 : vector<8x256xf32>, i32 -> vector<8x256xf32>
    %91 = tpu.concatenate %83, %84, %85, %86, %82, %87, %88, %89, %90 in 0 : vector<8x256xf32>, vector<8x256xf32>, vector<8x256xf32>, vector<8x256xf32>, vector<8x256xf32>, vector<8x256xf32>, vector<8x256xf32>, vector<8x256xf32>, vector<8x256xf32> -> vector<72x256xf32>
    %92 = arith.truncf %91 : vector<72x256xf32> to vector<72x256xbf16>
    %c24_56 = arith.constant 24 : index
    %c0_57 = arith.constant 0 : index
    %93 = vector.load %arg4[%c24_56, %c0_57] : memref<96x72xbf16, #tpu.memory_space<vmem>>, vector<8x72xbf16>
    %cst_58 = arith.constant dense<0.000000e+00> : vector<8x256xf32>
    %94 = tpu.matmul %93, %92, %cst_58 {dimension_numbers = #tpu.dot_dimension_numbers<[1], [0], [0], [1], [0, 0, 1, 1], [], []>} : vector<8x72xbf16>, vector<72x256xbf16>, vector<8x256xf32> -> vector<8x256xf32>
    %c56 = arith.constant 56 : index
    %c0_59 = arith.constant 0 : index
    %95 = vector.load %arg5[%c56, %c0_59] : memref<224x1xf32, #tpu.memory_space<vmem>>, vector<8x1xf32>
    %96 = vector.broadcast %95 : vector<8x1xf32> to vector<8x256xf32>
    %97 = arith.addf %94, %96 : vector<8x256xf32>
    %98 = arith.addf %97, %64 : vector<8x256xf32>
    %cst_60 = arith.constant 0.000000e+00 : f32
    %99 = vector.broadcast %cst_60 : f32 to vector<8x256xf32>
    %100 = arith.maximumf %98, %99 : vector<8x256xf32>
    %101 = arith.mulf %100, %2 : vector<8x256xf32>
    %102 = tpu.concatenate %19, %101 in 0 : vector<8x256xf32>, vector<8x256xf32> -> vector<16x256xf32>
    %103 = arith.truncf %102 : vector<16x256xf32> to vector<16x256xbf16>
    %c32_61 = arith.constant 32 : index
    %c0_62 = arith.constant 0 : index
    %104 = vector.load %arg3[%c32_61, %c0_62] : memref<128x16xbf16, #tpu.memory_space<vmem>>, vector<16x16xbf16>
    %cst_63 = arith.constant dense<0.000000e+00> : vector<16x256xf32>
    %105 = tpu.matmul %104, %103, %cst_63 {dimension_numbers = #tpu.dot_dimension_numbers<[1], [0], [0], [1], [0, 0, 1, 1], [], []>} : vector<16x16xbf16>, vector<16x256xbf16>, vector<16x256xf32> -> vector<16x256xf32>
    %c64 = arith.constant 64 : index
    %c0_64 = arith.constant 0 : index
    %106 = vector.load %arg5[%c64, %c0_64] : memref<224x1xf32, #tpu.memory_space<vmem>>, vector<16x1xf32>
    %107 = vector.broadcast %106 : vector<16x1xf32> to vector<16x256xf32>
    %108 = arith.addf %105, %107 : vector<16x256xf32>
    %cst_65 = arith.constant 0.000000e+00 : f32
    %109 = vector.broadcast %cst_65 : f32 to vector<16x256xf32>
    %110 = arith.maximumf %108, %109 : vector<16x256xf32>
    %111 = arith.truncf %110 : vector<16x256xf32> to vector<16x256xbf16>
    %c48_66 = arith.constant 48 : index
    %c0_67 = arith.constant 0 : index
    %112 = vector.load %arg3[%c48_66, %c0_67] : memref<128x16xbf16, #tpu.memory_space<vmem>>, vector<8x16xbf16>
    %cst_68 = arith.constant dense<0.000000e+00> : vector<8x256xf32>
    %113 = tpu.matmul %112, %111, %cst_68 {dimension_numbers = #tpu.dot_dimension_numbers<[1], [0], [0], [1], [0, 0, 1, 1], [], []>} : vector<8x16xbf16>, vector<16x256xbf16>, vector<8x256xf32> -> vector<8x256xf32>
    %c80 = arith.constant 80 : index
    %c0_69 = arith.constant 0 : index
    %114 = vector.load %arg5[%c80, %c0_69] : memref<224x1xf32, #tpu.memory_space<vmem>>, vector<8x1xf32>
    %115 = vector.broadcast %114 : vector<8x1xf32> to vector<8x256xf32>
    %116 = arith.addf %113, %115 : vector<8x256xf32>
    %cst_70 = arith.constant 0.000000e+00 : f32
    %117 = vector.broadcast %cst_70 : f32 to vector<8x256xf32>
    %118 = arith.maximumf %116, %117 : vector<8x256xf32>
    %c56_71 = arith.constant 56 : index
    %c0_72 = arith.constant 0 : index
    %119 = vector.load %arg3[%c56_71, %c0_72] : memref<128x16xbf16, #tpu.memory_space<vmem>>, vector<8x16xbf16>
    %cst_73 = arith.constant dense<0.000000e+00> : vector<8x256xf32>
    %120 = tpu.matmul %119, %111, %cst_73 {dimension_numbers = #tpu.dot_dimension_numbers<[1], [0], [0], [1], [0, 0, 1, 1], [], []>} : vector<8x16xbf16>, vector<16x256xbf16>, vector<8x256xf32> -> vector<8x256xf32>
    %c88 = arith.constant 88 : index
    %c0_74 = arith.constant 0 : index
    %121 = vector.load %arg5[%c88, %c0_74] : memref<224x1xf32, #tpu.memory_space<vmem>>, vector<8x1xf32>
    %122 = vector.broadcast %121 : vector<8x1xf32> to vector<8x256xf32>
    %123 = arith.addf %120, %122 : vector<8x256xf32>
    %cst_75 = arith.constant 0.000000e+00 : f32
    %124 = vector.broadcast %cst_75 : f32 to vector<8x256xf32>
    %125 = arith.maximumf %123, %124 : vector<8x256xf32>
    %126 = arith.mulf %125, %2 : vector<8x256xf32>
    %c11_i32_76 = arith.constant 11 : i32
    %127 = tpu.dynamic_rotate %126 by %c11_i32_76 dim 1 : vector<8x256xf32>, i32 -> vector<8x256xf32>
    %c10_i32_77 = arith.constant 10 : i32
    %128 = tpu.dynamic_rotate %126 by %c10_i32_77 dim 1 : vector<8x256xf32>, i32 -> vector<8x256xf32>
    %c9_i32_78 = arith.constant 9 : i32
    %129 = tpu.dynamic_rotate %126 by %c9_i32_78 dim 1 : vector<8x256xf32>, i32 -> vector<8x256xf32>
    %c1_i32_79 = arith.constant 1 : i32
    %130 = tpu.dynamic_rotate %126 by %c1_i32_79 dim 1 : vector<8x256xf32>, i32 -> vector<8x256xf32>
    %c255_i32_80 = arith.constant 255 : i32
    %131 = tpu.dynamic_rotate %126 by %c255_i32_80 dim 1 : vector<8x256xf32>, i32 -> vector<8x256xf32>
    %c247_i32_81 = arith.constant 247 : i32
    %132 = tpu.dynamic_rotate %126 by %c247_i32_81 dim 1 : vector<8x256xf32>, i32 -> vector<8x256xf32>
    %c246_i32_82 = arith.constant 246 : i32
    %133 = tpu.dynamic_rotate %126 by %c246_i32_82 dim 1 : vector<8x256xf32>, i32 -> vector<8x256xf32>
    %c245_i32_83 = arith.constant 245 : i32
    %134 = tpu.dynamic_rotate %126 by %c245_i32_83 dim 1 : vector<8x256xf32>, i32 -> vector<8x256xf32>
    %135 = tpu.concatenate %127, %128, %129, %130, %126, %131, %132, %133, %134 in 0 : vector<8x256xf32>, vector<8x256xf32>, vector<8x256xf32>, vector<8x256xf32>, vector<8x256xf32>, vector<8x256xf32>, vector<8x256xf32>, vector<8x256xf32>, vector<8x256xf32> -> vector<72x256xf32>
    %136 = arith.truncf %135 : vector<72x256xf32> to vector<72x256xbf16>
    %c32_84 = arith.constant 32 : index
    %c0_85 = arith.constant 0 : index
    %137 = vector.load %arg4[%c32_84, %c0_85] : memref<96x72xbf16, #tpu.memory_space<vmem>>, vector<8x72xbf16>
    %cst_86 = arith.constant dense<0.000000e+00> : vector<8x256xf32>
    %138 = tpu.matmul %137, %136, %cst_86 {dimension_numbers = #tpu.dot_dimension_numbers<[1], [0], [0], [1], [0, 0, 1, 1], [], []>} : vector<8x72xbf16>, vector<72x256xbf16>, vector<8x256xf32> -> vector<8x256xf32>
    %c96 = arith.constant 96 : index
    %c0_87 = arith.constant 0 : index
    %139 = vector.load %arg5[%c96, %c0_87] : memref<224x1xf32, #tpu.memory_space<vmem>>, vector<8x1xf32>
    %140 = vector.broadcast %139 : vector<8x1xf32> to vector<8x256xf32>
    %141 = arith.addf %138, %140 : vector<8x256xf32>
    %cst_88 = arith.constant 0.000000e+00 : f32
    %142 = vector.broadcast %cst_88 : f32 to vector<8x256xf32>
    %143 = arith.maximumf %141, %142 : vector<8x256xf32>
    %144 = arith.mulf %143, %2 : vector<8x256xf32>
    %c11_i32_89 = arith.constant 11 : i32
    %145 = tpu.dynamic_rotate %144 by %c11_i32_89 dim 1 : vector<8x256xf32>, i32 -> vector<8x256xf32>
    %c10_i32_90 = arith.constant 10 : i32
    %146 = tpu.dynamic_rotate %144 by %c10_i32_90 dim 1 : vector<8x256xf32>, i32 -> vector<8x256xf32>
    %c9_i32_91 = arith.constant 9 : i32
    %147 = tpu.dynamic_rotate %144 by %c9_i32_91 dim 1 : vector<8x256xf32>, i32 -> vector<8x256xf32>
    %c1_i32_92 = arith.constant 1 : i32
    %148 = tpu.dynamic_rotate %144 by %c1_i32_92 dim 1 : vector<8x256xf32>, i32 -> vector<8x256xf32>
    %c255_i32_93 = arith.constant 255 : i32
    %149 = tpu.dynamic_rotate %144 by %c255_i32_93 dim 1 : vector<8x256xf32>, i32 -> vector<8x256xf32>
    %c247_i32_94 = arith.constant 247 : i32
    %150 = tpu.dynamic_rotate %144 by %c247_i32_94 dim 1 : vector<8x256xf32>, i32 -> vector<8x256xf32>
    %c246_i32_95 = arith.constant 246 : i32
    %151 = tpu.dynamic_rotate %144 by %c246_i32_95 dim 1 : vector<8x256xf32>, i32 -> vector<8x256xf32>
    %c245_i32_96 = arith.constant 245 : i32
    %152 = tpu.dynamic_rotate %144 by %c245_i32_96 dim 1 : vector<8x256xf32>, i32 -> vector<8x256xf32>
    %153 = tpu.concatenate %145, %146, %147, %148, %144, %149, %150, %151, %152 in 0 : vector<8x256xf32>, vector<8x256xf32>, vector<8x256xf32>, vector<8x256xf32>, vector<8x256xf32>, vector<8x256xf32>, vector<8x256xf32>, vector<8x256xf32>, vector<8x256xf32> -> vector<72x256xf32>
    %154 = arith.truncf %153 : vector<72x256xf32> to vector<72x256xbf16>
    %c40_97 = arith.constant 40 : index
    %c0_98 = arith.constant 0 : index
    %155 = vector.load %arg4[%c40_97, %c0_98] : memref<96x72xbf16, #tpu.memory_space<vmem>>, vector<8x72xbf16>
    %cst_99 = arith.constant dense<0.000000e+00> : vector<8x256xf32>
    %156 = tpu.matmul %155, %154, %cst_99 {dimension_numbers = #tpu.dot_dimension_numbers<[1], [0], [0], [1], [0, 0, 1, 1], [], []>} : vector<8x72xbf16>, vector<72x256xbf16>, vector<8x256xf32> -> vector<8x256xf32>
    %c104 = arith.constant 104 : index
    %c0_100 = arith.constant 0 : index
    %157 = vector.load %arg5[%c104, %c0_100] : memref<224x1xf32, #tpu.memory_space<vmem>>, vector<8x1xf32>
    %158 = vector.broadcast %157 : vector<8x1xf32> to vector<8x256xf32>
    %159 = arith.addf %156, %158 : vector<8x256xf32>
    %160 = arith.addf %159, %126 : vector<8x256xf32>
    %cst_101 = arith.constant 0.000000e+00 : f32
    %161 = vector.broadcast %cst_101 : f32 to vector<8x256xf32>
    %162 = arith.maximumf %160, %161 : vector<8x256xf32>
    %163 = arith.mulf %162, %2 : vector<8x256xf32>
    %c11_i32_102 = arith.constant 11 : i32
    %164 = tpu.dynamic_rotate %163 by %c11_i32_102 dim 1 : vector<8x256xf32>, i32 -> vector<8x256xf32>
    %c10_i32_103 = arith.constant 10 : i32
    %165 = tpu.dynamic_rotate %163 by %c10_i32_103 dim 1 : vector<8x256xf32>, i32 -> vector<8x256xf32>
    %c9_i32_104 = arith.constant 9 : i32
    %166 = tpu.dynamic_rotate %163 by %c9_i32_104 dim 1 : vector<8x256xf32>, i32 -> vector<8x256xf32>
    %c1_i32_105 = arith.constant 1 : i32
    %167 = tpu.dynamic_rotate %163 by %c1_i32_105 dim 1 : vector<8x256xf32>, i32 -> vector<8x256xf32>
    %c255_i32_106 = arith.constant 255 : i32
    %168 = tpu.dynamic_rotate %163 by %c255_i32_106 dim 1 : vector<8x256xf32>, i32 -> vector<8x256xf32>
    %c247_i32_107 = arith.constant 247 : i32
    %169 = tpu.dynamic_rotate %163 by %c247_i32_107 dim 1 : vector<8x256xf32>, i32 -> vector<8x256xf32>
    %c246_i32_108 = arith.constant 246 : i32
    %170 = tpu.dynamic_rotate %163 by %c246_i32_108 dim 1 : vector<8x256xf32>, i32 -> vector<8x256xf32>
    %c245_i32_109 = arith.constant 245 : i32
    %171 = tpu.dynamic_rotate %163 by %c245_i32_109 dim 1 : vector<8x256xf32>, i32 -> vector<8x256xf32>
    %172 = tpu.concatenate %164, %165, %166, %167, %163, %168, %169, %170, %171 in 0 : vector<8x256xf32>, vector<8x256xf32>, vector<8x256xf32>, vector<8x256xf32>, vector<8x256xf32>, vector<8x256xf32>, vector<8x256xf32>, vector<8x256xf32>, vector<8x256xf32> -> vector<72x256xf32>
    %173 = arith.truncf %172 : vector<72x256xf32> to vector<72x256xbf16>
    %c48_110 = arith.constant 48 : index
    %c0_111 = arith.constant 0 : index
    %174 = vector.load %arg4[%c48_110, %c0_111] : memref<96x72xbf16, #tpu.memory_space<vmem>>, vector<8x72xbf16>
    %cst_112 = arith.constant dense<0.000000e+00> : vector<8x256xf32>
    %175 = tpu.matmul %174, %173, %cst_112 {dimension_numbers = #tpu.dot_dimension_numbers<[1], [0], [0], [1], [0, 0, 1, 1], [], []>} : vector<8x72xbf16>, vector<72x256xbf16>, vector<8x256xf32> -> vector<8x256xf32>
    %c112 = arith.constant 112 : index
    %c0_113 = arith.constant 0 : index
    %176 = vector.load %arg5[%c112, %c0_113] : memref<224x1xf32, #tpu.memory_space<vmem>>, vector<8x1xf32>
    %177 = vector.broadcast %176 : vector<8x1xf32> to vector<8x256xf32>
    %178 = arith.addf %175, %177 : vector<8x256xf32>
    %cst_114 = arith.constant 0.000000e+00 : f32
    %179 = vector.broadcast %cst_114 : f32 to vector<8x256xf32>
    %180 = arith.maximumf %178, %179 : vector<8x256xf32>
    %181 = arith.mulf %180, %2 : vector<8x256xf32>
    %c11_i32_115 = arith.constant 11 : i32
    %182 = tpu.dynamic_rotate %181 by %c11_i32_115 dim 1 : vector<8x256xf32>, i32 -> vector<8x256xf32>
    %c10_i32_116 = arith.constant 10 : i32
    %183 = tpu.dynamic_rotate %181 by %c10_i32_116 dim 1 : vector<8x256xf32>, i32 -> vector<8x256xf32>
    %c9_i32_117 = arith.constant 9 : i32
    %184 = tpu.dynamic_rotate %181 by %c9_i32_117 dim 1 : vector<8x256xf32>, i32 -> vector<8x256xf32>
    %c1_i32_118 = arith.constant 1 : i32
    %185 = tpu.dynamic_rotate %181 by %c1_i32_118 dim 1 : vector<8x256xf32>, i32 -> vector<8x256xf32>
    %c255_i32_119 = arith.constant 255 : i32
    %186 = tpu.dynamic_rotate %181 by %c255_i32_119 dim 1 : vector<8x256xf32>, i32 -> vector<8x256xf32>
    %c247_i32_120 = arith.constant 247 : i32
    %187 = tpu.dynamic_rotate %181 by %c247_i32_120 dim 1 : vector<8x256xf32>, i32 -> vector<8x256xf32>
    %c246_i32_121 = arith.constant 246 : i32
    %188 = tpu.dynamic_rotate %181 by %c246_i32_121 dim 1 : vector<8x256xf32>, i32 -> vector<8x256xf32>
    %c245_i32_122 = arith.constant 245 : i32
    %189 = tpu.dynamic_rotate %181 by %c245_i32_122 dim 1 : vector<8x256xf32>, i32 -> vector<8x256xf32>
    %190 = tpu.concatenate %182, %183, %184, %185, %181, %186, %187, %188, %189 in 0 : vector<8x256xf32>, vector<8x256xf32>, vector<8x256xf32>, vector<8x256xf32>, vector<8x256xf32>, vector<8x256xf32>, vector<8x256xf32>, vector<8x256xf32>, vector<8x256xf32> -> vector<72x256xf32>
    %191 = arith.truncf %190 : vector<72x256xf32> to vector<72x256xbf16>
    %c56_123 = arith.constant 56 : index
    %c0_124 = arith.constant 0 : index
    %192 = vector.load %arg4[%c56_123, %c0_124] : memref<96x72xbf16, #tpu.memory_space<vmem>>, vector<8x72xbf16>
    %cst_125 = arith.constant dense<0.000000e+00> : vector<8x256xf32>
    %193 = tpu.matmul %192, %191, %cst_125 {dimension_numbers = #tpu.dot_dimension_numbers<[1], [0], [0], [1], [0, 0, 1, 1], [], []>} : vector<8x72xbf16>, vector<72x256xbf16>, vector<8x256xf32> -> vector<8x256xf32>
    %c120 = arith.constant 120 : index
    %c0_126 = arith.constant 0 : index
    %194 = vector.load %arg5[%c120, %c0_126] : memref<224x1xf32, #tpu.memory_space<vmem>>, vector<8x1xf32>
    %195 = vector.broadcast %194 : vector<8x1xf32> to vector<8x256xf32>
    %196 = arith.addf %193, %195 : vector<8x256xf32>
    %197 = arith.addf %196, %163 : vector<8x256xf32>
    %cst_127 = arith.constant 0.000000e+00 : f32
    %198 = vector.broadcast %cst_127 : f32 to vector<8x256xf32>
    %199 = arith.maximumf %197, %198 : vector<8x256xf32>
    %200 = arith.mulf %199, %2 : vector<8x256xf32>
    %201 = tpu.concatenate %118, %200 in 0 : vector<8x256xf32>, vector<8x256xf32> -> vector<16x256xf32>
    %202 = arith.truncf %201 : vector<16x256xf32> to vector<16x256xbf16>
    %c64_128 = arith.constant 64 : index
    %c0_129 = arith.constant 0 : index
    %203 = vector.load %arg3[%c64_128, %c0_129] : memref<128x16xbf16, #tpu.memory_space<vmem>>, vector<16x16xbf16>
    %cst_130 = arith.constant dense<0.000000e+00> : vector<16x256xf32>
    %204 = tpu.matmul %203, %202, %cst_130 {dimension_numbers = #tpu.dot_dimension_numbers<[1], [0], [0], [1], [0, 0, 1, 1], [], []>} : vector<16x16xbf16>, vector<16x256xbf16>, vector<16x256xf32> -> vector<16x256xf32>
    %c128 = arith.constant 128 : index
    %c0_131 = arith.constant 0 : index
    %205 = vector.load %arg5[%c128, %c0_131] : memref<224x1xf32, #tpu.memory_space<vmem>>, vector<16x1xf32>
    %206 = vector.broadcast %205 : vector<16x1xf32> to vector<16x256xf32>
    %207 = arith.addf %204, %206 : vector<16x256xf32>
    %cst_132 = arith.constant 0.000000e+00 : f32
    %208 = vector.broadcast %cst_132 : f32 to vector<16x256xf32>
    %209 = arith.maximumf %207, %208 : vector<16x256xf32>
    %210 = arith.truncf %209 : vector<16x256xf32> to vector<16x256xbf16>
    %c80_133 = arith.constant 80 : index
    %c0_134 = arith.constant 0 : index
    %211 = vector.load %arg3[%c80_133, %c0_134] : memref<128x16xbf16, #tpu.memory_space<vmem>>, vector<8x16xbf16>
    %cst_135 = arith.constant dense<0.000000e+00> : vector<8x256xf32>
    %212 = tpu.matmul %211, %210, %cst_135 {dimension_numbers = #tpu.dot_dimension_numbers<[1], [0], [0], [1], [0, 0, 1, 1], [], []>} : vector<8x16xbf16>, vector<16x256xbf16>, vector<8x256xf32> -> vector<8x256xf32>
    %c144 = arith.constant 144 : index
    %c0_136 = arith.constant 0 : index
    %213 = vector.load %arg5[%c144, %c0_136] : memref<224x1xf32, #tpu.memory_space<vmem>>, vector<8x1xf32>
    %214 = vector.broadcast %213 : vector<8x1xf32> to vector<8x256xf32>
    %215 = arith.addf %212, %214 : vector<8x256xf32>
    %cst_137 = arith.constant 0.000000e+00 : f32
    %216 = vector.broadcast %cst_137 : f32 to vector<8x256xf32>
    %217 = arith.maximumf %215, %216 : vector<8x256xf32>
    %c88_138 = arith.constant 88 : index
    %c0_139 = arith.constant 0 : index
    %218 = vector.load %arg3[%c88_138, %c0_139] : memref<128x16xbf16, #tpu.memory_space<vmem>>, vector<8x16xbf16>
    %cst_140 = arith.constant dense<0.000000e+00> : vector<8x256xf32>
    %219 = tpu.matmul %218, %210, %cst_140 {dimension_numbers = #tpu.dot_dimension_numbers<[1], [0], [0], [1], [0, 0, 1, 1], [], []>} : vector<8x16xbf16>, vector<16x256xbf16>, vector<8x256xf32> -> vector<8x256xf32>
    %c152 = arith.constant 152 : index
    %c0_141 = arith.constant 0 : index
    %220 = vector.load %arg5[%c152, %c0_141] : memref<224x1xf32, #tpu.memory_space<vmem>>, vector<8x1xf32>
    %221 = vector.broadcast %220 : vector<8x1xf32> to vector<8x256xf32>
    %222 = arith.addf %219, %221 : vector<8x256xf32>
    %cst_142 = arith.constant 0.000000e+00 : f32
    %223 = vector.broadcast %cst_142 : f32 to vector<8x256xf32>
    %224 = arith.maximumf %222, %223 : vector<8x256xf32>
    %225 = arith.mulf %224, %2 : vector<8x256xf32>
    %c11_i32_143 = arith.constant 11 : i32
    %226 = tpu.dynamic_rotate %225 by %c11_i32_143 dim 1 : vector<8x256xf32>, i32 -> vector<8x256xf32>
    %c10_i32_144 = arith.constant 10 : i32
    %227 = tpu.dynamic_rotate %225 by %c10_i32_144 dim 1 : vector<8x256xf32>, i32 -> vector<8x256xf32>
    %c9_i32_145 = arith.constant 9 : i32
    %228 = tpu.dynamic_rotate %225 by %c9_i32_145 dim 1 : vector<8x256xf32>, i32 -> vector<8x256xf32>
    %c1_i32_146 = arith.constant 1 : i32
    %229 = tpu.dynamic_rotate %225 by %c1_i32_146 dim 1 : vector<8x256xf32>, i32 -> vector<8x256xf32>
    %c255_i32_147 = arith.constant 255 : i32
    %230 = tpu.dynamic_rotate %225 by %c255_i32_147 dim 1 : vector<8x256xf32>, i32 -> vector<8x256xf32>
    %c247_i32_148 = arith.constant 247 : i32
    %231 = tpu.dynamic_rotate %225 by %c247_i32_148 dim 1 : vector<8x256xf32>, i32 -> vector<8x256xf32>
    %c246_i32_149 = arith.constant 246 : i32
    %232 = tpu.dynamic_rotate %225 by %c246_i32_149 dim 1 : vector<8x256xf32>, i32 -> vector<8x256xf32>
    %c245_i32_150 = arith.constant 245 : i32
    %233 = tpu.dynamic_rotate %225 by %c245_i32_150 dim 1 : vector<8x256xf32>, i32 -> vector<8x256xf32>
    %234 = tpu.concatenate %226, %227, %228, %229, %225, %230, %231, %232, %233 in 0 : vector<8x256xf32>, vector<8x256xf32>, vector<8x256xf32>, vector<8x256xf32>, vector<8x256xf32>, vector<8x256xf32>, vector<8x256xf32>, vector<8x256xf32>, vector<8x256xf32> -> vector<72x256xf32>
    %235 = arith.truncf %234 : vector<72x256xf32> to vector<72x256xbf16>
    %c64_151 = arith.constant 64 : index
    %c0_152 = arith.constant 0 : index
    %236 = vector.load %arg4[%c64_151, %c0_152] : memref<96x72xbf16, #tpu.memory_space<vmem>>, vector<8x72xbf16>
    %cst_153 = arith.constant dense<0.000000e+00> : vector<8x256xf32>
    %237 = tpu.matmul %236, %235, %cst_153 {dimension_numbers = #tpu.dot_dimension_numbers<[1], [0], [0], [1], [0, 0, 1, 1], [], []>} : vector<8x72xbf16>, vector<72x256xbf16>, vector<8x256xf32> -> vector<8x256xf32>
    %c160 = arith.constant 160 : index
    %c0_154 = arith.constant 0 : index
    %238 = vector.load %arg5[%c160, %c0_154] : memref<224x1xf32, #tpu.memory_space<vmem>>, vector<8x1xf32>
    %239 = vector.broadcast %238 : vector<8x1xf32> to vector<8x256xf32>
    %240 = arith.addf %237, %239 : vector<8x256xf32>
    %cst_155 = arith.constant 0.000000e+00 : f32
    %241 = vector.broadcast %cst_155 : f32 to vector<8x256xf32>
    %242 = arith.maximumf %240, %241 : vector<8x256xf32>
    %243 = arith.mulf %242, %2 : vector<8x256xf32>
    %c11_i32_156 = arith.constant 11 : i32
    %244 = tpu.dynamic_rotate %243 by %c11_i32_156 dim 1 : vector<8x256xf32>, i32 -> vector<8x256xf32>
    %c10_i32_157 = arith.constant 10 : i32
    %245 = tpu.dynamic_rotate %243 by %c10_i32_157 dim 1 : vector<8x256xf32>, i32 -> vector<8x256xf32>
    %c9_i32_158 = arith.constant 9 : i32
    %246 = tpu.dynamic_rotate %243 by %c9_i32_158 dim 1 : vector<8x256xf32>, i32 -> vector<8x256xf32>
    %c1_i32_159 = arith.constant 1 : i32
    %247 = tpu.dynamic_rotate %243 by %c1_i32_159 dim 1 : vector<8x256xf32>, i32 -> vector<8x256xf32>
    %c255_i32_160 = arith.constant 255 : i32
    %248 = tpu.dynamic_rotate %243 by %c255_i32_160 dim 1 : vector<8x256xf32>, i32 -> vector<8x256xf32>
    %c247_i32_161 = arith.constant 247 : i32
    %249 = tpu.dynamic_rotate %243 by %c247_i32_161 dim 1 : vector<8x256xf32>, i32 -> vector<8x256xf32>
    %c246_i32_162 = arith.constant 246 : i32
    %250 = tpu.dynamic_rotate %243 by %c246_i32_162 dim 1 : vector<8x256xf32>, i32 -> vector<8x256xf32>
    %c245_i32_163 = arith.constant 245 : i32
    %251 = tpu.dynamic_rotate %243 by %c245_i32_163 dim 1 : vector<8x256xf32>, i32 -> vector<8x256xf32>
    %252 = tpu.concatenate %244, %245, %246, %247, %243, %248, %249, %250, %251 in 0 : vector<8x256xf32>, vector<8x256xf32>, vector<8x256xf32>, vector<8x256xf32>, vector<8x256xf32>, vector<8x256xf32>, vector<8x256xf32>, vector<8x256xf32>, vector<8x256xf32> -> vector<72x256xf32>
    %253 = arith.truncf %252 : vector<72x256xf32> to vector<72x256xbf16>
    %c72 = arith.constant 72 : index
    %c0_164 = arith.constant 0 : index
    %254 = vector.load %arg4[%c72, %c0_164] : memref<96x72xbf16, #tpu.memory_space<vmem>>, vector<8x72xbf16>
    %cst_165 = arith.constant dense<0.000000e+00> : vector<8x256xf32>
    %255 = tpu.matmul %254, %253, %cst_165 {dimension_numbers = #tpu.dot_dimension_numbers<[1], [0], [0], [1], [0, 0, 1, 1], [], []>} : vector<8x72xbf16>, vector<72x256xbf16>, vector<8x256xf32> -> vector<8x256xf32>
    %c168 = arith.constant 168 : index
    %c0_166 = arith.constant 0 : index
    %256 = vector.load %arg5[%c168, %c0_166] : memref<224x1xf32, #tpu.memory_space<vmem>>, vector<8x1xf32>
    %257 = vector.broadcast %256 : vector<8x1xf32> to vector<8x256xf32>
    %258 = arith.addf %255, %257 : vector<8x256xf32>
    %259 = arith.addf %258, %225 : vector<8x256xf32>
    %cst_167 = arith.constant 0.000000e+00 : f32
    %260 = vector.broadcast %cst_167 : f32 to vector<8x256xf32>
    %261 = arith.maximumf %259, %260 : vector<8x256xf32>
    %262 = arith.mulf %261, %2 : vector<8x256xf32>
    %c11_i32_168 = arith.constant 11 : i32
    %263 = tpu.dynamic_rotate %262 by %c11_i32_168 dim 1 : vector<8x256xf32>, i32 -> vector<8x256xf32>
    %c10_i32_169 = arith.constant 10 : i32
    %264 = tpu.dynamic_rotate %262 by %c10_i32_169 dim 1 : vector<8x256xf32>, i32 -> vector<8x256xf32>
    %c9_i32_170 = arith.constant 9 : i32
    %265 = tpu.dynamic_rotate %262 by %c9_i32_170 dim 1 : vector<8x256xf32>, i32 -> vector<8x256xf32>
    %c1_i32_171 = arith.constant 1 : i32
    %266 = tpu.dynamic_rotate %262 by %c1_i32_171 dim 1 : vector<8x256xf32>, i32 -> vector<8x256xf32>
    %c255_i32_172 = arith.constant 255 : i32
    %267 = tpu.dynamic_rotate %262 by %c255_i32_172 dim 1 : vector<8x256xf32>, i32 -> vector<8x256xf32>
    %c247_i32_173 = arith.constant 247 : i32
    %268 = tpu.dynamic_rotate %262 by %c247_i32_173 dim 1 : vector<8x256xf32>, i32 -> vector<8x256xf32>
    %c246_i32_174 = arith.constant 246 : i32
    %269 = tpu.dynamic_rotate %262 by %c246_i32_174 dim 1 : vector<8x256xf32>, i32 -> vector<8x256xf32>
    %c245_i32_175 = arith.constant 245 : i32
    %270 = tpu.dynamic_rotate %262 by %c245_i32_175 dim 1 : vector<8x256xf32>, i32 -> vector<8x256xf32>
    %271 = tpu.concatenate %263, %264, %265, %266, %262, %267, %268, %269, %270 in 0 : vector<8x256xf32>, vector<8x256xf32>, vector<8x256xf32>, vector<8x256xf32>, vector<8x256xf32>, vector<8x256xf32>, vector<8x256xf32>, vector<8x256xf32>, vector<8x256xf32> -> vector<72x256xf32>
    %272 = arith.truncf %271 : vector<72x256xf32> to vector<72x256xbf16>
    %c80_176 = arith.constant 80 : index
    %c0_177 = arith.constant 0 : index
    %273 = vector.load %arg4[%c80_176, %c0_177] : memref<96x72xbf16, #tpu.memory_space<vmem>>, vector<8x72xbf16>
    %cst_178 = arith.constant dense<0.000000e+00> : vector<8x256xf32>
    %274 = tpu.matmul %273, %272, %cst_178 {dimension_numbers = #tpu.dot_dimension_numbers<[1], [0], [0], [1], [0, 0, 1, 1], [], []>} : vector<8x72xbf16>, vector<72x256xbf16>, vector<8x256xf32> -> vector<8x256xf32>
    %c176 = arith.constant 176 : index
    %c0_179 = arith.constant 0 : index
    %275 = vector.load %arg5[%c176, %c0_179] : memref<224x1xf32, #tpu.memory_space<vmem>>, vector<8x1xf32>
    %276 = vector.broadcast %275 : vector<8x1xf32> to vector<8x256xf32>
    %277 = arith.addf %274, %276 : vector<8x256xf32>
    %cst_180 = arith.constant 0.000000e+00 : f32
    %278 = vector.broadcast %cst_180 : f32 to vector<8x256xf32>
    %279 = arith.maximumf %277, %278 : vector<8x256xf32>
    %280 = arith.mulf %279, %2 : vector<8x256xf32>
    %c11_i32_181 = arith.constant 11 : i32
    %281 = tpu.dynamic_rotate %280 by %c11_i32_181 dim 1 : vector<8x256xf32>, i32 -> vector<8x256xf32>
    %c10_i32_182 = arith.constant 10 : i32
    %282 = tpu.dynamic_rotate %280 by %c10_i32_182 dim 1 : vector<8x256xf32>, i32 -> vector<8x256xf32>
    %c9_i32_183 = arith.constant 9 : i32
    %283 = tpu.dynamic_rotate %280 by %c9_i32_183 dim 1 : vector<8x256xf32>, i32 -> vector<8x256xf32>
    %c1_i32_184 = arith.constant 1 : i32
    %284 = tpu.dynamic_rotate %280 by %c1_i32_184 dim 1 : vector<8x256xf32>, i32 -> vector<8x256xf32>
    %c255_i32_185 = arith.constant 255 : i32
    %285 = tpu.dynamic_rotate %280 by %c255_i32_185 dim 1 : vector<8x256xf32>, i32 -> vector<8x256xf32>
    %c247_i32_186 = arith.constant 247 : i32
    %286 = tpu.dynamic_rotate %280 by %c247_i32_186 dim 1 : vector<8x256xf32>, i32 -> vector<8x256xf32>
    %c246_i32_187 = arith.constant 246 : i32
    %287 = tpu.dynamic_rotate %280 by %c246_i32_187 dim 1 : vector<8x256xf32>, i32 -> vector<8x256xf32>
    %c245_i32_188 = arith.constant 245 : i32
    %288 = tpu.dynamic_rotate %280 by %c245_i32_188 dim 1 : vector<8x256xf32>, i32 -> vector<8x256xf32>
    %289 = tpu.concatenate %281, %282, %283, %284, %280, %285, %286, %287, %288 in 0 : vector<8x256xf32>, vector<8x256xf32>, vector<8x256xf32>, vector<8x256xf32>, vector<8x256xf32>, vector<8x256xf32>, vector<8x256xf32>, vector<8x256xf32>, vector<8x256xf32> -> vector<72x256xf32>
    %290 = arith.truncf %289 : vector<72x256xf32> to vector<72x256xbf16>
    %c88_189 = arith.constant 88 : index
    %c0_190 = arith.constant 0 : index
    %291 = vector.load %arg4[%c88_189, %c0_190] : memref<96x72xbf16, #tpu.memory_space<vmem>>, vector<8x72xbf16>
    %cst_191 = arith.constant dense<0.000000e+00> : vector<8x256xf32>
    %292 = tpu.matmul %291, %290, %cst_191 {dimension_numbers = #tpu.dot_dimension_numbers<[1], [0], [0], [1], [0, 0, 1, 1], [], []>} : vector<8x72xbf16>, vector<72x256xbf16>, vector<8x256xf32> -> vector<8x256xf32>
    %c184 = arith.constant 184 : index
    %c0_192 = arith.constant 0 : index
    %293 = vector.load %arg5[%c184, %c0_192] : memref<224x1xf32, #tpu.memory_space<vmem>>, vector<8x1xf32>
    %294 = vector.broadcast %293 : vector<8x1xf32> to vector<8x256xf32>
    %295 = arith.addf %292, %294 : vector<8x256xf32>
    %296 = arith.addf %295, %262 : vector<8x256xf32>
    %cst_193 = arith.constant 0.000000e+00 : f32
    %297 = vector.broadcast %cst_193 : f32 to vector<8x256xf32>
    %298 = arith.maximumf %296, %297 : vector<8x256xf32>
    %299 = arith.mulf %298, %2 : vector<8x256xf32>
    %300 = tpu.concatenate %217, %299 in 0 : vector<8x256xf32>, vector<8x256xf32> -> vector<16x256xf32>
    %301 = arith.truncf %300 : vector<16x256xf32> to vector<16x256xbf16>
    %c96_194 = arith.constant 96 : index
    %c0_195 = arith.constant 0 : index
    %302 = vector.load %arg3[%c96_194, %c0_195] : memref<128x16xbf16, #tpu.memory_space<vmem>>, vector<32x16xbf16>
    %cst_196 = arith.constant dense<0.000000e+00> : vector<32x256xf32>
    %303 = tpu.matmul %302, %301, %cst_196 {dimension_numbers = #tpu.dot_dimension_numbers<[1], [0], [0], [1], [0, 0, 1, 1], [], []>} : vector<32x16xbf16>, vector<16x256xbf16>, vector<32x256xf32> -> vector<32x256xf32>
    %c192 = arith.constant 192 : index
    %c0_197 = arith.constant 0 : index
    %304 = vector.load %arg5[%c192, %c0_197] : memref<224x1xf32, #tpu.memory_space<vmem>>, vector<32x1xf32>
    %305 = vector.broadcast %304 : vector<32x1xf32> to vector<32x256xf32>
    %306 = arith.addf %303, %305 : vector<32x256xf32>
    %cst_198 = arith.constant 0.000000e+00 : f32
    %307 = vector.broadcast %cst_198 : f32 to vector<32x256xf32>
    %308 = arith.maximumf %306, %307 : vector<32x256xf32>
    %309 = arith.truncf %308 : vector<32x256xf32> to vector<32x256xbf16>
    %c0_199 = arith.constant 0 : index
    %c0_200 = arith.constant 0 : index
    %310 = vector.load %arg2[%c0_199, %c0_200] : memref<256x2xbf16, #tpu.memory_space<vmem>>, vector<256x2xbf16>
    %cst_201 = arith.constant dense<0.000000e+00> : vector<32x2xf32>
    %311 = tpu.matmul %309, %310, %cst_201 {dimension_numbers = #tpu.dot_dimension_numbers<[1], [0], [0], [1], [0, 0, 1, 1], [], []>} : vector<32x256xbf16>, vector<256x2xbf16>, vector<32x2xf32> -> vector<32x2xf32>
    %c0_202 = arith.constant 0 : index
    %c0_203 = arith.constant 0 : index
    %312 = vector.load %arg6[%c0_202, %c0_203] : memref<32x1xf32, #tpu.memory_space<vmem>>, vector<32x1xf32>
    %313 = vector.broadcast %312 : vector<32x1xf32> to vector<32x2xf32>
    %314 = arith.mulf %311, %313 : vector<32x2xf32>
    %cst_204 = arith.constant dense<0.000000e+00> : vector<2xf32>
    %315 = vector.multi_reduction <add>, %314, %cst_204 [0] : vector<32x2xf32> to vector<2xf32>
    %316 = vector.shape_cast %315 : vector<2xf32> to vector<1x2xf32>
    %c0_205 = arith.constant 0 : index
    %c0_206 = arith.constant 0 : index
    %317 = vector.load %arg7[%c0_205, %c0_206] : memref<1x1xf32, #tpu.memory_space<vmem>>, vector<1x1xf32>
    %318 = vector.broadcast %317 : vector<1x1xf32> to vector<1x2xf32>
    %319 = arith.addf %316, %318 : vector<1x2xf32>
    %320 = arith.negf %319 : vector<1x2xf32>
    %321 = math.exp %320 : vector<1x2xf32>
    %cst_207 = arith.constant 1.000000e+00 : f32
    %322 = vector.broadcast %cst_207 : f32 to vector<1x2xf32>
    %323 = arith.addf %322, %321 : vector<1x2xf32>
    %324 = arith.divf %322, %323 : vector<1x2xf32>
    %c0_208 = arith.constant 0 : index
    %c0_209 = arith.constant 0 : index
    %325 = vector.load %arg8[%c0_208, %c0_209] : memref<1x2xf32, #tpu.memory_space<vmem>>, vector<1x2xf32>
    tpu.vector_store %arg8[%c0_208, %c0_209], %324 {strides = array<i32>} : memref<1x2xf32, #tpu.memory_space<vmem>>, vector<1x2xf32>,
    return
  }
}

</mosaic_0001>

<bundles_post_ra>
// kernel: tinyvad_forward.1
= control target key start
LH: loop header
LB: loop body
LE: loop exit
PB: predicated region body
PF: predicated region fallthrough
CT: control target
= control target key end

     0   :  { %s4019_s0 = inlined_call_operand.vmem [shape: f32[16,256], index: 0, kind: input, shape index: {}]   ;;  %s4020_s1 = inlined_call_operand.vmem [shape: f32[1,256], index: 1, kind: input, shape index: {}]   ;;  %s4021_s2 = inlined_call_operand.vmem [shape: bf16[256,2], index: 2, kind: input, shape index: {}]   ;;  %s4022_s3 = inlined_call_operand.vmem [shape: bf16[128,16], index: 3, kind: input, shape index: {}]   ;;  %s4023_s4 = inlined_call_operand.vmem [shape: bf16[96,72], index: 4, kind: input, shape index: {}]   ;;  %s4024_s5 = inlined_call_operand.vmem [shape: f32[224,1], index: 5, kind: input, shape index: {}]   ;;  %s4025_s6 = inlined_call_operand.vmem [shape: f32[32,1], index: 6, kind: input, shape index: {}]   ;;  %s4026_s7 = inlined_call_operand.<no memory space> [shape: f32[1,1], index: 7, kind: input, shape index: {}]   ;;  %s4027_s8 = inlined_call_operand.hbm [shape: f32[1,2], index: 8, kind: output, shape index: {}]  }
   0x1   :  { %v13_v0 = vstv %s4026_s7 }
   0x2   :  { %14 = vst [vmem:[#allocation2] sm:$0x1] %v13_v0 }
   0x3   :  { %v46_v1 = vld [vmem:[%s4019_s0 + $0x8] sm:$0xff]  ;;  %v48_v2 = vld [vmem:[%s4019_s0 + $0x18] sm:$0xff]  ;;  %v45_v3 = vld [vmem:[%s4019_s0] sm:$0xff]  ;;  %v3032_v6 = vmov 0   ;;  %vm70_vm0 = vcmask 130048  }
   0x4   :  { %v50_v4 = vpack.c.bf16 %v48_v2, %v46_v1  ;;  %v47_v5 = vld [vmem:[%s4019_s0 + $0x10] sm:$0xff]  ;;  %106 = vmatprep.mubr.bf16.mxu0 %v3032_v6  ;;  %2503 = vset.pattern.permute.xlu0 %v3032_v6  ;;  %v2985_v8 = vld [vmem:[%s4022_s3] sm:$0xff]   ;;  %v54_v10 = vld [vmem:[%s4024_s5 + $0x8] sm:$0xff] }
   0x5   :  { %v49_v7 = vpack.c.bf16 %v47_v5, %v45_v3  ;;  %v53_v9 = vld [vmem:[%s4024_s5] sm:$0xff]  ;;  %2504 = vset.pattern.permute.xlu1 %v3032_v6  ;;  %165 = vmatprep.mubr.bf16.mxu1 %v3032_v6 }
   0x6   :  { %88 = vmatprep.subr.bf16.mxu0 %v50_v4  ;;  %57 = vperm.xlu0 %2503, %v53_v9  }
   0x7   :  { %89 = vmatpush1.bf16.msra.mxu0 %v49_v7 }
   0xa   :  { %2409 = vmatmul.mubr.msk.bf16.vlgmr.msra.gmra.mxu0 %vm70_vm0, %v2985_v8  ;;  %62 = vperm.xlu0 %2503, %v54_v10  }
   0xb   :  { %218 = vmatprep.mubr.bf16.mxu0 %v3032_v6 }
   0xc   :  { %15 = vsyncpa [#allocation4], 0  ;;  %v177_v11 = vld [vmem:[%s4024_s5 + $0x18] sm:$0xff]  ;;  %v176_v28 = vld [vmem:[%s4022_s3 + $0xc] sm:$0xf]  ;;  %v35_v29 = vlaneseq  ;;  %s3034_s27 = smov 117  }
   0xd   :  { %180 = vperm.xlu1 %2504, %v177_v11   ;;  %v123_v32 = vld [vmem:[%s4022_s3 + $0x8] sm:$0xf]  ;;  %v33_v35 = vld [vmem:[%s4020_s1] sm:$0x3]  ;;  %s3033_s1 = smov 119   ;;  %s3035_s28 = smov 127  }
   0xe   :  { %v3125_v30 = vshrl.u32 %v35_v29, 7  ;;  %s3036_s29 = smov 118   ;;  %s3037_s30 = smov 1   ;;  %v300_v49 = vld [vmem:[%s4024_s5 + $0x20] sm:$0xff]  ;;  %v3162_v50 = vand.u32 127, %v35_v29  ;;  %vm310_vm3 = vcmask 1043456  }
   0xf   :  { %s3038_s9 = smov 9   ;;  %s3039_s10 = smov 10   ;;  %vm306_vm10 = vcmask 588800   ;;  %vm2361_vm11 = vcmask 15360   ;;  %vm2392_vm12 = vcmask 8192  }
  0x10   :  { %v37_v33 = vsub.s32 0, %v3125_v30  ;;  %v41_v34 = vsub.s32 1, %v3125_v30  ;;  %s3040_s11 = smov 11   ;;  %vm286_vm1 = vcmp.lt.s32.totalorder %v3162_v50, 117  ;;  %vm272_vm2 = vcmp.lt.s32.totalorder %v3162_v50, 119 }
  0x11   :  { %vm265_vm4 = vcmp.lt.s32.totalorder %v3162_v50, 127  ;;  %vm279_vm5 = vcmp.lt.s32.totalorder %v3162_v50, 118  ;;  %vm258_vm6 = vcmp.lt.s32.totalorder %v3162_v50, 1  ;;  %vm251_vm7 = vcmp.lt.s32.totalorder %v3162_v50, 9 }
  0x12   :  { %v3139_v39 = vrot.slane %v33_v35, %v37_v33  ;;  %v3141_v41 = vrot.slane %v33_v35, %v41_v34  ;;  %vm244_vm8 = vcmp.lt.s32.totalorder %v3162_v50, 10  ;;  %vm237_vm9 = vcmp.lt.s32.totalorder %v3162_v50, 11  ;;  %v2991_v50 = vld [vmem:[%s4021_s2 + $0x38] sm:$0xff]  }
  0x81   :  { %v58_v12 = vpop.permute.xlu0 %57 }
  0x85   :  { %v63_v15 = vpop.permute.xlu0 %62 }
  0x88   :  { %v181_v31 = vpop.permute.xlu1 %180 }
  0xca   :  { %v108_v13 = vpop.f32.mrf.mxu0 }
  0xcb   :  { %v109_v19 = vadd.f32 %v108_v13, %v58_v12 }
  0xcc   :  { %v110_v14 = vpop.f32.mrf.mxu0 }
  0xcd   :  { %v111_v17 = vadd.f32 %v110_v14, %v58_v12  ;;  %v117_v25 = vmax.f32 %v109_v19, 0.0 }
  0xce   :  { %v112_v16 = vpop.f32.mrf.mxu0 }
  0xcf   :  { %v113_v18 = vadd.f32 %v112_v16, %v63_v15  ;;  %v118_v23 = vmax.f32 %v111_v17, 0.0 }
  0xd0   :  { %v114_v20 = vpop.f32.mrf.mxu0 }
  0xd1   :  { %v115_v21 = vadd.f32 %v114_v20, %v63_v15  ;;  %v119_v22 = vmax.f32 %v113_v18, 0.0 }
  0xd3   :  { %v120_v24 = vmax.f32 %v115_v21, 0.0  ;;  %v121_v27 = vpack.c.bf16 %v119_v22, %v117_v25 }
  0xd5   :  { %v122_v26 = vpack.c.bf16 %v120_v24, %v118_v23 }
  0xd7   :  { %147 = vmatprep.subr.bf16.mxu1 %v122_v26  ;;  %200 = vmatprep.subr.bf16.mxu0 %v122_v26 }
  0xd8   :  { %148 = vmatpush1.bf16.msra.mxu1 %v121_v27  ;;  %201 = vmatpush1.bf16.msra.mxu0 %v121_v27 }
  0xdb   :  { %2411 = vmatmul.mubr.msk.bf16.vlgmr.msra.gmra.mxu0 %vm70_vm0, %v176_v28  ;;  %2410 = vmatmul.mubr.msk.bf16.vlgmr.msra.gmra.mxu1 %vm70_vm0, %v123_v32 }
  0xdc   :  { %708 = vmatprep.mubr.bf16.mxu0 %v3032_v6  ;;  %349 = vmatprep.mubr.bf16.mxu1 %v3032_v6 }
 0x19b   :  { %v220_v36 = vpop.f32.mrf.mxu0 }
 0x19c   :  { %v221_v37 = vadd.f32 %v220_v36, %v181_v31 }
 0x19d   :  { %v222_v38 = vpop.f32.mrf.mxu0 }
 0x19e   :  { %v227_v40 = vmax.f32 %v221_v37, 0.0  ;;  %v223_v42 = vadd.f32 %v222_v38, %v181_v31 }
 0x19f   :  { %v224_v43 = vpop.f32.mrf.mxu0 }
 0x1a0   :  { %v228_v44 = vmax.f32 %v223_v42, 0.0  ;;  %v3144_v46 = vmul.f32 %v227_v40, %v3139_v39  ;;  %v299_v43 = vld [vmem:[%s4023_s4] sm:$0xf] }
 0x1a1   :  { %v225_v45 = vpop.f32.mrf.mxu0 }
 0x1a2   :  { %v3147_v47 = vmul.f32 %v228_v44, %v3141_v41  ;;  %v3213_v44 = vpop.f32.mrf.mxu1 }
 0x1a4   :  { %v2510_v48 = vpack.i.bf16 %v3147_v47, %v3144_v46  ;;  %v3215_v45 = vpop.f32.mrf.mxu1 }
 0x1a6   :  { %2511 = vrot.lane.b32.xlu0 %v2510_v48, %s3033_s1  ;;  %2506 = vrot.lane.b32.xlu1 %v2510_v48, %s3034_s27 }
 0x1aa   :  { %2521 = vrot.lane.b32.xlu0 %v2510_v48, %s3035_s28  ;;  %2516 = vrot.lane.b32.xlu1 %v2510_v48, %s3036_s29 }
 0x1ae   :  { %2531 = vrot.lane.b32.xlu0 %v2510_v48, %s3037_s30  ;;  %2526 = vrot.lane.b32.xlu1 %v2510_v48, %s3038_s9 }
 0x1b2   :  { %2541 = vrot.lane.b32.xlu0 %v2510_v48, %s3039_s10  ;;  %2536 = vrot.lane.b32.xlu1 %v2510_v48, %s3040_s11  ;;  %v171_v48 = vpop.f32.mrf.mxu1 }
 0x1b6   :  { %303 = vperm.xlu1 %2504, %v300_v49   ;;  %v172_v49 = vpop.f32.mrf.mxu1 }
 0x218   :  { %v2512_v51 = vpop.permute.xlu0 %2511  ;;  %v2507_v52 = vpop.permute.xlu1 %2506 }
 0x219   :  { %v2509_v53 = vunpack.i.h.bf16 %v2507_v52  ;;  %v2508_v54 = vunpack.i.l.bf16 %v2507_v52  ;;  %v2514_v55 = vunpack.i.h.bf16 %v2512_v51  ;;  %v2513_v56 = vunpack.i.l.bf16 %v2512_v51 }
 0x21b   :  { %v288_v57 = vsel %vm286_vm1, %v2509_v53, %v2508_v54  ;;  %v287_v58 = vsel %vm286_vm1, %v2508_v54, %v2509_v53  ;;  %v273_v3 = vsel %vm272_vm2, %v2513_v56, %v2514_v55  ;;  %v274_v7 = vsel %vm272_vm2, %v2514_v55, %v2513_v56 }
 0x21c   :  { %v2522_v59 = vpop.permute.xlu0 %2521  ;;  %v2517_v60 = vpop.permute.xlu1 %2516  ;;  %v298_v61 = vpack.c.bf16 %v288_v57, %v288_v57  ;;  %v297_v62 = vpack.c.bf16 %v287_v58, %v287_v58 }
 0x21d   :  { %v2524_v63 = vunpack.i.h.bf16 %v2522_v59  ;;  %v2523_v0 = vunpack.i.l.bf16 %v2522_v59  ;;  %v2519_v1 = vunpack.i.h.bf16 %v2517_v60  ;;  %v2518_v2 = vunpack.i.l.bf16 %v2517_v60 }
 0x21e   :  { %2412 = vmatprep.subr.msk.bf16.mxu1 %vm310_vm3, %v298_v61  ;;  %v312_v4 = vsel %vm310_vm3, %v297_v62, 0 }
 0x21f   :  { %v280_v5 = vsel %vm279_vm5, %v2518_v2, %v2519_v1  ;;  %324 = vmatpush1.bf16.msra.mxu1 %v312_v4  ;;  %v281_v8 = vsel %vm279_vm5, %v2519_v1, %v2518_v2  ;;  %v267_v9 = vsel %vm265_vm4, %v2524_v63, %v2523_v0  ;;  %v266_v10 = vsel %vm265_vm4, %v2523_v0, %v2524_v63  ;;  %v421_v63 = vld [vmem:[%s4024_s5 + $0x28] sm:$0xff] }
 0x220   :  { %v2532_v11 = vpop.permute.xlu0 %2531  ;;  %v2527_v12 = vpop.permute.xlu1 %2526  ;;  %v296_v13 = vpack.c.bf16 %v281_v8, %v274_v7  ;;  %v295_v14 = vpack.c.bf16 %v280_v5, %v273_v3  ;;  %v294_v19 = vpack.c.bf16 %v267_v9, %v3147_v47  ;;  %v293_v24 = vpack.c.bf16 %v266_v10, %v3144_v46 }
 0x221   :  { %v2534_v15 = vunpack.i.h.bf16 %v2532_v11  ;;  %v2533_v16 = vunpack.i.l.bf16 %v2532_v11  ;;  %v2529_v17 = vunpack.i.h.bf16 %v2527_v12  ;;  %v2528_v18 = vunpack.i.l.bf16 %v2527_v12 }
 0x222   :  { %325 = vmatprep.subr.bf16.mxu1 %v296_v13 }
 0x223   :  { %326 = vmatpush1.bf16.msra.mxu1 %v295_v14  ;;  %v252_v20 = vsel %vm251_vm7, %v2528_v18, %v2529_v17  ;;  %v259_v21 = vsel %vm258_vm6, %v2533_v16, %v2534_v15  ;;  %v260_v29 = vsel %vm258_vm6, %v2534_v15, %v2533_v16  ;;  %v253_v31 = vsel %vm251_vm7, %v2529_v17, %v2528_v18 }
 0x224   :  { %v2542_v22 = vpop.permute.xlu0 %2541  ;;  %v2537_v23 = vpop.permute.xlu1 %2536  ;;  %327 = vmatprep.subr.bf16.mxu1 %v294_v19  ;;  %v292_v32 = vpack.c.bf16 %v259_v21, %v252_v20  ;;  %v291_v36 = vpack.c.bf16 %v260_v29, %v253_v31 }
 0x225   :  { %v2544_v25 = vunpack.i.h.bf16 %v2542_v22  ;;  %v2543_v26 = vunpack.i.l.bf16 %v2542_v22  ;;  %v2539_v27 = vunpack.i.h.bf16 %v2537_v23  ;;  %v2538_v28 = vunpack.i.l.bf16 %v2537_v23 }
 0x227   :  { %328 = vmatpush1.bf16.msra.mxu1 %v293_v24  ;;  %v238_v34 = vsel %vm237_vm9, %v2538_v28, %v2539_v27  ;;  %v245_v35 = vsel %vm244_vm8, %v2543_v26, %v2544_v25  ;;  %v246_v37 = vsel %vm244_vm8, %v2544_v25, %v2543_v26  ;;  %v239_v38 = vsel %vm237_vm9, %v2539_v27, %v2538_v28 }
 0x228   :  { %329 = vmatprep.subr.bf16.mxu1 %v292_v32  ;;  %v290_v40 = vpack.c.bf16 %v245_v35, %v238_v34  ;;  %v289_v42 = vpack.c.bf16 %v246_v37, %v239_v38 }
 0x22b   :  { %330 = vmatpush1.bf16.msra.mxu1 %v291_v36 }
 0x22c   :  { %331 = vmatprep.subr.bf16.mxu1 %v290_v40 }
 0x22f   :  { %332 = vmatpush1.bf16.msra.mxu1 %v289_v42 }
 0x231   :  { %v304_v51 = vpop.permute.xlu1 %303 }
 0x232   :  { %2413 = vmatmul.mubr.msk.bf16.vlgmr.msra.gmra.mxu1 %vm306_vm10, %v299_v43 }
 0x233   :  { %468 = vmatprep.mubr.bf16.mxu1 %v3032_v6 }
 0x2f2   :  { %v351_v52 = vpop.f32.mrf.mxu1 }
 0x2f3   :  { %v352_v53 = vadd.f32 %v351_v52, %v304_v51 }
 0x2f4   :  { %v353_v54 = vpop.f32.mrf.mxu1 }
 0x2f5   :  { %v358_v55 = vmax.f32 %v352_v53, 0.0  ;;  %v354_v56 = vadd.f32 %v353_v54, %v304_v51 }
 0x2f6   :  { %v355_v57 = vpop.f32.mrf.mxu1 }
 0x2f7   :  { %v359_v58 = vmax.f32 %v354_v56, 0.0  ;;  %v360_v60 = vmul.f32 %v358_v55, %v3139_v39 }
 0x2f8   :  { %v356_v59 = vpop.f32.mrf.mxu1 }
 0x2f9   :  { %v361_v61 = vmul.f32 %v359_v58, %v3141_v41 }
 0x2fb   :  { %v2550_v62 = vpack.i.bf16 %v361_v61, %v360_v60 }
 0x2fd   :  { %2551 = vrot.lane.b32.xlu1 %v2550_v62, %s3033_s1  ;;  %2546 = vrot.lane.b32.xlu0 %v2550_v62, %s3034_s27 }
 0x301   :  { %2561 = vrot.lane.b32.xlu1 %v2550_v62, %s3035_s28  ;;  %2556 = vrot.lane.b32.xlu0 %v2550_v62, %s3036_s29 }
 0x305   :  { %2571 = vrot.lane.b32.xlu1 %v2550_v62, %s3037_s30  ;;  %2566 = vrot.lane.b32.xlu0 %v2550_v62, %s3038_s9 }
 0x309   :  { %2581 = vrot.lane.b32.xlu1 %v2550_v62, %s3039_s10  ;;  %2576 = vrot.lane.b32.xlu0 %v2550_v62, %s3040_s11 }
 0x30d   :  { %424 = vperm.xlu0 %2503, %v421_v63  }
 0x36f   :  { %v2552_v0 = vpop.permute.xlu1 %2551  ;;  %v2547_v1 = vpop.permute.xlu0 %2546 }
 0x370   :  { %v2549_v2 = vunpack.i.h.bf16 %v2547_v1  ;;  %v2548_v3 = vunpack.i.l.bf16 %v2547_v1  ;;  %v2554_v4 = vunpack.i.h.bf16 %v2552_v0  ;;  %v2553_v5 = vunpack.i.l.bf16 %v2552_v0 }
 0x372   :  { %v409_v7 = vsel %vm286_vm1, %v2549_v2, %v2548_v3  ;;  %v408_v8 = vsel %vm286_vm1, %v2548_v3, %v2549_v2  ;;  %v396_v17 = vsel %vm272_vm2, %v2553_v5, %v2554_v4  ;;  %v397_v20 = vsel %vm272_vm2, %v2554_v4, %v2553_v5 }
 0x373   :  { %v2562_v9 = vpop.permute.xlu1 %2561  ;;  %v2557_v10 = vpop.permute.xlu0 %2556  ;;  %v419_v11 = vpack.c.bf16 %v409_v7, %v409_v7  ;;  %v418_v12 = vpack.c.bf16 %v408_v8, %v408_v8 }
 0x374   :  { %v2564_v13 = vunpack.i.h.bf16 %v2562_v9  ;;  %v2563_v14 = vunpack.i.l.bf16 %v2562_v9  ;;  %v2559_v15 = vunpack.i.h.bf16 %v2557_v10  ;;  %v2558_v16 = vunpack.i.l.bf16 %v2557_v10 }
 0x375   :  { %2414 = vmatprep.subr.msk.bf16.mxu1 %vm310_vm3, %v419_v11  ;;  %v431_v18 = vsel %vm310_vm3, %v418_v12, 0 }
 0x376   :  { %v402_v19 = vsel %vm279_vm5, %v2558_v16, %v2559_v15  ;;  %443 = vmatpush1.bf16.msra.mxu1 %v431_v18  ;;  %v403_v21 = vsel %vm279_vm5, %v2559_v15, %v2558_v16  ;;  %v391_v22 = vsel %vm265_vm4, %v2564_v13, %v2563_v14  ;;  %v390_v23 = vsel %vm265_vm4, %v2563_v14, %v2564_v13 }
 0x377   :  { %v2572_v24 = vpop.permute.xlu1 %2571  ;;  %v2567_v25 = vpop.permute.xlu0 %2566  ;;  %v417_v26 = vpack.c.bf16 %v403_v21, %v397_v20  ;;  %v416_v27 = vpack.c.bf16 %v402_v19, %v396_v17  ;;  %v415_v34 = vpack.c.bf16 %v391_v22, %v361_v61  ;;  %v414_v40 = vpack.c.bf16 %v390_v23, %v360_v60  ;;  %v420_v61 = vld [vmem:[%s4023_s4 + $0x4] sm:$0xf] }
 0x378   :  { %v2574_v28 = vunpack.i.h.bf16 %v2572_v24  ;;  %v2573_v29 = vunpack.i.l.bf16 %v2572_v24  ;;  %v2569_v31 = vunpack.i.h.bf16 %v2567_v25  ;;  %v2568_v32 = vunpack.i.l.bf16 %v2567_v25 }
 0x379   :  { %444 = vmatprep.subr.bf16.mxu1 %v417_v26 }
 0x37a   :  { %445 = vmatpush1.bf16.msra.mxu1 %v416_v27  ;;  %v378_v35 = vsel %vm251_vm7, %v2568_v32, %v2569_v31  ;;  %v384_v36 = vsel %vm258_vm6, %v2573_v29, %v2574_v28  ;;  %v385_v51 = vsel %vm258_vm6, %v2574_v28, %v2573_v29  ;;  %v379_v52 = vsel %vm251_vm7, %v2569_v31, %v2568_v32 }
 0x37b   :  { %v2582_v37 = vpop.permute.xlu1 %2581  ;;  %v2577_v38 = vpop.permute.xlu0 %2576  ;;  %446 = vmatprep.subr.bf16.mxu1 %v415_v34  ;;  %v413_v53 = vpack.c.bf16 %v384_v36, %v378_v35  ;;  %v412_v56 = vpack.c.bf16 %v385_v51, %v379_v52 }
 0x37c   :  { %v2584_v42 = vunpack.i.h.bf16 %v2582_v37  ;;  %v2583_v43 = vunpack.i.l.bf16 %v2582_v37  ;;  %v2579_v48 = vunpack.i.h.bf16 %v2577_v38  ;;  %v2578_v49 = vunpack.i.l.bf16 %v2577_v38 }
 0x37e   :  { %447 = vmatpush1.bf16.msra.mxu1 %v414_v40  ;;  %v366_v54 = vsel %vm237_vm9, %v2578_v49, %v2579_v48  ;;  %v372_v55 = vsel %vm244_vm8, %v2583_v43, %v2584_v42  ;;  %v373_v57 = vsel %vm244_vm8, %v2584_v42, %v2583_v43  ;;  %v367_v58 = vsel %vm237_vm9, %v2579_v48, %v2578_v49 }
 0x37f   :  { %448 = vmatprep.subr.bf16.mxu1 %v413_v53  ;;  %v411_v59 = vpack.c.bf16 %v372_v55, %v366_v54  ;;  %v410_v60 = vpack.c.bf16 %v373_v57, %v367_v58 }
 0x382   :  { %449 = vmatpush1.bf16.msra.mxu1 %v412_v56 }
 0x383   :  { %450 = vmatprep.subr.bf16.mxu1 %v411_v59 }
 0x386   :  { %451 = vmatpush1.bf16.msra.mxu1 %v410_v60 }
 0x388   :  { %v425_v62 = vpop.permute.xlu0 %424 }
 0x389   :  { %2415 = vmatmul.mubr.msk.bf16.vlgmr.msra.gmra.mxu1 %vm306_vm10, %v420_v61 }
 0x38a   :  { %589 = vmatprep.mubr.bf16.mxu1 %v3032_v6 }
 0x449   :  { %v470_v63 = vpop.f32.mrf.mxu1 }
 0x44a   :  { %v471_v0 = vadd.f32 %v470_v63, %v425_v62 }
 0x44b   :  { %v472_v1 = vpop.f32.mrf.mxu1 }
 0x44c   :  { %v477_v2 = vadd.f32 %v471_v0, %v3144_v46  ;;  %v473_v3 = vadd.f32 %v472_v1, %v425_v62  ;;  %v542_v46 = vld [vmem:[%s4024_s5 + $0x30] sm:$0xff] }
 0x44d   :  { %v474_v4 = vpop.f32.mrf.mxu1 }
 0x44e   :  { %v479_v5 = vmax.f32 %v477_v2, 0.0  ;;  %v478_v7 = vadd.f32 %v473_v3, %v3147_v47 }
 0x44f   :  { %v475_v8 = vpop.f32.mrf.mxu1 }
 0x450   :  { %v480_v9 = vmax.f32 %v478_v7, 0.0  ;;  %v3272_v10 = vmul.f32 %v479_v5, %v3139_v39 }
 0x452   :  { %v3275_v11 = vmul.f32 %v480_v9, %v3141_v41  ;;  %v541_v9 = vld [vmem:[%s4023_s4 + $0x8] sm:$0xf] }
 0x454   :  { %v2590_v12 = vpack.i.bf16 %v3275_v11, %v3272_v10 }
 0x456   :  { %2591 = vrot.lane.b32.xlu0 %v2590_v12, %s3033_s1  ;;  %2586 = vrot.lane.b32.xlu1 %v2590_v12, %s3034_s27 }
 0x45a   :  { %2601 = vrot.lane.b32.xlu0 %v2590_v12, %s3035_s28  ;;  %2596 = vrot.lane.b32.xlu1 %v2590_v12, %s3036_s29 }
 0x45e   :  { %2611 = vrot.lane.b32.xlu0 %v2590_v12, %s3037_s30  ;;  %2606 = vrot.lane.b32.xlu1 %v2590_v12, %s3038_s9 }
 0x462   :  { %2621 = vrot.lane.b32.xlu0 %v2590_v12, %s3039_s10  ;;  %2616 = vrot.lane.b32.xlu1 %v2590_v12, %s3040_s11 }
 0x466   :  { %545 = vperm.xlu1 %2504, %v542_v46  }
 0x4c8   :  { %v2592_v47 = vpop.permute.xlu0 %2591  ;;  %v2587_v13 = vpop.permute.xlu1 %2586 }
 0x4c9   :  { %v2589_v14 = vunpack.i.h.bf16 %v2587_v13  ;;  %v2588_v15 = vunpack.i.l.bf16 %v2587_v13  ;;  %v2594_v16 = vunpack.i.h.bf16 %v2592_v47  ;;  %v2593_v17 = vunpack.i.l.bf16 %v2592_v47 }
 0x4cb   :  { %v530_v18 = vsel %vm286_vm1, %v2589_v14, %v2588_v15  ;;  %v529_v19 = vsel %vm286_vm1, %v2588_v15, %v2589_v14  ;;  %v517_v28 = vsel %vm272_vm2, %v2593_v17, %v2594_v16  ;;  %v518_v32 = vsel %vm272_vm2, %v2594_v16, %v2593_v17 }
 0x4cc   :  { %v2602_v20 = vpop.permute.xlu0 %2601  ;;  %v2597_v21 = vpop.permute.xlu1 %2596  ;;  %v540_v22 = vpack.c.bf16 %v530_v18, %v530_v18  ;;  %v539_v23 = vpack.c.bf16 %v529_v19, %v529_v19 }
 0x4cd   :  { %v2604_v24 = vunpack.i.h.bf16 %v2602_v20  ;;  %v2603_v25 = vunpack.i.l.bf16 %v2602_v20  ;;  %v2599_v26 = vunpack.i.h.bf16 %v2597_v21  ;;  %v2598_v27 = vunpack.i.l.bf16 %v2597_v21 }
 0x4ce   :  { %2416 = vmatprep.subr.msk.bf16.mxu1 %vm310_vm3, %v540_v22  ;;  %v552_v29 = vsel %vm310_vm3, %v539_v23, 0  ;;  %v124_v22 = vld [vmem:[%s4024_s5 + $0x10] sm:$0xff]  ;;  %v661_v23 = vld [vmem:[%s4024_s5 + $0x38] sm:$0xff] }
 0x4cf   :  { %v523_v31 = vsel %vm279_vm5, %v2598_v27, %v2599_v26  ;;  %564 = vmatpush1.bf16.msra.mxu1 %v552_v29  ;;  %v524_v34 = vsel %vm279_vm5, %v2599_v26, %v2598_v27  ;;  %v512_v35 = vsel %vm265_vm4, %v2604_v24, %v2603_v25  ;;  %v511_v36 = vsel %vm265_vm4, %v2603_v25, %v2604_v24  ;;  %v728_v24 = vld [vmem:[%s4024_s5 + $0x48] sm:$0xff]  ;;  %v727_v25 = vld [vmem:[%s4024_s5 + $0x40] sm:$0xff]  ;;  %v850_v26 = vld [vmem:[%s4024_s5 + $0x58] sm:$0xff] }
 0x4d0   :  { %v2612_v37 = vpop.permute.xlu0 %2611  ;;  %v2607_v38 = vpop.permute.xlu1 %2606  ;;  %v538_v40 = vpack.c.bf16 %v524_v34, %v518_v32  ;;  %v537_v42 = vpack.c.bf16 %v523_v31, %v517_v28  ;;  %v536_v52 = vpack.c.bf16 %v512_v35, %v3275_v11  ;;  %v535_v57 = vpack.c.bf16 %v511_v36, %v3272_v10 }
 0x4d1   :  { %v2614_v43 = vunpack.i.h.bf16 %v2612_v37  ;;  %v2613_v48 = vunpack.i.l.bf16 %v2612_v37  ;;  %v2609_v49 = vunpack.i.h.bf16 %v2607_v38  ;;  %v2608_v51 = vunpack.i.l.bf16 %v2607_v38 }
 0x4d2   :  { %565 = vmatprep.subr.bf16.mxu1 %v538_v40 }
 0x4d3   :  { %566 = vmatpush1.bf16.msra.mxu1 %v537_v42  ;;  %v499_v53 = vsel %vm251_vm7, %v2608_v51, %v2609_v49  ;;  %v505_v54 = vsel %vm258_vm6, %v2613_v48, %v2614_v43  ;;  %v506_v62 = vsel %vm258_vm6, %v2614_v43, %v2613_v48  ;;  %v500_v63 = vsel %vm251_vm7, %v2609_v49, %v2608_v51 }
 0x4d4   :  { %v2622_v55 = vpop.permute.xlu0 %2621  ;;  %v2617_v56 = vpop.permute.xlu1 %2616  ;;  %567 = vmatprep.subr.bf16.mxu1 %v536_v52  ;;  %v534_v0 = vpack.c.bf16 %v505_v54, %v499_v53  ;;  %v533_v3 = vpack.c.bf16 %v506_v62, %v500_v63 }
 0x4d5   :  { %v2624_v58 = vunpack.i.h.bf16 %v2622_v55  ;;  %v2623_v59 = vunpack.i.l.bf16 %v2622_v55  ;;  %v2619_v60 = vunpack.i.h.bf16 %v2617_v56  ;;  %v2618_v61 = vunpack.i.l.bf16 %v2617_v56 }
 0x4d7   :  { %568 = vmatpush1.bf16.msra.mxu1 %v535_v57  ;;  %v487_v1 = vsel %vm237_vm9, %v2618_v61, %v2619_v60  ;;  %v493_v2 = vsel %vm244_vm8, %v2623_v59, %v2624_v58  ;;  %v494_v4 = vsel %vm244_vm8, %v2624_v58, %v2623_v59  ;;  %v488_v5 = vsel %vm237_vm9, %v2619_v60, %v2618_v61 }
 0x4d8   :  { %569 = vmatprep.subr.bf16.mxu1 %v534_v0  ;;  %v532_v7 = vpack.c.bf16 %v493_v2, %v487_v1  ;;  %v531_v8 = vpack.c.bf16 %v494_v4, %v488_v5 }
 0x4db   :  { %570 = vmatpush1.bf16.msra.mxu1 %v533_v3 }
 0x4dc   :  { %571 = vmatprep.subr.bf16.mxu1 %v532_v7 }
 0x4df   :  { %572 = vmatpush1.bf16.msra.mxu1 %v531_v8 }
 0x4e1   :  { %v546_v12 = vpop.permute.xlu1 %545 }
 0x4e2   :  { %2417 = vmatmul.mubr.msk.bf16.vlgmr.msra.gmra.mxu1 %vm306_vm10, %v541_v9 }
 0x4e3   :  { %779 = vmatprep.mubr.bf16.mxu1 %v3032_v6 }
 0x5a2   :  { %v591_v46 = vpop.f32.mrf.mxu1 }
 0x5a3   :  { %v592_v47 = vadd.f32 %v591_v46, %v546_v12 }
 0x5a4   :  { %v593_v13 = vpop.f32.mrf.mxu1 }
 0x5a5   :  { %v598_v14 = vmax.f32 %v592_v47, 0.0  ;;  %v594_v15 = vadd.f32 %v593_v13, %v546_v12 }
 0x5a6   :  { %v595_v16 = vpop.f32.mrf.mxu1 }
 0x5a7   :  { %v599_v17 = vmax.f32 %v594_v15, 0.0  ;;  %v3332_v19 = vmul.f32 %v598_v14, %v3139_v39 }
 0x5a8   :  { %v596_v18 = vpop.f32.mrf.mxu1 }
 0x5a9   :  { %v601_v20 = vmul.f32 %v599_v17, %v3141_v41 }
 0x5ab   :  { %v2630_v21 = vpack.i.bf16 %v601_v20, %v3332_v19 }
 0x5ad   :  { %2631 = vrot.lane.b32.xlu1 %v2630_v21, %s3033_s1  ;;  %2626 = vrot.lane.b32.xlu0 %v2630_v21, %s3034_s27 }
 0x5b1   :  { %2641 = vrot.lane.b32.xlu1 %v2630_v21, %s3035_s28  ;;  %2636 = vrot.lane.b32.xlu0 %v2630_v21, %s3036_s29 }
 0x5b5   :  { %2651 = vrot.lane.b32.xlu1 %v2630_v21, %s3037_s30  ;;  %2646 = vrot.lane.b32.xlu0 %v2630_v21, %s3038_s9 }
 0x5b9   :  { %2661 = vrot.lane.b32.xlu1 %v2630_v21, %s3039_s10  ;;  %2656 = vrot.lane.b32.xlu0 %v2630_v21, %s3040_s11 }
 0x5bd   :  { %127 = vperm.xlu1 %2504, %v124_v22   ;;  %664 = vperm.xlu0 %2503, %v661_v23  }
 0x5c1   :  { %736 = vperm.xlu1 %2504, %v728_v24   ;;  %731 = vperm.xlu0 %2503, %v727_v25   ;;  %v660_v24 = vld [vmem:[%s4023_s4 + $0xc] sm:$0xf] }
 0x5c5   :  { %853 = vperm.xlu0 %2503, %v850_v26  }
 0x61f   :  { %v2632_v27 = vpop.permute.xlu1 %2631  ;;  %v2627_v28 = vpop.permute.xlu0 %2626 }
 0x620   :  { %v2629_v29 = vunpack.i.h.bf16 %v2627_v28  ;;  %v2628_v31 = vunpack.i.l.bf16 %v2627_v28  ;;  %v2634_v32 = vunpack.i.h.bf16 %v2632_v27  ;;  %v2633_v34 = vunpack.i.l.bf16 %v2632_v27 }
 0x622   :  { %v649_v35 = vsel %vm286_vm1, %v2629_v29, %v2628_v31  ;;  %v648_v36 = vsel %vm286_vm1, %v2628_v31, %v2629_v29  ;;  %v636_v52 = vsel %vm272_vm2, %v2633_v34, %v2634_v32  ;;  %v637_v55 = vsel %vm272_vm2, %v2634_v32, %v2633_v34 }
 0x623   :  { %v2642_v37 = vpop.permute.xlu1 %2641  ;;  %v2637_v38 = vpop.permute.xlu0 %2636  ;;  %v659_v40 = vpack.c.bf16 %v649_v35, %v649_v35  ;;  %v658_v42 = vpack.c.bf16 %v648_v36, %v648_v36 }
 0x624   :  { %v2644_v43 = vunpack.i.h.bf16 %v2642_v37  ;;  %v2643_v48 = vunpack.i.l.bf16 %v2642_v37  ;;  %v2639_v49 = vunpack.i.h.bf16 %v2637_v38  ;;  %v2638_v51 = vunpack.i.l.bf16 %v2637_v38 }
 0x625   :  { %2418 = vmatprep.subr.msk.bf16.mxu0 %vm310_vm3, %v659_v40  ;;  %v671_v53 = vsel %vm310_vm3, %v658_v42, 0 }
 0x626   :  { %v642_v54 = vsel %vm279_vm5, %v2638_v51, %v2639_v49  ;;  %683 = vmatpush1.bf16.msra.mxu0 %v671_v53  ;;  %v643_v56 = vsel %vm279_vm5, %v2639_v49, %v2638_v51  ;;  %v631_v57 = vsel %vm265_vm4, %v2644_v43, %v2643_v48  ;;  %v630_v58 = vsel %vm265_vm4, %v2643_v48, %v2644_v43 }
 0x627   :  { %v656_v59 = vpack.c.bf16 %v642_v54, %v636_v52  ;;  %v2652_v60 = vpop.permute.xlu1 %2651  ;;  %v2647_v61 = vpop.permute.xlu0 %2646  ;;  %v657_v62 = vpack.c.bf16 %v643_v56, %v637_v55  ;;  %v655_v3 = vpack.c.bf16 %v631_v57, %v601_v20  ;;  %v654_v7 = vpack.c.bf16 %v630_v58, %v3332_v19 }
 0x628   :  { %v2654_v63 = vunpack.i.h.bf16 %v2652_v60  ;;  %v2653_v0 = vunpack.i.l.bf16 %v2652_v60  ;;  %v2649_v1 = vunpack.i.h.bf16 %v2647_v61  ;;  %v2648_v2 = vunpack.i.l.bf16 %v2647_v61 }
 0x629   :  { %684 = vmatprep.subr.bf16.mxu0 %v657_v62 }
 0x62a   :  { %685 = vmatpush1.bf16.msra.mxu0 %v656_v59  ;;  %v618_v4 = vsel %vm251_vm7, %v2648_v2, %v2649_v1  ;;  %v624_v5 = vsel %vm258_vm6, %v2653_v0, %v2654_v63  ;;  %v625_v14 = vsel %vm258_vm6, %v2654_v63, %v2653_v0  ;;  %v619_v15 = vsel %vm251_vm7, %v2649_v1, %v2648_v2 }
 0x62b   :  { %v2662_v8 = vpop.permute.xlu1 %2661  ;;  %v2657_v9 = vpop.permute.xlu0 %2656  ;;  %686 = vmatprep.subr.bf16.mxu0 %v655_v3  ;;  %v653_v16 = vpack.c.bf16 %v624_v5, %v618_v4  ;;  %v652_v19 = vpack.c.bf16 %v625_v14, %v619_v15  ;;  %v849_v3 = vld [vmem:[%s4022_s3 + $0x1c] sm:$0xf]  ;;  %v796_v4 = vld [vmem:[%s4022_s3 + $0x18] sm:$0xf] }
 0x62c   :  { %v2664_v12 = vunpack.i.h.bf16 %v2662_v8  ;;  %v2663_v46 = vunpack.i.l.bf16 %v2662_v8  ;;  %v2659_v47 = vunpack.i.h.bf16 %v2657_v9  ;;  %v2658_v13 = vunpack.i.l.bf16 %v2657_v9 }
 0x62e   :  { %687 = vmatpush1.bf16.msra.mxu0 %v654_v7  ;;  %v606_v17 = vsel %vm237_vm9, %v2658_v13, %v2659_v47  ;;  %v612_v18 = vsel %vm244_vm8, %v2663_v46, %v2664_v12  ;;  %v613_v20 = vsel %vm244_vm8, %v2664_v12, %v2663_v46  ;;  %v607_v21 = vsel %vm237_vm9, %v2659_v47, %v2658_v13 }
 0x62f   :  { %688 = vmatprep.subr.bf16.mxu0 %v653_v16  ;;  %v651_v22 = vpack.c.bf16 %v612_v18, %v606_v17  ;;  %v650_v23 = vpack.c.bf16 %v613_v20, %v607_v21  ;;  %v963_v18 = vld [vmem:[%s4024_s5 + $0x60] sm:$0xff] }
 0x632   :  { %689 = vmatpush1.bf16.msra.mxu0 %v652_v19 }
 0x633   :  { %690 = vmatprep.subr.bf16.mxu0 %v651_v22 }
 0x636   :  { %691 = vmatpush1.bf16.msra.mxu0 %v650_v23 }
 0x638   :  { %v665_v25 = vpop.permute.xlu0 %664  ;;  %v128_v28 = vpop.permute.xlu1 %127 }
 0x639   :  { %2419 = vmatmul.mubr.msk.bf16.vlgmr.msra.gmra.mxu0 %vm306_vm10, %v660_v24  ;;  %v170_v35 = vadd.f32 %v3215_v45, %v128_v28  ;;  %v168_v38 = vadd.f32 %v3213_v44, %v128_v28  ;;  %v2986_v45 = vld [vmem:[%s4022_s3 + $0x10] sm:$0xff]  }
 0x63a   :  { %838 = vmatprep.mubr.bf16.mxu0 %v3032_v6 }
 0x63b   :  { %v175_v48 = vmax.f32 %v170_v35, 0.0  ;;  %v174_v51 = vmax.f32 %v168_v38, 0.0 }
 0x63c   :  { %v732_v54 = vpop.permute.xlu0 %731 }
 0x640   :  { %v854_v5 = vpop.permute.xlu0 %853 }
 0x6f9   :  { %v710_v26 = vpop.f32.mrf.mxu0 }
 0x6fa   :  { %v711_v27 = vadd.f32 %v710_v26, %v665_v25 }
 0x6fb   :  { %v712_v29 = vpop.f32.mrf.mxu0 }
 0x6fc   :  { %v717_v31 = vadd.f32 %v711_v27, %v3272_v10  ;;  %v713_v32 = vadd.f32 %v712_v29, %v665_v25 }
 0x6fd   :  { %v714_v34 = vpop.f32.mrf.mxu0 }
 0x6fe   :  { %v719_v36 = vmax.f32 %v717_v31, 0.0  ;;  %v718_v37 = vadd.f32 %v713_v32, %v3275_v11  ;;  %v737_v11 = vpop.permute.xlu1 %736 }
 0x6ff   :  { %v715_v40 = vpop.f32.mrf.mxu0 }
 0x700   :  { %v720_v42 = vmax.f32 %v718_v37, 0.0  ;;  %v721_v43 = vmul.f32 %v719_v36, %v3139_v39 }
 0x702   :  { %v722_v49 = vmul.f32 %v720_v42, %v3141_v41  ;;  %v723_v53 = vpack.c.bf16 %v721_v43, %v174_v51 }
 0x704   :  { %v724_v52 = vpack.c.bf16 %v722_v49, %v175_v48 }
 0x706   :  { %761 = vmatprep.subr.bf16.mxu1 %v724_v52 }
 0x707   :  { %762 = vmatpush1.bf16.msra.mxu1 %v723_v53 }
 0x70a   :  { %2421 = vmatmul.mubr.msk.bf16.vlgmr.msra.gmra.mxu1 %vm70_vm0, %v2986_v45 }
 0x70b   :  { %891 = vmatprep.mubr.bf16.mxu1 %v3032_v6 }
 0x7ca   :  { %v781_v44 = vpop.f32.mrf.mxu1 }
 0x7cb   :  { %v782_v58 = vadd.f32 %v781_v44, %v732_v54 }
 0x7cc   :  { %v783_v10 = vpop.f32.mrf.mxu1 }
 0x7cd   :  { %v784_v56 = vadd.f32 %v783_v10, %v732_v54  ;;  %v790_v0 = vmax.f32 %v782_v58, 0.0 }
 0x7ce   :  { %v785_v55 = vpop.f32.mrf.mxu1 }
 0x7cf   :  { %v786_v57 = vadd.f32 %v785_v55, %v737_v11  ;;  %v791_v62 = vmax.f32 %v784_v56, 0.0 }
 0x7d0   :  { %v787_v59 = vpop.f32.mrf.mxu1 }
 0x7d1   :  { %v788_v60 = vadd.f32 %v787_v59, %v737_v11  ;;  %v792_v61 = vmax.f32 %v786_v57, 0.0 }
 0x7d3   :  { %v793_v63 = vmax.f32 %v788_v60, 0.0  ;;  %v794_v2 = vpack.c.bf16 %v792_v61, %v790_v0 }
 0x7d5   :  { %v795_v1 = vpack.c.bf16 %v793_v63, %v791_v62 }
 0x7d7   :  { %820 = vmatprep.subr.bf16.mxu0 %v795_v1  ;;  %873 = vmatprep.subr.bf16.mxu1 %v795_v1 }
 0x7d8   :  { %821 = vmatpush1.bf16.msra.mxu0 %v794_v2  ;;  %874 = vmatpush1.bf16.msra.mxu1 %v794_v2 }
 0x7db   :  { %2423 = vmatmul.mubr.msk.bf16.vlgmr.msra.gmra.mxu1 %vm70_vm0, %v849_v3  ;;  %2422 = vmatmul.mubr.msk.bf16.vlgmr.msra.gmra.mxu0 %vm70_vm0, %v796_v4 }
 0x7dc   :  { %1129 = vmatprep.mubr.bf16.mxu1 %v3032_v6  ;;  %1010 = vmatprep.mubr.bf16.mxu0 %v3032_v6 }
 0x89b   :  { %v893_v7 = vpop.f32.mrf.mxu1 }
 0x89c   :  { %v894_v8 = vadd.f32 %v893_v7, %v854_v5 }
 0x89d   :  { %v895_v9 = vpop.f32.mrf.mxu1 }
 0x89e   :  { %v900_v12 = vmax.f32 %v894_v8, 0.0  ;;  %v896_v46 = vadd.f32 %v895_v9, %v854_v5 }
 0x89f   :  { %v897_v47 = vpop.f32.mrf.mxu1 }
 0x8a0   :  { %v901_v13 = vmax.f32 %v896_v46, 0.0  ;;  %v3421_v15 = vmul.f32 %v900_v12, %v3139_v39  ;;  %v962_v47 = vld [vmem:[%s4023_s4 + $0x10] sm:$0xf] }
 0x8a1   :  { %v898_v14 = vpop.f32.mrf.mxu1 }
 0x8a2   :  { %v3424_v16 = vmul.f32 %v901_v13, %v3141_v41  ;;  %v3480_v13 = vpop.f32.mrf.mxu0 }
 0x8a4   :  { %v2670_v17 = vpack.i.bf16 %v3424_v16, %v3421_v15  ;;  %v3482_v14 = vpop.f32.mrf.mxu0 }
 0x8a6   :  { %2671 = vrot.lane.b32.xlu0 %v2670_v17, %s3033_s1  ;;  %2666 = vrot.lane.b32.xlu1 %v2670_v17, %s3034_s27 }
 0x8aa   :  { %2681 = vrot.lane.b32.xlu0 %v2670_v17, %s3035_s28  ;;  %2676 = vrot.lane.b32.xlu1 %v2670_v17, %s3036_s29 }
 0x8ae   :  { %2691 = vrot.lane.b32.xlu0 %v2670_v17, %s3037_s30  ;;  %2686 = vrot.lane.b32.xlu1 %v2670_v17, %s3038_s9 }
 0x8b2   :  { %2701 = vrot.lane.b32.xlu0 %v2670_v17, %s3039_s10  ;;  %2696 = vrot.lane.b32.xlu1 %v2670_v17, %s3040_s11  ;;  %v844_v17 = vpop.f32.mrf.mxu0 }
 0x8b6   :  { %966 = vperm.xlu1 %2504, %v963_v18   ;;  %v845_v18 = vpop.f32.mrf.mxu0 }
 0x918   :  { %v2672_v19 = vpop.permute.xlu0 %2671  ;;  %v2667_v20 = vpop.permute.xlu1 %2666 }
 0x919   :  { %v2669_v21 = vunpack.i.h.bf16 %v2667_v20  ;;  %v2668_v22 = vunpack.i.l.bf16 %v2667_v20  ;;  %v2674_v23 = vunpack.i.h.bf16 %v2672_v19  ;;  %v2673_v24 = vunpack.i.l.bf16 %v2672_v19 }
 0x91b   :  { %v951_v25 = vsel %vm286_vm1, %v2669_v21, %v2668_v22  ;;  %v950_v26 = vsel %vm286_vm1, %v2668_v22, %v2669_v21  ;;  %v938_v37 = vsel %vm272_vm2, %v2673_v24, %v2674_v23  ;;  %v939_v42 = vsel %vm272_vm2, %v2674_v23, %v2673_v24 }
 0x91c   :  { %v961_v27 = vpack.c.bf16 %v951_v25, %v951_v25  ;;  %v2682_v28 = vpop.permute.xlu0 %2681  ;;  %v2677_v29 = vpop.permute.xlu1 %2676  ;;  %v960_v31 = vpack.c.bf16 %v950_v26, %v950_v26 }
 0x91d   :  { %v2684_v32 = vunpack.i.h.bf16 %v2682_v28  ;;  %v2683_v34 = vunpack.i.l.bf16 %v2682_v28  ;;  %v2679_v35 = vunpack.i.h.bf16 %v2677_v29  ;;  %v2678_v36 = vunpack.i.l.bf16 %v2677_v29 }
 0x91e   :  { %2424 = vmatprep.subr.msk.bf16.mxu0 %vm310_vm3, %v961_v27  ;;  %v973_v38 = vsel %vm310_vm3, %v960_v31, 0 }
 0x91f   :  { %v944_v40 = vsel %vm279_vm5, %v2678_v36, %v2679_v35  ;;  %985 = vmatpush1.bf16.msra.mxu0 %v973_v38  ;;  %v945_v43 = vsel %vm279_vm5, %v2679_v35, %v2678_v36  ;;  %v933_v48 = vsel %vm265_vm4, %v2684_v32, %v2683_v34  ;;  %v932_v49 = vsel %vm265_vm4, %v2683_v34, %v2684_v32  ;;  %v1082_v32 = vld [vmem:[%s4024_s5 + $0x68] sm:$0xff] }
 0x920   :  { %v958_v51 = vpack.c.bf16 %v944_v40, %v938_v37  ;;  %v2692_v52 = vpop.permute.xlu0 %2691  ;;  %v2687_v53 = vpop.permute.xlu1 %2686  ;;  %v959_v45 = vpack.c.bf16 %v945_v43, %v939_v42  ;;  %v957_v55 = vpack.c.bf16 %v933_v48, %v3424_v16  ;;  %v956_v58 = vpack.c.bf16 %v932_v49, %v3421_v15 }
 0x921   :  { %v2694_v44 = vunpack.i.h.bf16 %v2692_v52  ;;  %v2693_v10 = vunpack.i.l.bf16 %v2692_v52  ;;  %v2689_v11 = vunpack.i.h.bf16 %v2687_v53  ;;  %v2688_v54 = vunpack.i.l.bf16 %v2687_v53 }
 0x922   :  { %986 = vmatprep.subr.bf16.mxu0 %v959_v45 }
 0x923   :  { %987 = vmatpush1.bf16.msra.mxu0 %v958_v51  ;;  %v920_v56 = vsel %vm251_vm7, %v2688_v54, %v2689_v11  ;;  %v926_v57 = vsel %vm258_vm6, %v2693_v10, %v2694_v44  ;;  %v927_v1 = vsel %vm258_vm6, %v2694_v44, %v2693_v10  ;;  %v921_v2 = vsel %vm251_vm7, %v2689_v11, %v2688_v54 }
 0x924   :  { %v2702_v59 = vpop.permute.xlu0 %2701  ;;  %v2697_v60 = vpop.permute.xlu1 %2696  ;;  %988 = vmatprep.subr.bf16.mxu0 %v957_v55  ;;  %v955_v3 = vpack.c.bf16 %v926_v57, %v920_v56  ;;  %v954_v7 = vpack.c.bf16 %v927_v1, %v921_v2 }
 0x925   :  { %v2704_v61 = vunpack.i.h.bf16 %v2702_v59  ;;  %v2703_v62 = vunpack.i.l.bf16 %v2702_v59  ;;  %v2699_v63 = vunpack.i.h.bf16 %v2697_v60  ;;  %v2698_v0 = vunpack.i.l.bf16 %v2697_v60 }
 0x927   :  { %989 = vmatpush1.bf16.msra.mxu0 %v956_v58  ;;  %v908_v4 = vsel %vm237_vm9, %v2698_v0, %v2699_v63  ;;  %v914_v5 = vsel %vm244_vm8, %v2703_v62, %v2704_v61  ;;  %v915_v8 = vsel %vm244_vm8, %v2704_v61, %v2703_v62  ;;  %v909_v9 = vsel %vm237_vm9, %v2699_v63, %v2698_v0 }
 0x928   :  { %990 = vmatprep.subr.bf16.mxu0 %v955_v3  ;;  %v953_v12 = vpack.c.bf16 %v914_v5, %v908_v4  ;;  %v952_v46 = vpack.c.bf16 %v915_v8, %v909_v9 }
 0x92b   :  { %991 = vmatpush1.bf16.msra.mxu0 %v954_v7 }
 0x92c   :  { %992 = vmatprep.subr.bf16.mxu0 %v953_v12 }
 0x92f   :  { %993 = vmatpush1.bf16.msra.mxu0 %v952_v46 }
 0x931   :  { %v967_v19 = vpop.permute.xlu1 %966 }
 0x932   :  { %2425 = vmatmul.mubr.msk.bf16.vlgmr.msra.gmra.mxu0 %vm306_vm10, %v962_v47 }
 0x933   :  { %1250 = vmatprep.mubr.bf16.mxu0 %v3032_v6 }
 0x9f2   :  { %v1012_v20 = vpop.f32.mrf.mxu0 }
 0x9f3   :  { %v1013_v21 = vadd.f32 %v1012_v20, %v967_v19 }
 0x9f4   :  { %v1014_v22 = vpop.f32.mrf.mxu0 }
 0x9f5   :  { %v1019_v23 = vmax.f32 %v1013_v21, 0.0  ;;  %v1015_v24 = vadd.f32 %v1014_v22, %v967_v19 }
 0x9f6   :  { %v1016_v25 = vpop.f32.mrf.mxu0 }
 0x9f7   :  { %v1020_v26 = vmax.f32 %v1015_v24, 0.0  ;;  %v1021_v28 = vmul.f32 %v1019_v23, %v3139_v39 }
 0x9f8   :  { %v1017_v27 = vpop.f32.mrf.mxu0 }
 0x9f9   :  { %v1022_v29 = vmul.f32 %v1020_v26, %v3141_v41 }
 0x9fb   :  { %v2710_v31 = vpack.i.bf16 %v1022_v29, %v1021_v28 }
 0x9fd   :  { %2711 = vrot.lane.b32.xlu1 %v2710_v31, %s3033_s1  ;;  %2706 = vrot.lane.b32.xlu0 %v2710_v31, %s3034_s27 }
 0xa01   :  { %2721 = vrot.lane.b32.xlu1 %v2710_v31, %s3035_s28  ;;  %2716 = vrot.lane.b32.xlu0 %v2710_v31, %s3036_s29 }
 0xa05   :  { %2731 = vrot.lane.b32.xlu1 %v2710_v31, %s3037_s30  ;;  %2726 = vrot.lane.b32.xlu0 %v2710_v31, %s3038_s9 }
 0xa09   :  { %2741 = vrot.lane.b32.xlu1 %v2710_v31, %s3039_s10  ;;  %2736 = vrot.lane.b32.xlu0 %v2710_v31, %s3040_s11 }
 0xa0d   :  { %1085 = vperm.xlu0 %2503, %v1082_v32  }
 0xa6f   :  { %v2712_v34 = vpop.permute.xlu1 %2711  ;;  %v2707_v35 = vpop.permute.xlu0 %2706 }
 0xa70   :  { %v2709_v36 = vunpack.i.h.bf16 %v2707_v35  ;;  %v2708_v37 = vunpack.i.l.bf16 %v2707_v35  ;;  %v2714_v38 = vunpack.i.h.bf16 %v2712_v34  ;;  %v2713_v40 = vunpack.i.l.bf16 %v2712_v34 }
 0xa72   :  { %v1070_v42 = vsel %vm286_vm1, %v2709_v36, %v2708_v37  ;;  %v1069_v43 = vsel %vm286_vm1, %v2708_v37, %v2709_v36  ;;  %v1057_v11 = vsel %vm272_vm2, %v2713_v40, %v2714_v38  ;;  %v1058_v56 = vsel %vm272_vm2, %v2714_v38, %v2713_v40 }
 0xa73   :  { %v1080_v48 = vpack.c.bf16 %v1070_v42, %v1070_v42  ;;  %v2722_v49 = vpop.permute.xlu1 %2721  ;;  %v2717_v51 = vpop.permute.xlu0 %2716  ;;  %v1079_v52 = vpack.c.bf16 %v1069_v43, %v1069_v43 }
 0xa74   :  { %v2724_v53 = vunpack.i.h.bf16 %v2722_v49  ;;  %v2723_v45 = vunpack.i.l.bf16 %v2722_v49  ;;  %v2719_v44 = vunpack.i.h.bf16 %v2717_v51  ;;  %v2718_v10 = vunpack.i.l.bf16 %v2717_v51 }
 0xa75   :  { %2426 = vmatprep.subr.msk.bf16.mxu1 %vm310_vm3, %v1080_v48  ;;  %v1092_v54 = vsel %vm310_vm3, %v1079_v52, 0 }
 0xa76   :  { %v1063_v55 = vsel %vm279_vm5, %v2718_v10, %v2719_v44  ;;  %1104 = vmatpush1.bf16.msra.mxu1 %v1092_v54  ;;  %v1064_v57 = vsel %vm279_vm5, %v2719_v44, %v2718_v10  ;;  %v1052_v58 = vsel %vm265_vm4, %v2724_v53, %v2723_v45  ;;  %v1051_v59 = vsel %vm265_vm4, %v2723_v45, %v2724_v53 }
 0xa77   :  { %v1077_v60 = vpack.c.bf16 %v1063_v55, %v1057_v11  ;;  %v2732_v61 = vpop.permute.xlu1 %2731  ;;  %v2727_v62 = vpop.permute.xlu0 %2726  ;;  %v1078_v63 = vpack.c.bf16 %v1064_v57, %v1058_v56  ;;  %v1076_v4 = vpack.c.bf16 %v1052_v58, %v1022_v29  ;;  %v1075_v8 = vpack.c.bf16 %v1051_v59, %v1021_v28  ;;  %v1081_v29 = vld [vmem:[%s4023_s4 + $0x14] sm:$0xf] }
 0xa78   :  { %v2734_v0 = vunpack.i.h.bf16 %v2732_v61  ;;  %v2733_v1 = vunpack.i.l.bf16 %v2732_v61  ;;  %v2729_v2 = vunpack.i.h.bf16 %v2727_v62  ;;  %v2728_v3 = vunpack.i.l.bf16 %v2727_v62 }
 0xa79   :  { %1105 = vmatprep.subr.bf16.mxu1 %v1078_v63 }
 0xa7a   :  { %1106 = vmatpush1.bf16.msra.mxu1 %v1077_v60  ;;  %v1039_v5 = vsel %vm251_vm7, %v2728_v3, %v2729_v2  ;;  %v1045_v7 = vsel %vm258_vm6, %v2733_v1, %v2734_v0  ;;  %v1046_v19 = vsel %vm258_vm6, %v2734_v0, %v2733_v1  ;;  %v1040_v20 = vsel %vm251_vm7, %v2729_v2, %v2728_v3 }
 0xa7b   :  { %v2742_v9 = vpop.permute.xlu1 %2741  ;;  %v2737_v12 = vpop.permute.xlu0 %2736  ;;  %1107 = vmatprep.subr.bf16.mxu1 %v1076_v4  ;;  %v1074_v21 = vpack.c.bf16 %v1045_v7, %v1039_v5  ;;  %v1073_v24 = vpack.c.bf16 %v1046_v19, %v1040_v20 }
 0xa7c   :  { %v2744_v46 = vunpack.i.h.bf16 %v2742_v9  ;;  %v2743_v47 = vunpack.i.l.bf16 %v2742_v9  ;;  %v2739_v17 = vunpack.i.h.bf16 %v2737_v12  ;;  %v2738_v18 = vunpack.i.l.bf16 %v2737_v12 }
 0xa7e   :  { %1108 = vmatpush1.bf16.msra.mxu1 %v1075_v8  ;;  %v1027_v22 = vsel %vm237_vm9, %v2738_v18, %v2739_v17  ;;  %v1033_v23 = vsel %vm244_vm8, %v2743_v47, %v2744_v46  ;;  %v1034_v25 = vsel %vm244_vm8, %v2744_v46, %v2743_v47  ;;  %v1028_v26 = vsel %vm237_vm9, %v2739_v17, %v2738_v18 }
 0xa7f   :  { %1109 = vmatprep.subr.bf16.mxu1 %v1074_v21  ;;  %v1072_v27 = vpack.c.bf16 %v1033_v23, %v1027_v22  ;;  %v1071_v28 = vpack.c.bf16 %v1034_v25, %v1028_v26 }
 0xa82   :  { %1110 = vmatpush1.bf16.msra.mxu1 %v1073_v24 }
 0xa83   :  { %1111 = vmatprep.subr.bf16.mxu1 %v1072_v27 }
 0xa86   :  { %1112 = vmatpush1.bf16.msra.mxu1 %v1071_v28 }
 0xa88   :  { %v1086_v31 = vpop.permute.xlu0 %1085 }
 0xa89   :  { %2427 = vmatmul.mubr.msk.bf16.vlgmr.msra.gmra.mxu1 %vm306_vm10, %v1081_v29 }
 0xa8a   :  { %1369 = vmatprep.mubr.bf16.mxu1 %v3032_v6 }
 0xb49   :  { %v1131_v32 = vpop.f32.mrf.mxu1 }
 0xb4a   :  { %v1132_v34 = vadd.f32 %v1131_v32, %v1086_v31 }
 0xb4b   :  { %v1133_v35 = vpop.f32.mrf.mxu1 }
 0xb4c   :  { %v1138_v36 = vadd.f32 %v1132_v34, %v3421_v15  ;;  %v1134_v37 = vadd.f32 %v1133_v35, %v1086_v31  ;;  %v1203_v15 = vld [vmem:[%s4024_s5 + $0x70] sm:$0xff] }
 0xb4d   :  { %v1135_v38 = vpop.f32.mrf.mxu1 }
 0xb4e   :  { %v1140_v40 = vmax.f32 %v1138_v36, 0.0  ;;  %v1139_v42 = vadd.f32 %v1134_v37, %v3424_v16 }
 0xb4f   :  { %v1136_v43 = vpop.f32.mrf.mxu1 }
 0xb50   :  { %v1141_v48 = vmax.f32 %v1139_v42, 0.0  ;;  %v3539_v49 = vmul.f32 %v1140_v40, %v3139_v39 }
 0xb52   :  { %v3542_v51 = vmul.f32 %v1141_v48, %v3141_v41  ;;  %v1202_v48 = vld [vmem:[%s4023_s4 + $0x18] sm:$0xf] }
 0xb54   :  { %v2750_v52 = vpack.i.bf16 %v3542_v51, %v3539_v49 }
 0xb56   :  { %2751 = vrot.lane.b32.xlu0 %v2750_v52, %s3033_s1  ;;  %2746 = vrot.lane.b32.xlu1 %v2750_v52, %s3034_s27 }
 0xb5a   :  { %2761 = vrot.lane.b32.xlu0 %v2750_v52, %s3035_s28  ;;  %2756 = vrot.lane.b32.xlu1 %v2750_v52, %s3036_s29 }
 0xb5e   :  { %2771 = vrot.lane.b32.xlu0 %v2750_v52, %s3037_s30  ;;  %2766 = vrot.lane.b32.xlu1 %v2750_v52, %s3038_s9 }
 0xb62   :  { %2781 = vrot.lane.b32.xlu0 %v2750_v52, %s3039_s10  ;;  %2776 = vrot.lane.b32.xlu1 %v2750_v52, %s3040_s11 }
 0xb66   :  { %1206 = vperm.xlu1 %2504, %v1203_v15  }
 0xbc8   :  { %v2752_v16 = vpop.permute.xlu0 %2751  ;;  %v2747_v53 = vpop.permute.xlu1 %2746 }
 0xbc9   :  { %v2749_v45 = vunpack.i.h.bf16 %v2747_v53  ;;  %v2748_v44 = vunpack.i.l.bf16 %v2747_v53  ;;  %v2754_v10 = vunpack.i.h.bf16 %v2752_v16  ;;  %v2753_v11 = vunpack.i.l.bf16 %v2752_v16 }
 0xbcb   :  { %v1191_v54 = vsel %vm286_vm1, %v2749_v45, %v2748_v44  ;;  %v1190_v55 = vsel %vm286_vm1, %v2748_v44, %v2749_v45  ;;  %v1178_v0 = vsel %vm272_vm2, %v2753_v11, %v2754_v10  ;;  %v1179_v3 = vsel %vm272_vm2, %v2754_v10, %v2753_v11 }
 0xbcc   :  { %v1201_v56 = vpack.c.bf16 %v1191_v54, %v1191_v54  ;;  %v2762_v57 = vpop.permute.xlu0 %2761  ;;  %v2757_v58 = vpop.permute.xlu1 %2756  ;;  %v1200_v59 = vpack.c.bf16 %v1190_v55, %v1190_v55 }
 0xbcd   :  { %v2764_v60 = vunpack.i.h.bf16 %v2762_v57  ;;  %v2763_v61 = vunpack.i.l.bf16 %v2762_v57  ;;  %v2759_v62 = vunpack.i.h.bf16 %v2757_v58  ;;  %v2758_v63 = vunpack.i.l.bf16 %v2757_v58  ;;  %v797_v58 = vld [vmem:[%s4024_s5 + $0x50] sm:$0xff] }
 0xbce   :  { %2428 = vmatprep.subr.msk.bf16.mxu0 %vm310_vm3, %v1201_v56  ;;  %v1213_v1 = vsel %vm310_vm3, %v1200_v59, 0  ;;  %v1322_v59 = vld [vmem:[%s4024_s5 + $0x78] sm:$0xff] }
 0xbcf   :  { %v1184_v2 = vsel %vm279_vm5, %v2758_v63, %v2759_v62  ;;  %1225 = vmatpush1.bf16.msra.mxu0 %v1213_v1  ;;  %v1185_v4 = vsel %vm279_vm5, %v2759_v62, %v2758_v63  ;;  %v1173_v5 = vsel %vm265_vm4, %v2764_v60, %v2763_v61  ;;  %v1172_v7 = vsel %vm265_vm4, %v2763_v61, %v2764_v60  ;;  %v1389_v60 = vld [vmem:[%s4024_s5 + $0x88] sm:$0xff]  ;;  %v1388_v61 = vld [vmem:[%s4024_s5 + $0x80] sm:$0xff]  ;;  %v1511_v62 = vld [vmem:[%s4024_s5 + $0x98] sm:$0xff] }
 0xbd0   :  { %v1198_v8 = vpack.c.bf16 %v1184_v2, %v1178_v0  ;;  %v2772_v9 = vpop.permute.xlu0 %2771  ;;  %v2767_v12 = vpop.permute.xlu1 %2766  ;;  %v1199_v46 = vpack.c.bf16 %v1185_v4, %v1179_v3  ;;  %v1197_v20 = vpack.c.bf16 %v1173_v5, %v3542_v51  ;;  %v1196_v23 = vpack.c.bf16 %v1172_v7, %v3539_v49 }
 0xbd1   :  { %v2774_v47 = vunpack.i.h.bf16 %v2772_v9  ;;  %v2773_v17 = vunpack.i.l.bf16 %v2772_v9  ;;  %v2769_v18 = vunpack.i.h.bf16 %v2767_v12  ;;  %v2768_v19 = vunpack.i.l.bf16 %v2767_v12 }
 0xbd2   :  { %1226 = vmatprep.subr.bf16.mxu0 %v1199_v46 }
 0xbd3   :  { %1227 = vmatpush1.bf16.msra.mxu0 %v1198_v8  ;;  %v1160_v21 = vsel %vm251_vm7, %v2768_v19, %v2769_v18  ;;  %v1166_v22 = vsel %vm258_vm6, %v2773_v17, %v2774_v47  ;;  %v1167_v31 = vsel %vm258_vm6, %v2774_v47, %v2773_v17  ;;  %v1161_v32 = vsel %vm251_vm7, %v2769_v18, %v2768_v19 }
 0xbd4   :  { %v2782_v24 = vpop.permute.xlu0 %2781  ;;  %v2777_v25 = vpop.permute.xlu1 %2776  ;;  %1228 = vmatprep.subr.bf16.mxu0 %v1197_v20  ;;  %v1195_v34 = vpack.c.bf16 %v1166_v22, %v1160_v21  ;;  %v1194_v37 = vpack.c.bf16 %v1167_v31, %v1161_v32 }
 0xbd5   :  { %v2784_v26 = vunpack.i.h.bf16 %v2782_v24  ;;  %v2783_v27 = vunpack.i.l.bf16 %v2782_v24  ;;  %v2779_v28 = vunpack.i.h.bf16 %v2777_v25  ;;  %v2778_v29 = vunpack.i.l.bf16 %v2777_v25 }
 0xbd7   :  { %1229 = vmatpush1.bf16.msra.mxu0 %v1196_v23  ;;  %v1148_v35 = vsel %vm237_vm9, %v2778_v29, %v2779_v28  ;;  %v1154_v36 = vsel %vm244_vm8, %v2783_v27, %v2784_v26  ;;  %v1155_v38 = vsel %vm244_vm8, %v2784_v26, %v2783_v27  ;;  %v1149_v40 = vsel %vm237_vm9, %v2779_v28, %v2778_v29 }
 0xbd8   :  { %1230 = vmatprep.subr.bf16.mxu0 %v1195_v34  ;;  %v1193_v42 = vpack.c.bf16 %v1154_v36, %v1148_v35  ;;  %v1192_v43 = vpack.c.bf16 %v1155_v38, %v1149_v40 }
 0xbdb   :  { %1231 = vmatpush1.bf16.msra.mxu0 %v1194_v37 }
 0xbdc   :  { %1232 = vmatprep.subr.bf16.mxu0 %v1193_v42 }
 0xbdf   :  { %1233 = vmatpush1.bf16.msra.mxu0 %v1192_v43 }
 0xbe1   :  { %v1207_v52 = vpop.permute.xlu1 %1206 }
 0xbe2   :  { %2429 = vmatmul.mubr.msk.bf16.vlgmr.msra.gmra.mxu0 %vm306_vm10, %v1202_v48 }
 0xbe3   :  { %1440 = vmatprep.mubr.bf16.mxu0 %v3032_v6 }
 0xca2   :  { %v1252_v15 = vpop.f32.mrf.mxu0 }
 0xca3   :  { %v1253_v16 = vadd.f32 %v1252_v15, %v1207_v52 }
 0xca4   :  { %v1254_v53 = vpop.f32.mrf.mxu0 }
 0xca5   :  { %v1259_v45 = vmax.f32 %v1253_v16, 0.0  ;;  %v1255_v44 = vadd.f32 %v1254_v53, %v1207_v52 }
 0xca6   :  { %v1256_v10 = vpop.f32.mrf.mxu0 }
 0xca7   :  { %v1260_v11 = vmax.f32 %v1255_v44, 0.0  ;;  %v3599_v55 = vmul.f32 %v1259_v45, %v3139_v39 }
 0xca8   :  { %v1257_v54 = vpop.f32.mrf.mxu0 }
 0xca9   :  { %v1262_v56 = vmul.f32 %v1260_v11, %v3141_v41 }
 0xcab   :  { %v2790_v57 = vpack.i.bf16 %v1262_v56, %v3599_v55 }
 0xcad   :  { %2791 = vrot.lane.b32.xlu1 %v2790_v57, %s3033_s1  ;;  %2786 = vrot.lane.b32.xlu0 %v2790_v57, %s3034_s27 }
 0xcb1   :  { %2801 = vrot.lane.b32.xlu1 %v2790_v57, %s3035_s28  ;;  %2796 = vrot.lane.b32.xlu0 %v2790_v57, %s3036_s29 }
 0xcb5   :  { %2811 = vrot.lane.b32.xlu1 %v2790_v57, %s3037_s30  ;;  %2806 = vrot.lane.b32.xlu0 %v2790_v57, %s3038_s9 }
 0xcb9   :  { %2821 = vrot.lane.b32.xlu1 %v2790_v57, %s3039_s10  ;;  %2816 = vrot.lane.b32.xlu0 %v2790_v57, %s3040_s11 }
 0xcbd   :  { %800 = vperm.xlu1 %2504, %v797_v58   ;;  %1325 = vperm.xlu0 %2503, %v1322_v59  }
 0xcc1   :  { %1397 = vperm.xlu1 %2504, %v1389_v60   ;;  %1392 = vperm.xlu0 %2503, %v1388_v61   ;;  %v1321_v60 = vld [vmem:[%s4023_s4 + $0x1c] sm:$0xf] }
 0xcc5   :  { %1514 = vperm.xlu0 %2503, %v1511_v62  }
 0xd1f   :  { %v2792_v63 = vpop.permute.xlu1 %2791  ;;  %v2787_v0 = vpop.permute.xlu0 %2786 }
 0xd20   :  { %v2789_v1 = vunpack.i.h.bf16 %v2787_v0  ;;  %v2788_v2 = vunpack.i.l.bf16 %v2787_v0  ;;  %v2794_v3 = vunpack.i.h.bf16 %v2792_v63  ;;  %v2793_v4 = vunpack.i.l.bf16 %v2792_v63 }
 0xd22   :  { %v1310_v5 = vsel %vm286_vm1, %v2789_v1, %v2788_v2  ;;  %v1309_v7 = vsel %vm286_vm1, %v2788_v2, %v2789_v1  ;;  %v1297_v20 = vsel %vm272_vm2, %v2793_v4, %v2794_v3  ;;  %v1298_v23 = vsel %vm272_vm2, %v2794_v3, %v2793_v4 }
 0xd23   :  { %v1320_v8 = vpack.c.bf16 %v1310_v5, %v1310_v5  ;;  %v2802_v9 = vpop.permute.xlu1 %2801  ;;  %v2797_v12 = vpop.permute.xlu0 %2796  ;;  %v1319_v46 = vpack.c.bf16 %v1309_v7, %v1309_v7 }
 0xd24   :  { %v2804_v47 = vunpack.i.h.bf16 %v2802_v9  ;;  %v2803_v17 = vunpack.i.l.bf16 %v2802_v9  ;;  %v2799_v18 = vunpack.i.h.bf16 %v2797_v12  ;;  %v2798_v19 = vunpack.i.l.bf16 %v2797_v12 }
 0xd25   :  { %2430 = vmatprep.subr.msk.bf16.mxu1 %vm310_vm3, %v1320_v8  ;;  %v1332_v21 = vsel %vm310_vm3, %v1319_v46, 0 }
 0xd26   :  { %v1303_v22 = vsel %vm279_vm5, %v2798_v19, %v2799_v18  ;;  %1344 = vmatpush1.bf16.msra.mxu1 %v1332_v21  ;;  %v1304_v24 = vsel %vm279_vm5, %v2799_v18, %v2798_v19  ;;  %v1292_v25 = vsel %vm265_vm4, %v2804_v47, %v2803_v17  ;;  %v1291_v26 = vsel %vm265_vm4, %v2803_v17, %v2804_v47 }
 0xd27   :  { %v1317_v27 = vpack.c.bf16 %v1303_v22, %v1297_v20  ;;  %v2812_v28 = vpop.permute.xlu1 %2811  ;;  %v2807_v29 = vpop.permute.xlu0 %2806  ;;  %v1318_v31 = vpack.c.bf16 %v1304_v24, %v1298_v23  ;;  %v1316_v37 = vpack.c.bf16 %v1292_v25, %v1262_v56  ;;  %v1315_v42 = vpack.c.bf16 %v1291_v26, %v3599_v55 }
 0xd28   :  { %v2814_v32 = vunpack.i.h.bf16 %v2812_v28  ;;  %v2813_v34 = vunpack.i.l.bf16 %v2812_v28  ;;  %v2809_v35 = vunpack.i.h.bf16 %v2807_v29  ;;  %v2808_v36 = vunpack.i.l.bf16 %v2807_v29 }
 0xd29   :  { %1345 = vmatprep.subr.bf16.mxu1 %v1318_v31 }
 0xd2a   :  { %1346 = vmatpush1.bf16.msra.mxu1 %v1317_v27  ;;  %v1279_v38 = vsel %vm251_vm7, %v2808_v36, %v2809_v35  ;;  %v1285_v40 = vsel %vm258_vm6, %v2813_v34, %v2814_v32  ;;  %v1286_v45 = vsel %vm258_vm6, %v2814_v32, %v2813_v34  ;;  %v1280_v44 = vsel %vm251_vm7, %v2809_v35, %v2808_v36 }
 0xd2b   :  { %v2822_v43 = vpop.permute.xlu1 %2821  ;;  %v2817_v48 = vpop.permute.xlu0 %2816  ;;  %1347 = vmatprep.subr.bf16.mxu1 %v1316_v37  ;;  %v1314_v10 = vpack.c.bf16 %v1285_v40, %v1279_v38  ;;  %v1313_v55 = vpack.c.bf16 %v1286_v45, %v1280_v44  ;;  %v1510_v37 = vld [vmem:[%s4022_s3 + $0x2c] sm:$0xf]  ;;  %v1457_v38 = vld [vmem:[%s4022_s3 + $0x28] sm:$0xf] }
 0xd2c   :  { %v2824_v52 = vunpack.i.h.bf16 %v2822_v43  ;;  %v2823_v15 = vunpack.i.l.bf16 %v2822_v43  ;;  %v2819_v16 = vunpack.i.h.bf16 %v2817_v48  ;;  %v2818_v53 = vunpack.i.l.bf16 %v2817_v48 }
 0xd2e   :  { %1348 = vmatpush1.bf16.msra.mxu1 %v1315_v42  ;;  %v1267_v11 = vsel %vm237_vm9, %v2818_v53, %v2819_v16  ;;  %v1273_v54 = vsel %vm244_vm8, %v2823_v15, %v2824_v52  ;;  %v1274_v56 = vsel %vm244_vm8, %v2824_v52, %v2823_v15  ;;  %v1268_v57 = vsel %vm237_vm9, %v2819_v16, %v2818_v53 }
 0xd2f   :  { %1349 = vmatprep.subr.bf16.mxu1 %v1314_v10  ;;  %v1312_v58 = vpack.c.bf16 %v1273_v54, %v1267_v11  ;;  %v1311_v59 = vpack.c.bf16 %v1274_v56, %v1268_v57  ;;  %v1624_v54 = vld [vmem:[%s4024_s5 + $0xa0] sm:$0xff] }
 0xd32   :  { %1350 = vmatpush1.bf16.msra.mxu1 %v1313_v55 }
 0xd33   :  { %1351 = vmatprep.subr.bf16.mxu1 %v1312_v58 }
 0xd36   :  { %1352 = vmatpush1.bf16.msra.mxu1 %v1311_v59 }
 0xd38   :  { %v1326_v61 = vpop.permute.xlu0 %1325  ;;  %v801_v0 = vpop.permute.xlu1 %800 }
 0xd39   :  { %2431 = vmatmul.mubr.msk.bf16.vlgmr.msra.gmra.mxu1 %vm306_vm10, %v1321_v60  ;;  %v843_v5 = vadd.f32 %v3482_v14, %v801_v0  ;;  %v841_v9 = vadd.f32 %v3480_v13, %v801_v0  ;;  %v2987_v14 = vld [vmem:[%s4022_s3 + $0x20] sm:$0xff]  }
 0xd3a   :  { %1499 = vmatprep.mubr.bf16.mxu1 %v3032_v6 }
 0xd3b   :  { %v848_v17 = vmax.f32 %v843_v5, 0.0  ;;  %v847_v19 = vmax.f32 %v841_v9, 0.0 }
 0xd3c   :  { %v1393_v22 = vpop.permute.xlu0 %1392 }
 0xd40   :  { %v1515_v40 = vpop.permute.xlu0 %1514 }
 0xdf9   :  { %v1371_v62 = vpop.f32.mrf.mxu1 }
 0xdfa   :  { %v1372_v63 = vadd.f32 %v1371_v62, %v1326_v61 }
 0xdfb   :  { %v1373_v1 = vpop.f32.mrf.mxu1 }
 0xdfc   :  { %v1378_v2 = vadd.f32 %v1372_v63, %v3539_v49  ;;  %v1374_v3 = vadd.f32 %v1373_v1, %v1326_v61 }
 0xdfd   :  { %v1375_v4 = vpop.f32.mrf.mxu1 }
 0xdfe   :  { %v1380_v7 = vmax.f32 %v1378_v2, 0.0  ;;  %v1379_v8 = vadd.f32 %v1374_v3, %v3542_v51  ;;  %v1398_v51 = vpop.permute.xlu1 %1397 }
 0xdff   :  { %v1376_v12 = vpop.f32.mrf.mxu1 }
 0xe00   :  { %v1381_v46 = vmax.f32 %v1379_v8, 0.0  ;;  %v1382_v47 = vmul.f32 %v1380_v7, %v3139_v39 }
 0xe02   :  { %v1383_v18 = vmul.f32 %v1381_v46, %v3141_v41  ;;  %v1384_v21 = vpack.c.bf16 %v1382_v47, %v847_v19 }
 0xe04   :  { %v1385_v20 = vpack.c.bf16 %v1383_v18, %v848_v17 }
 0xe06   :  { %1422 = vmatprep.subr.bf16.mxu0 %v1385_v20 }
 0xe07   :  { %1423 = vmatpush1.bf16.msra.mxu0 %v1384_v21 }
 0xe0a   :  { %2433 = vmatmul.mubr.msk.bf16.vlgmr.msra.gmra.mxu0 %vm70_vm0, %v2987_v14 }
 0xe0b   :  { %1552 = vmatprep.mubr.bf16.mxu0 %v3032_v6 }
 0xeca   :  { %v1442_v13 = vpop.f32.mrf.mxu0 }
 0xecb   :  { %v1443_v26 = vadd.f32 %v1442_v13, %v1393_v22 }
 0xecc   :  { %v1444_v49 = vpop.f32.mrf.mxu0 }
 0xecd   :  { %v1445_v24 = vadd.f32 %v1444_v49, %v1393_v22  ;;  %v1451_v34 = vmax.f32 %v1443_v26, 0.0 }
 0xece   :  { %v1446_v23 = vpop.f32.mrf.mxu0 }
 0xecf   :  { %v1447_v25 = vadd.f32 %v1446_v23, %v1398_v51  ;;  %v1452_v31 = vmax.f32 %v1445_v24, 0.0 }
 0xed0   :  { %v1448_v27 = vpop.f32.mrf.mxu0 }
 0xed1   :  { %v1449_v28 = vadd.f32 %v1448_v27, %v1398_v51  ;;  %v1453_v29 = vmax.f32 %v1447_v25, 0.0 }
 0xed3   :  { %v1454_v32 = vmax.f32 %v1449_v28, 0.0  ;;  %v1455_v36 = vpack.c.bf16 %v1453_v29, %v1451_v34 }
 0xed5   :  { %v1456_v35 = vpack.c.bf16 %v1454_v32, %v1452_v31 }
 0xed7   :  { %1481 = vmatprep.subr.bf16.mxu1 %v1456_v35  ;;  %1534 = vmatprep.subr.bf16.mxu0 %v1456_v35 }
 0xed8   :  { %1482 = vmatpush1.bf16.msra.mxu1 %v1455_v36  ;;  %1535 = vmatpush1.bf16.msra.mxu0 %v1455_v36 }
 0xedb   :  { %2435 = vmatmul.mubr.msk.bf16.vlgmr.msra.gmra.mxu0 %vm70_vm0, %v1510_v37  ;;  %2434 = vmatmul.mubr.msk.bf16.vlgmr.msra.gmra.mxu1 %vm70_vm0, %v1457_v38 }
 0xedc   :  { %1790 = vmatprep.mubr.bf16.mxu0 %v3032_v6  ;;  %1671 = vmatprep.mubr.bf16.mxu1 %v3032_v6 }
 0xf9b   :  { %v1554_v42 = vpop.f32.mrf.mxu0 }
 0xf9c   :  { %v1555_v43 = vadd.f32 %v1554_v42, %v1515_v40 }
 0xf9d   :  { %v1556_v48 = vpop.f32.mrf.mxu0 }
 0xf9e   :  { %v1561_v52 = vmax.f32 %v1555_v43, 0.0  ;;  %v1557_v15 = vadd.f32 %v1556_v48, %v1515_v40 }
 0xf9f   :  { %v1558_v16 = vpop.f32.mrf.mxu0 }
 0xfa0   :  { %v1562_v53 = vmax.f32 %v1557_v15, 0.0  ;;  %v3688_v44 = vmul.f32 %v1561_v52, %v3139_v39  ;;  %v1623_v16 = vld [vmem:[%s4023_s4 + $0x20] sm:$0xf] }
 0xfa1   :  { %v1559_v45 = vpop.f32.mrf.mxu0 }
 0xfa2   :  { %v3691_v10 = vmul.f32 %v1562_v53, %v3141_v41  ;;  %v3747_v53 = vpop.f32.mrf.mxu1 }
 0xfa4   :  { %v2830_v11 = vpack.i.bf16 %v3691_v10, %v3688_v44  ;;  %v3749_v45 = vpop.f32.mrf.mxu1 }
 0xfa6   :  { %2831 = vrot.lane.b32.xlu0 %v2830_v11, %s3033_s1  ;;  %2826 = vrot.lane.b32.xlu1 %v2830_v11, %s3034_s27 }
 0xfaa   :  { %2841 = vrot.lane.b32.xlu0 %v2830_v11, %s3035_s28  ;;  %2836 = vrot.lane.b32.xlu1 %v2830_v11, %s3036_s29 }
 0xfae   :  { %2851 = vrot.lane.b32.xlu0 %v2830_v11, %s3037_s30  ;;  %2846 = vrot.lane.b32.xlu1 %v2830_v11, %s3038_s9 }
 0xfb2   :  { %2861 = vrot.lane.b32.xlu0 %v2830_v11, %s3039_s10  ;;  %2856 = vrot.lane.b32.xlu1 %v2830_v11, %s3040_s11  ;;  %v1505_v11 = vpop.f32.mrf.mxu1 }
 0xfb6   :  { %1627 = vperm.xlu1 %2504, %v1624_v54   ;;  %v1506_v54 = vpop.f32.mrf.mxu1 }
0x1018   :  { %v2832_v55 = vpop.permute.xlu0 %2831  ;;  %v2827_v56 = vpop.permute.xlu1 %2826 }
0x1019   :  { %v2829_v57 = vunpack.i.h.bf16 %v2827_v56  ;;  %v2828_v58 = vunpack.i.l.bf16 %v2827_v56  ;;  %v2834_v59 = vunpack.i.h.bf16 %v2832_v55  ;;  %v2833_v60 = vunpack.i.l.bf16 %v2832_v55 }
0x101b   :  { %v1612_v61 = vsel %vm286_vm1, %v2829_v57, %v2828_v58  ;;  %v1611_v62 = vsel %vm286_vm1, %v2828_v58, %v2829_v57  ;;  %v1599_v8 = vsel %vm272_vm2, %v2833_v60, %v2834_v59  ;;  %v1600_v46 = vsel %vm272_vm2, %v2834_v59, %v2833_v60 }
0x101c   :  { %v1622_v63 = vpack.c.bf16 %v1612_v61, %v1612_v61  ;;  %v2842_v0 = vpop.permute.xlu0 %2841  ;;  %v2837_v1 = vpop.permute.xlu1 %2836  ;;  %v1621_v2 = vpack.c.bf16 %v1611_v62, %v1611_v62 }
0x101d   :  { %v2844_v3 = vunpack.i.h.bf16 %v2842_v0  ;;  %v2843_v4 = vunpack.i.l.bf16 %v2842_v0  ;;  %v2839_v5 = vunpack.i.h.bf16 %v2837_v1  ;;  %v2838_v7 = vunpack.i.l.bf16 %v2837_v1 }
0x101e   :  { %2436 = vmatprep.subr.msk.bf16.mxu1 %vm310_vm3, %v1622_v63  ;;  %v1634_v9 = vsel %vm310_vm3, %v1621_v2, 0 }
0x101f   :  { %v1605_v12 = vsel %vm279_vm5, %v2838_v7, %v2839_v5  ;;  %1646 = vmatpush1.bf16.msra.mxu1 %v1634_v9  ;;  %v1606_v47 = vsel %vm279_vm5, %v2839_v5, %v2838_v7  ;;  %v1594_v17 = vsel %vm265_vm4, %v2844_v3, %v2843_v4  ;;  %v1593_v18 = vsel %vm265_vm4, %v2843_v4, %v2844_v3  ;;  %v1743_v3 = vld [vmem:[%s4024_s5 + $0xa8] sm:$0xff] }
0x1020   :  { %v1619_v19 = vpack.c.bf16 %v1605_v12, %v1599_v8  ;;  %v2852_v20 = vpop.permute.xlu0 %2851  ;;  %v2847_v21 = vpop.permute.xlu1 %2846  ;;  %v1620_v14 = vpack.c.bf16 %v1606_v47, %v1600_v46  ;;  %v1618_v23 = vpack.c.bf16 %v1594_v17, %v3691_v10  ;;  %v1617_v26 = vpack.c.bf16 %v1593_v18, %v3688_v44 }
0x1021   :  { %v2854_v13 = vunpack.i.h.bf16 %v2852_v20  ;;  %v2853_v49 = vunpack.i.l.bf16 %v2852_v20  ;;  %v2849_v51 = vunpack.i.h.bf16 %v2847_v21  ;;  %v2848_v22 = vunpack.i.l.bf16 %v2847_v21 }
0x1022   :  { %1647 = vmatprep.subr.bf16.mxu1 %v1620_v14 }
0x1023   :  { %1648 = vmatpush1.bf16.msra.mxu1 %v1619_v19  ;;  %v1581_v24 = vsel %vm251_vm7, %v2848_v22, %v2849_v51  ;;  %v1587_v25 = vsel %vm258_vm6, %v2853_v49, %v2854_v13  ;;  %v1588_v35 = vsel %vm258_vm6, %v2854_v13, %v2853_v49  ;;  %v1582_v36 = vsel %vm251_vm7, %v2849_v51, %v2848_v22 }
0x1024   :  { %v2862_v27 = vpop.permute.xlu0 %2861  ;;  %v2857_v28 = vpop.permute.xlu1 %2856  ;;  %1649 = vmatprep.subr.bf16.mxu1 %v1618_v23  ;;  %v1616_v37 = vpack.c.bf16 %v1587_v25, %v1581_v24  ;;  %v1615_v42 = vpack.c.bf16 %v1588_v35, %v1582_v36 }
0x1025   :  { %v2864_v29 = vunpack.i.h.bf16 %v2862_v27  ;;  %v2863_v31 = vunpack.i.l.bf16 %v2862_v27  ;;  %v2859_v32 = vunpack.i.h.bf16 %v2857_v28  ;;  %v2858_v34 = vunpack.i.l.bf16 %v2857_v28 }
0x1027   :  { %1650 = vmatpush1.bf16.msra.mxu1 %v1617_v26  ;;  %v1569_v38 = vsel %vm237_vm9, %v2858_v34, %v2859_v32  ;;  %v1575_v40 = vsel %vm244_vm8, %v2863_v31, %v2864_v29  ;;  %v1576_v43 = vsel %vm244_vm8, %v2864_v29, %v2863_v31  ;;  %v1570_v48 = vsel %vm237_vm9, %v2859_v32, %v2858_v34 }
0x1028   :  { %1651 = vmatprep.subr.bf16.mxu1 %v1616_v37  ;;  %v1614_v52 = vpack.c.bf16 %v1575_v40, %v1569_v38  ;;  %v1613_v15 = vpack.c.bf16 %v1576_v43, %v1570_v48 }
0x102b   :  { %1652 = vmatpush1.bf16.msra.mxu1 %v1615_v42 }
0x102c   :  { %1653 = vmatprep.subr.bf16.mxu1 %v1614_v52 }
0x102f   :  { %1654 = vmatpush1.bf16.msra.mxu1 %v1613_v15 }
0x1031   :  { %v1628_v55 = vpop.permute.xlu1 %1627 }
0x1032   :  { %2437 = vmatmul.mubr.msk.bf16.vlgmr.msra.gmra.mxu1 %vm306_vm10, %v1623_v16 }
0x1033   :  { %1911 = vmatprep.mubr.bf16.mxu1 %v3032_v6 }
0x10f2   :  { %v1673_v56 = vpop.f32.mrf.mxu1 }
0x10f3   :  { %v1674_v57 = vadd.f32 %v1673_v56, %v1628_v55 }
0x10f4   :  { %v1675_v58 = vpop.f32.mrf.mxu1 }
0x10f5   :  { %v1680_v59 = vmax.f32 %v1674_v57, 0.0  ;;  %v1676_v60 = vadd.f32 %v1675_v58, %v1628_v55 }
0x10f6   :  { %v1677_v61 = vpop.f32.mrf.mxu1 }
0x10f7   :  { %v1681_v62 = vmax.f32 %v1676_v60, 0.0  ;;  %v1682_v0 = vmul.f32 %v1680_v59, %v3139_v39 }
0x10f8   :  { %v1678_v63 = vpop.f32.mrf.mxu1 }
0x10f9   :  { %v1683_v1 = vmul.f32 %v1681_v62, %v3141_v41 }
0x10fb   :  { %v2870_v2 = vpack.i.bf16 %v1683_v1, %v1682_v0 }
0x10fd   :  { %2871 = vrot.lane.b32.xlu1 %v2870_v2, %s3033_s1  ;;  %2866 = vrot.lane.b32.xlu0 %v2870_v2, %s3034_s27 }
0x1101   :  { %2881 = vrot.lane.b32.xlu1 %v2870_v2, %s3035_s28  ;;  %2876 = vrot.lane.b32.xlu0 %v2870_v2, %s3036_s29 }
0x1105   :  { %2891 = vrot.lane.b32.xlu1 %v2870_v2, %s3037_s30  ;;  %2886 = vrot.lane.b32.xlu0 %v2870_v2, %s3038_s9 }
0x1109   :  { %2901 = vrot.lane.b32.xlu1 %v2870_v2, %s3039_s10  ;;  %2896 = vrot.lane.b32.xlu0 %v2870_v2, %s3040_s11 }
0x110d   :  { %1746 = vperm.xlu0 %2503, %v1743_v3  }
0x116f   :  { %v2872_v4 = vpop.permute.xlu1 %2871  ;;  %v2867_v5 = vpop.permute.xlu0 %2866 }
0x1170   :  { %v2869_v7 = vunpack.i.h.bf16 %v2867_v5  ;;  %v2868_v8 = vunpack.i.l.bf16 %v2867_v5  ;;  %v2874_v9 = vunpack.i.h.bf16 %v2872_v4  ;;  %v2873_v12 = vunpack.i.l.bf16 %v2872_v4 }
0x1172   :  { %v1731_v46 = vsel %vm286_vm1, %v2869_v7, %v2868_v8  ;;  %v1730_v47 = vsel %vm286_vm1, %v2868_v8, %v2869_v7  ;;  %v1718_v51 = vsel %vm272_vm2, %v2873_v12, %v2874_v9  ;;  %v1719_v24 = vsel %vm272_vm2, %v2874_v9, %v2873_v12 }
0x1173   :  { %v1741_v17 = vpack.c.bf16 %v1731_v46, %v1731_v46  ;;  %v2882_v18 = vpop.permute.xlu1 %2881  ;;  %v2877_v19 = vpop.permute.xlu0 %2876  ;;  %v1740_v20 = vpack.c.bf16 %v1730_v47, %v1730_v47 }
0x1174   :  { %v2884_v21 = vunpack.i.h.bf16 %v2882_v18  ;;  %v2883_v14 = vunpack.i.l.bf16 %v2882_v18  ;;  %v2879_v13 = vunpack.i.h.bf16 %v2877_v19  ;;  %v2878_v49 = vunpack.i.l.bf16 %v2877_v19 }
0x1175   :  { %2438 = vmatprep.subr.msk.bf16.mxu0 %vm310_vm3, %v1741_v17  ;;  %v1753_v22 = vsel %vm310_vm3, %v1740_v20, 0 }
0x1176   :  { %v1724_v23 = vsel %vm279_vm5, %v2878_v49, %v2879_v13  ;;  %1765 = vmatpush1.bf16.msra.mxu0 %v1753_v22  ;;  %v1725_v25 = vsel %vm279_vm5, %v2879_v13, %v2878_v49  ;;  %v1713_v26 = vsel %vm265_vm4, %v2884_v21, %v2883_v14  ;;  %v1712_v27 = vsel %vm265_vm4, %v2883_v14, %v2884_v21 }
0x1177   :  { %v1738_v28 = vpack.c.bf16 %v1724_v23, %v1718_v51  ;;  %v2892_v29 = vpop.permute.xlu1 %2891  ;;  %v2887_v31 = vpop.permute.xlu0 %2886  ;;  %v1739_v32 = vpack.c.bf16 %v1725_v25, %v1719_v24  ;;  %v1737_v38 = vpack.c.bf16 %v1713_v26, %v1683_v1  ;;  %v1736_v43 = vpack.c.bf16 %v1712_v27, %v1682_v0  ;;  %v1742_v1 = vld [vmem:[%s4023_s4 + $0x24] sm:$0xf] }
0x1178   :  { %v2894_v34 = vunpack.i.h.bf16 %v2892_v29  ;;  %v2893_v35 = vunpack.i.l.bf16 %v2892_v29  ;;  %v2889_v36 = vunpack.i.h.bf16 %v2887_v31  ;;  %v2888_v37 = vunpack.i.l.bf16 %v2887_v31 }
0x1179   :  { %1766 = vmatprep.subr.bf16.mxu0 %v1739_v32 }
0x117a   :  { %1767 = vmatpush1.bf16.msra.mxu0 %v1738_v28  ;;  %v1700_v40 = vsel %vm251_vm7, %v2888_v37, %v2889_v36  ;;  %v1706_v42 = vsel %vm258_vm6, %v2893_v35, %v2894_v34  ;;  %v1707_v55 = vsel %vm258_vm6, %v2894_v34, %v2893_v35  ;;  %v1701_v56 = vsel %vm251_vm7, %v2889_v36, %v2888_v37 }
0x117b   :  { %v2902_v48 = vpop.permute.xlu1 %2901  ;;  %v2897_v52 = vpop.permute.xlu0 %2896  ;;  %1768 = vmatprep.subr.bf16.mxu0 %v1737_v38  ;;  %v1735_v57 = vpack.c.bf16 %v1706_v42, %v1700_v40  ;;  %v1734_v60 = vpack.c.bf16 %v1707_v55, %v1701_v56 }
0x117c   :  { %v2904_v15 = vunpack.i.h.bf16 %v2902_v48  ;;  %v2903_v16 = vunpack.i.l.bf16 %v2902_v48  ;;  %v2899_v11 = vunpack.i.h.bf16 %v2897_v52  ;;  %v2898_v54 = vunpack.i.l.bf16 %v2897_v52 }
0x117e   :  { %1769 = vmatpush1.bf16.msra.mxu0 %v1736_v43  ;;  %v1688_v58 = vsel %vm237_vm9, %v2898_v54, %v2899_v11  ;;  %v1694_v59 = vsel %vm244_vm8, %v2903_v16, %v2904_v15  ;;  %v1695_v61 = vsel %vm244_vm8, %v2904_v15, %v2903_v16  ;;  %v1689_v62 = vsel %vm237_vm9, %v2899_v11, %v2898_v54 }
0x117f   :  { %1770 = vmatprep.subr.bf16.mxu0 %v1735_v57  ;;  %v1733_v63 = vpack.c.bf16 %v1694_v59, %v1688_v58  ;;  %v1732_v0 = vpack.c.bf16 %v1695_v61, %v1689_v62 }
0x1182   :  { %1771 = vmatpush1.bf16.msra.mxu0 %v1734_v60 }
0x1183   :  { %1772 = vmatprep.subr.bf16.mxu0 %v1733_v63 }
0x1186   :  { %1773 = vmatpush1.bf16.msra.mxu0 %v1732_v0 }
0x1188   :  { %v1747_v2 = vpop.permute.xlu0 %1746 }
0x1189   :  { %2439 = vmatmul.mubr.msk.bf16.vlgmr.msra.gmra.mxu0 %vm306_vm10, %v1742_v1 }
0x118a   :  { %2030 = vmatprep.mubr.bf16.mxu0 %v3032_v6 }
0x1249   :  { %v1792_v3 = vpop.f32.mrf.mxu0 }
0x124a   :  { %v1793_v4 = vadd.f32 %v1792_v3, %v1747_v2 }
0x124b   :  { %v1794_v5 = vpop.f32.mrf.mxu0 }
0x124c   :  { %v1799_v7 = vadd.f32 %v1793_v4, %v3688_v44  ;;  %v1795_v8 = vadd.f32 %v1794_v5, %v1747_v2  ;;  %v1864_v44 = vld [vmem:[%s4024_s5 + $0xb0] sm:$0xff] }
0x124d   :  { %v1796_v9 = vpop.f32.mrf.mxu0 }
0x124e   :  { %v1801_v12 = vmax.f32 %v1799_v7, 0.0  ;;  %v1800_v46 = vadd.f32 %v1795_v8, %v3691_v10 }
0x124f   :  { %v1797_v47 = vpop.f32.mrf.mxu0 }
0x1250   :  { %v1802_v17 = vmax.f32 %v1800_v46, 0.0  ;;  %v3806_v18 = vmul.f32 %v1801_v12, %v3139_v39 }
0x1252   :  { %v3809_v19 = vmul.f32 %v1802_v17, %v3141_v41  ;;  %v1863_v17 = vld [vmem:[%s4023_s4 + $0x28] sm:$0xf] }
0x1254   :  { %v2910_v20 = vpack.i.bf16 %v3809_v19, %v3806_v18 }
0x1256   :  { %2911 = vrot.lane.b32.xlu0 %v2910_v20, %s3033_s1  ;;  %2906 = vrot.lane.b32.xlu1 %v2910_v20, %s3034_s27 }
0x125a   :  { %2921 = vrot.lane.b32.xlu0 %v2910_v20, %s3035_s28  ;;  %2916 = vrot.lane.b32.xlu1 %v2910_v20, %s3036_s29 }
0x125e   :  { %2931 = vrot.lane.b32.xlu0 %v2910_v20, %s3037_s30  ;;  %2926 = vrot.lane.b32.xlu1 %v2910_v20, %s3038_s9 }
0x1262   :  { %2941 = vrot.lane.b32.xlu0 %v2910_v20, %s3039_s10  ;;  %2936 = vrot.lane.b32.xlu1 %v2910_v20, %s3040_s11 }
0x1266   :  { %1867 = vperm.xlu1 %2504, %v1864_v44  }
0x12c8   :  { %v2912_v10 = vpop.permute.xlu0 %2911  ;;  %v2907_v21 = vpop.permute.xlu1 %2906 }
0x12c9   :  { %v2909_v14 = vunpack.i.h.bf16 %v2907_v21  ;;  %v2908_v13 = vunpack.i.l.bf16 %v2907_v21  ;;  %v2914_v49 = vunpack.i.h.bf16 %v2912_v10  ;;  %v2913_v51 = vunpack.i.l.bf16 %v2912_v10 }
0x12cb   :  { %v1852_v22 = vsel %vm286_vm1, %v2909_v14, %v2908_v13  ;;  %v1851_v23 = vsel %vm286_vm1, %v2908_v13, %v2909_v14  ;;  %v1839_v34 = vsel %vm272_vm2, %v2913_v51, %v2914_v49  ;;  %v1840_v37 = vsel %vm272_vm2, %v2914_v49, %v2913_v51 }
0x12cc   :  { %v1862_v24 = vpack.c.bf16 %v1852_v22, %v1852_v22  ;;  %v2922_v25 = vpop.permute.xlu0 %2921  ;;  %v2917_v26 = vpop.permute.xlu1 %2916  ;;  %v1861_v27 = vpack.c.bf16 %v1851_v23, %v1851_v23 }
0x12cd   :  { %v2924_v28 = vunpack.i.h.bf16 %v2922_v25  ;;  %v2923_v29 = vunpack.i.l.bf16 %v2922_v25  ;;  %v2919_v31 = vunpack.i.h.bf16 %v2917_v26  ;;  %v2918_v32 = vunpack.i.l.bf16 %v2917_v26  ;;  %v1458_v26 = vld [vmem:[%s4024_s5 + $0x90] sm:$0xff] }
0x12ce   :  { %2440 = vmatprep.subr.msk.bf16.mxu1 %vm310_vm3, %v1862_v24  ;;  %v1874_v35 = vsel %vm310_vm3, %v1861_v27, 0  ;;  %v1983_v27 = vld [vmem:[%s4024_s5 + $0xb8] sm:$0xff] }
0x12cf   :  { %v1845_v36 = vsel %vm279_vm5, %v2918_v32, %v2919_v31  ;;  %1886 = vmatpush1.bf16.msra.mxu1 %v1874_v35  ;;  %v1846_v38 = vsel %vm279_vm5, %v2919_v31, %v2918_v32  ;;  %v1834_v40 = vsel %vm265_vm4, %v2924_v28, %v2923_v29  ;;  %v1833_v42 = vsel %vm265_vm4, %v2923_v29, %v2924_v28  ;;  %v2052_v28 = vld [vmem:[%s4024_s5 + $0xc8] sm:$0xff]  ;;  %v2051_v29 = vld [vmem:[%s4024_s5 + $0xc0] sm:$0xff]  ;;  %v2054_v31 = vld [vmem:[%s4024_s5 + $0xd8] sm:$0xff] }
0x12d0   :  { %v1859_v43 = vpack.c.bf16 %v1845_v36, %v1839_v34  ;;  %v2932_v48 = vpop.permute.xlu0 %2931  ;;  %v2927_v52 = vpop.permute.xlu1 %2926  ;;  %v1860_v15 = vpack.c.bf16 %v1846_v38, %v1840_v37  ;;  %v1858_v56 = vpack.c.bf16 %v1834_v40, %v3809_v19  ;;  %v1857_v59 = vpack.c.bf16 %v1833_v42, %v3806_v18  ;;  %v2053_v32 = vld [vmem:[%s4024_s5 + $0xd0] sm:$0xff]  ;;  %v2334_v34 = vld [vmem:[%s4025_s6 + $0x8] sm:$0xff]  ;;  %v2333_v35 = vld [vmem:[%s4025_s6] sm:$0xff] }
0x12d1   :  { %v2934_v16 = vunpack.i.h.bf16 %v2932_v48  ;;  %v2933_v11 = vunpack.i.l.bf16 %v2932_v48  ;;  %v2929_v54 = vunpack.i.h.bf16 %v2927_v52  ;;  %v2928_v55 = vunpack.i.l.bf16 %v2927_v52  ;;  %v2336_v36 = vld [vmem:[%s4025_s6 + $0x18] sm:$0xff]  ;;  %v2335_v37 = vld [vmem:[%s4025_s6 + $0x10] sm:$0xff]  ;;  %v2375_v38 = vld [vmem:[#allocation2] sm:$0x1] }
0x12d2   :  { %1887 = vmatprep.subr.bf16.mxu1 %v1860_v15 }
0x12d3   :  { %1888 = vmatpush1.bf16.msra.mxu1 %v1859_v43  ;;  %v1821_v57 = vsel %vm251_vm7, %v2928_v55, %v2929_v54  ;;  %v1827_v58 = vsel %vm258_vm6, %v2933_v11, %v2934_v16  ;;  %v1828_v2 = vsel %vm258_vm6, %v2934_v16, %v2933_v11  ;;  %v1822_v3 = vsel %vm251_vm7, %v2929_v54, %v2928_v55 }
0x12d4   :  { %v2942_v60 = vpop.permute.xlu0 %2941  ;;  %v2937_v61 = vpop.permute.xlu1 %2936  ;;  %1889 = vmatprep.subr.bf16.mxu1 %v1858_v56  ;;  %v1856_v4 = vpack.c.bf16 %v1827_v58, %v1821_v57  ;;  %v1855_v8 = vpack.c.bf16 %v1828_v2, %v1822_v3 }
0x12d5   :  { %v2944_v62 = vunpack.i.h.bf16 %v2942_v60  ;;  %v2943_v63 = vunpack.i.l.bf16 %v2942_v60  ;;  %v2939_v0 = vunpack.i.h.bf16 %v2937_v61  ;;  %v2938_v1 = vunpack.i.l.bf16 %v2937_v61 }
0x12d7   :  { %1890 = vmatpush1.bf16.msra.mxu1 %v1857_v59  ;;  %v1809_v5 = vsel %vm237_vm9, %v2938_v1, %v2939_v0  ;;  %v1815_v7 = vsel %vm244_vm8, %v2943_v63, %v2944_v62  ;;  %v1816_v9 = vsel %vm244_vm8, %v2944_v62, %v2943_v63  ;;  %v1810_v12 = vsel %vm237_vm9, %v2939_v0, %v2938_v1 }
0x12d8   :  { %1891 = vmatprep.subr.bf16.mxu1 %v1856_v4  ;;  %v1854_v46 = vpack.c.bf16 %v1815_v7, %v1809_v5  ;;  %v1853_v47 = vpack.c.bf16 %v1816_v9, %v1810_v12 }
0x12db   :  { %1892 = vmatpush1.bf16.msra.mxu1 %v1855_v8 }
0x12dc   :  { %1893 = vmatprep.subr.bf16.mxu1 %v1854_v46 }
0x12df   :  { %1894 = vmatpush1.bf16.msra.mxu1 %v1853_v47 }
0x12e1   :  { %v1868_v20 = vpop.permute.xlu1 %1867 }
0x12e2   :  { %2441 = vmatmul.mubr.msk.bf16.vlgmr.msra.gmra.mxu1 %vm306_vm10, %v1863_v17 }
0x12e3   :  { %2123 = vmatprep.mubr.bf16.mxu1 %v3032_v6 }
0x13a2   :  { %v1913_v44 = vpop.f32.mrf.mxu1 }
0x13a3   :  { %v1914_v10 = vadd.f32 %v1913_v44, %v1868_v20 }
0x13a4   :  { %v1915_v21 = vpop.f32.mrf.mxu1 }
0x13a5   :  { %v1920_v14 = vmax.f32 %v1914_v10, 0.0  ;;  %v1916_v13 = vadd.f32 %v1915_v21, %v1868_v20 }
0x13a6   :  { %v1917_v49 = vpop.f32.mrf.mxu1 }
0x13a7   :  { %v1921_v51 = vmax.f32 %v1916_v13, 0.0  ;;  %v3866_v23 = vmul.f32 %v1920_v14, %v3139_v39 }
0x13a8   :  { %v1918_v22 = vpop.f32.mrf.mxu1 }
0x13a9   :  { %v3869_v24 = vmul.f32 %v1921_v51, %v3141_v41 }
0x13ab   :  { %v2950_v25 = vpack.i.bf16 %v3869_v24, %v3866_v23 }
0x13ad   :  { %2951 = vrot.lane.b32.xlu1 %v2950_v25, %s3033_s1  ;;  %2946 = vrot.lane.b32.xlu0 %v2950_v25, %s3034_s27 }
0x13b1   :  { %2961 = vrot.lane.b32.xlu1 %v2950_v25, %s3035_s28  ;;  %2956 = vrot.lane.b32.xlu0 %v2950_v25, %s3036_s29 }
0x13b5   :  { %2971 = vrot.lane.b32.xlu1 %v2950_v25, %s3037_s30  ;;  %2966 = vrot.lane.b32.xlu0 %v2950_v25, %s3038_s9 }
0x13b9   :  { %2981 = vrot.lane.b32.xlu1 %v2950_v25, %s3039_s10  ;;  %2976 = vrot.lane.b32.xlu0 %v2950_v25, %s3040_s11 }
0x13bd   :  { %1461 = vperm.xlu1 %2504, %v1458_v26   ;;  %1986 = vperm.xlu0 %2503, %v1983_v27  }
0x13c1   :  { %2062 = vperm.xlu1 %2504, %v2052_v28   ;;  %2057 = vperm.xlu0 %2503, %v2051_v29  }
0x13c5   :  { %2072 = vperm.xlu1 %2504, %v2054_v31   ;;  %2067 = vperm.xlu0 %2503, %v2053_v32  }
0x13c9   :  { %2344 = vperm.xlu1 %2504, %v2334_v34   ;;  %2339 = vperm.xlu0 %2503, %v2333_v35  }
0x13cd   :  { %2354 = vperm.xlu1 %2504, %v2336_v36   ;;  %2349 = vperm.xlu0 %2503, %v2335_v37   ;;  %v1982_v36 = vld [vmem:[%s4023_s4 + $0x2c] sm:$0xf]  ;;  %v2990_v37 = vld [vmem:[%s4021_s2 + $0x78] sm:$0xff]  }
0x13d1   :  { %2378 = vperm.xlu0 %2503, %v2375_v38   ;;  %v2992_v38 = vld [vmem:[%s4021_s2 + $0x70] sm:$0xff]  }
0x141f   :  { %v2952_v40 = vpop.permute.xlu1 %2951  ;;  %v2947_v42 = vpop.permute.xlu0 %2946 }
0x1420   :  { %v2949_v43 = vunpack.i.h.bf16 %v2947_v42  ;;  %v2948_v48 = vunpack.i.l.bf16 %v2947_v42  ;;  %v2954_v52 = vunpack.i.h.bf16 %v2952_v40  ;;  %v2953_v15 = vunpack.i.l.bf16 %v2952_v40  ;;  %v2993_v40 = vld [vmem:[%s4021_s2 + $0x30] sm:$0xff]   ;;  %v2994_v42 = vld [vmem:[%s4021_s2 + $0x68] sm:$0xff]  }
0x1422   :  { %v1971_v16 = vsel %vm286_vm1, %v2949_v43, %v2948_v48  ;;  %v1970_v11 = vsel %vm286_vm1, %v2948_v48, %v2949_v43  ;;  %v1958_v62 = vsel %vm272_vm2, %v2953_v15, %v2954_v52  ;;  %v1959_v1 = vsel %vm272_vm2, %v2954_v52, %v2953_v15  ;;  %v2995_v43 = vld [vmem:[%s4021_s2 + $0x28] sm:$0xff]   ;;  %v2996_v48 = vld [vmem:[%s4021_s2 + $0x60] sm:$0xff]   ;;  %v2998_v15 = vld [vmem:[%s4021_s2 + $0x58] sm:$0xff]  }
0x1423   :  { %v1981_v54 = vpack.c.bf16 %v1971_v16, %v1971_v16  ;;  %v2962_v55 = vpop.permute.xlu1 %2961  ;;  %v2957_v56 = vpop.permute.xlu0 %2956  ;;  %v1980_v57 = vpack.c.bf16 %v1970_v11, %v1970_v11  ;;  %v2997_v52 = vld [vmem:[%s4021_s2 + $0x20] sm:$0xff]   ;;  %v2999_v16 = vld [vmem:[%s4021_s2 + $0x18] sm:$0xff]  }
0x1424   :  { %v2964_v58 = vunpack.i.h.bf16 %v2962_v55  ;;  %v2963_v59 = vunpack.i.l.bf16 %v2962_v55  ;;  %v2959_v60 = vunpack.i.h.bf16 %v2957_v56  ;;  %v2958_v61 = vunpack.i.l.bf16 %v2957_v56 }
0x1425   :  { %2442 = vmatprep.subr.msk.bf16.mxu0 %vm310_vm3, %v1981_v54  ;;  %v1993_v63 = vsel %vm310_vm3, %v1980_v57, 0 }
0x1426   :  { %v1964_v0 = vsel %vm279_vm5, %v2958_v61, %v2959_v60  ;;  %2005 = vmatpush1.bf16.msra.mxu0 %v1993_v63  ;;  %v1965_v2 = vsel %vm279_vm5, %v2959_v60, %v2958_v61  ;;  %v1953_v3 = vsel %vm265_vm4, %v2964_v58, %v2963_v59  ;;  %v1952_v4 = vsel %vm265_vm4, %v2963_v59, %v2964_v58 }
0x1427   :  { %v1978_v5 = vpack.c.bf16 %v1964_v0, %v1958_v62  ;;  %v2972_v7 = vpop.permute.xlu1 %2971  ;;  %v2967_v8 = vpop.permute.xlu0 %2966  ;;  %v1979_v9 = vpack.c.bf16 %v1965_v2, %v1959_v1  ;;  %v1977_v20 = vpack.c.bf16 %v1953_v3, %v3869_v24  ;;  %v1976_v21 = vpack.c.bf16 %v1952_v4, %v3866_v23 }
0x1428   :  { %v2974_v12 = vunpack.i.h.bf16 %v2972_v7  ;;  %v2973_v46 = vunpack.i.l.bf16 %v2972_v7  ;;  %v2969_v47 = vunpack.i.h.bf16 %v2967_v8  ;;  %v2968_v17 = vunpack.i.l.bf16 %v2967_v8 }
0x1429   :  { %2006 = vmatprep.subr.bf16.mxu0 %v1979_v9 }
0x142a   :  { %2007 = vmatpush1.bf16.msra.mxu0 %v1978_v5  ;;  %v1940_v44 = vsel %vm251_vm7, %v2968_v17, %v2969_v47  ;;  %v1946_v10 = vsel %vm258_vm6, %v2973_v46, %v2974_v12  ;;  %v1947_v26 = vsel %vm258_vm6, %v2974_v12, %v2973_v46  ;;  %v1941_v24 = vsel %vm251_vm7, %v2969_v47, %v2968_v17  ;;  %v3005_v12 = vld [vmem:[%s4021_s2] sm:$0xff]  }
0x142b   :  { %v2982_v14 = vpop.permute.xlu1 %2981  ;;  %v2977_v13 = vpop.permute.xlu0 %2976  ;;  %2008 = vmatprep.subr.bf16.mxu0 %v1977_v20  ;;  %v1975_v27 = vpack.c.bf16 %v1946_v10, %v1940_v44  ;;  %v1974_v29 = vpack.c.bf16 %v1947_v26, %v1941_v24 }
0x142c   :  { %v2984_v49 = vunpack.i.h.bf16 %v2982_v14  ;;  %v2983_v51 = vunpack.i.l.bf16 %v2982_v14  ;;  %v2979_v22 = vunpack.i.h.bf16 %v2977_v13  ;;  %v2978_v25 = vunpack.i.l.bf16 %v2977_v13 }
0x142e   :  { %2009 = vmatpush1.bf16.msra.mxu0 %v1976_v21  ;;  %v1928_v28 = vsel %vm237_vm9, %v2978_v25, %v2979_v22  ;;  %v1934_v23 = vsel %vm244_vm8, %v2983_v51, %v2984_v49  ;;  %v1935_v31 = vsel %vm244_vm8, %v2984_v49, %v2983_v51  ;;  %v1929_v32 = vsel %vm237_vm9, %v2979_v22, %v2978_v25 }
0x142f   :  { %2010 = vmatprep.subr.bf16.mxu0 %v1975_v27  ;;  %v1973_v34 = vpack.c.bf16 %v1934_v23, %v1928_v28  ;;  %v1972_v35 = vpack.c.bf16 %v1935_v31, %v1929_v32 }
0x1432   :  { %2011 = vmatpush1.bf16.msra.mxu0 %v1974_v29 }
0x1433   :  { %2012 = vmatprep.subr.bf16.mxu0 %v1973_v34 }
0x1436   :  { %2013 = vmatpush1.bf16.msra.mxu0 %v1972_v35 }
0x1437   :  { %2465 = vmatprep.subr.bf16.mxu0 %v2990_v37 }
0x1438   :  { %v1987_v11 = vpop.permute.xlu0 %1986  ;;  %v1462_v56 = vpop.permute.xlu1 %1461 }
0x1439   :  { %2443 = vmatmul.mubr.msk.bf16.vlgmr.msra.gmra.mxu0 %vm306_vm10, %v1982_v36  ;;  %v1504_v61 = vadd.f32 %v3749_v45, %v1462_v56  ;;  %v1502_v0 = vadd.f32 %v3747_v53, %v1462_v56  ;;  %v2988_v45 = vld [vmem:[%s4022_s3 + $0x30] sm:$0xff]  }
0x143a   :  { %2466 = vmatpush3.bf16.msra.mxu0 %v2991_v50  ;;  %v3001_v53 = vld [vmem:[%s4021_s2 + $0x10] sm:$0xff]  }
0x143b   :  { %2467 = vmatprep.subr.bf16.mxu0 %v2992_v38  ;;  %v1509_v4 = vmax.f32 %v1504_v61, 0.0  ;;  %v1508_v7 = vmax.f32 %v1502_v0, 0.0 }
0x143c   :  { %v2063_v17 = vpop.permute.xlu1 %2062  ;;  %v2058_v20 = vpop.permute.xlu0 %2057 }
0x143e   :  { %2468 = vmatpush3.bf16.msra.mxu0 %v2993_v40 }
0x143f   :  { %2469 = vmatprep.subr.bf16.mxu0 %v2994_v42 }
0x1440   :  { %v2073_v28 = vpop.permute.xlu1 %2072  ;;  %v2068_v29 = vpop.permute.xlu0 %2067 }
0x1442   :  { %2470 = vmatpush3.bf16.msra.mxu0 %v2995_v43 }
0x1443   :  { %2471 = vmatprep.subr.bf16.mxu0 %v2996_v48 }
0x1446   :  { %2472 = vmatpush3.bf16.msra.mxu0 %v2997_v52 }
0x1447   :  { %2473 = vmatprep.subr.bf16.mxu0 %v2998_v15 }
0x144a   :  { %2474 = vmatpush3.bf16.msra.mxu0 %v2999_v16 }
0x14f9   :  { %v2032_v54 = vpop.f32.mrf.mxu0 }
0x14fa   :  { %v2033_v55 = vadd.f32 %v2032_v54, %v1987_v11  ;;  %v2340_v54 = vpop.permute.xlu0 %2339 }
0x14fb   :  { %v2034_v57 = vpop.f32.mrf.mxu0 }
0x14fc   :  { %v2039_v58 = vadd.f32 %v2033_v55, %v3806_v18  ;;  %v2035_v59 = vadd.f32 %v2034_v57, %v1987_v11  ;;  %v3003_v18 = vld [vmem:[%s4021_s2 + $0x8] sm:$0xff]  }
0x14fd   :  { %v2036_v60 = vpop.f32.mrf.mxu0 }
0x14fe   :  { %v2041_v62 = vmax.f32 %v2039_v58, 0.0  ;;  %v2040_v63 = vadd.f32 %v2035_v59, %v3809_v19  ;;  %v3004_v19 = vld [vmem:[%s4021_s2 + $0x40] sm:$0xff]   ;;  %v2345_v58 = vpop.permute.xlu1 %2344  ;;  %v2350_v0 = vpop.permute.xlu0 %2349 }
0x14ff   :  { %v2037_v1 = vpop.f32.mrf.mxu0 }
0x1500   :  { %v2042_v2 = vmax.f32 %v2040_v63, 0.0  ;;  %v2043_v3 = vmul.f32 %v2041_v62, %v3139_v39  ;;  %v2989_v39 = vld [vmem:[%s4022_s3 + $0x38] sm:$0xff]  }
0x1502   :  { %v2044_v5 = vmul.f32 %v2042_v2, %v3141_v41  ;;  %v2045_v9 = vpack.c.bf16 %v2043_v3, %v1508_v7  ;;  %v3000_v41 = vld [vmem:[%s4021_s2 + $0x50] sm:$0xff]  }
0x1503   :  { %2475 = vmatprep.subr.bf16.mxu0 %v3000_v41 }
0x1504   :  { %v2046_v8 = vpack.c.bf16 %v2044_v5, %v1509_v4  ;;  %2476 = vmatpush3.bf16.msra.mxu0 %v3001_v53 }
0x1506   :  { %2105 = vmatprep.subr.bf16.mxu1 %v2046_v8 }
0x1507   :  { %2106 = vmatpush1.bf16.msra.mxu1 %v2045_v9  ;;  %v2355_v9 = vpop.permute.xlu1 %2354 }
0x150a   :  { %2446 = vmatmul.mubr.msk.bf16.vlgmr.msra.gmra.mxu1 %vm70_vm0, %v2988_v45 }
0x150b   :  { %2133 = vmatprep.mubr.bf16.mxu1 %v3032_v6  ;;  %v3002_v6 = vld [vmem:[%s4021_s2 + $0x48] sm:$0xff]   ;;  %s3041_s2 = smov [#allocation3]  }
0x150c   :  { %2477 = vmatprep.subr.bf16.mxu0 %v3002_v6  ;;  %s2400_s17 = sshll.u32 %s3041_s2, 4  ;;  %s2401_s17 = int_to_ptr.vmem [resolvable:$true] %s2400_s17 }
0x150d   :  { %2478 = vmatpush3.bf16.msra.mxu0 %v3003_v18  ;;  %s3010_s4 = scalar_lea.vmem %s2401_s17, 16  ;;  %s3014_s1 = scalar_lea.vmem %s2401_s17, 32 }
0x150e   :  { %2479 = vmatprep.subr.bf16.mxu0 %v3004_v19  ;;  %p3011_p0 = scmp.ne.s32.totalorder %s2401_s17, %s3010_s4  ;;  %p3015_p1 = scmp.lt.s32.totalorder %s2401_s17, %s2401_s17 }
0x150f   :  { %p3016_p2 = scmp.lt.s32.totalorder %s3014_s1, %s3010_s4 }
0x1511   :  { %2480 = vmatpush3.bf16.msra.mxu0 %v3005_v12  ;;  %p3017_p3 = por %p3016_p2, %p3015_p1 }
0x1512   :  { %2447 = vmatmul.mubr.msk.bf16.gmra.mxu1 %vm70_vm0, %v2989_v39 }
0x1513   :  { %p3018_p4 = pnand %p3017_p3, %p3011_p0 }
0x15ca   :  { %v2125_v46 = vpop.f32.mrf.mxu1 }
0x15cb   :  { %v2126_v14 = vadd.f32 %v2125_v46, %v2058_v20 }
0x15cc   :  { %v2127_v47 = vpop.f32.mrf.mxu1 }
0x15cd   :  { %v2128_v10 = vadd.f32 %v2127_v47, %v2058_v20  ;;  %v2144_v24 = vmax.f32 %v2126_v14, 0.0  ;;  %v2379_v47 = vpop.permute.xlu0 %2378 }
0x15ce   :  { %v2129_v44 = vpop.f32.mrf.mxu1  ;;  %v2384_v20 = vrot.slane %v2379_v47, %v37_v33 }
0x15cf   :  { %v2130_v21 = vadd.f32 %v2129_v44, %v2063_v17  ;;  %v2145_v25 = vmax.f32 %v2128_v10, 0.0 }
0x15d0   :  { %v2131_v13 = vpop.f32.mrf.mxu1 }
0x15d1   :  { %v2132_v49 = vadd.f32 %v2131_v13, %v2063_v17  ;;  %v2146_v51 = vmax.f32 %v2130_v21, 0.0 }
0x15d2   :  { %v2135_v22 = vpop.f32.mrf.mxu1 }
0x15d3   :  { %v2147_v26 = vmax.f32 %v2132_v49, 0.0  ;;  %v2152_v31 = vpack.c.bf16 %v2146_v51, %v2144_v24  ;;  %v2136_v36 = vadd.f32 %v2135_v22, %v2068_v29 }
0x15d4   :  { %v2137_v27 = vpop.f32.mrf.mxu1 }
0x15d5   :  { %v2153_v23 = vpack.c.bf16 %v2147_v26, %v2145_v25  ;;  %v2138_v34 = vadd.f32 %v2137_v27, %v2068_v29  ;;  %v2148_v43 = vmax.f32 %v2136_v36, 0.0 }
0x15d6   :  { %v2139_v32 = vpop.f32.mrf.mxu1 }
0x15d7   :  { %v2140_v35 = vadd.f32 %v2139_v32, %v2073_v28  ;;  %2316 = vmatprep.mubr.bf16.mxu0 %v2153_v23  ;;  %v2149_v40 = vmax.f32 %v2138_v34, 0.0 }
0x15d8   :  { %v2141_v37 = vpop.f32.mrf.mxu1  ;;  %2317 = vmatmul.mubr.bf16.vlgmr.msra.gmra.mxu0 %v2152_v31 }
0x15d9   :  { %v2142_v50 = vadd.f32 %v2141_v37, %v2073_v28  ;;  %v2150_v38 = vmax.f32 %v2140_v35, 0.0 }
0x15db   :  { %v2151_v42 = vmax.f32 %v2142_v50, 0.0  ;;  %v2154_v52 = vpack.c.bf16 %v2150_v38, %v2148_v43 }
0x15dd   :  { %v2155_v48 = vpack.c.bf16 %v2151_v42, %v2149_v40 }
0x15df   :  { %2324 = vmatprep.mubr.bf16.mxu0 %v2155_v48 }
0x15e0   :  { %2325 = vmatmul.mubr.bf16.gmra.mxu0 %v2154_v52 }
0x1698   :  { %v2481_v15 = vpop.f32.mrf.mxu0 }
0x169a   :  { %v2482_v16 = vpop.f32.mrf.mxu0 }
0x169b   :  { %v2483_v56 = vadd.f32 %v2482_v16, %v2481_v15 }
0x169c   :  { %v2484_v11 = vpop.f32.mrf.mxu0 }
0x169d   :  { %v2357_v62 = vmul.f32 %v2483_v56, %v2340_v54 }
0x169e   :  { %v2485_v55 = vpop.f32.mrf.mxu0 }
0x169f   :  { %v2486_v57 = vadd.f32 %v2485_v55, %v2484_v11  ;;  %v2362_v5 = vsel %vm2361_vm11, %v2357_v62, 0.0 }
0x16a0   :  { %v2487_v59 = vpop.f32.mrf.mxu0 }
0x16a1   :  { %v2358_v60 = vmul.f32 %v2486_v57, %v2345_v58 }
0x16a2   :  { %v2488_v61 = vpop.f32.mrf.mxu0 }
0x16a3   :  { %v2489_v63 = vadd.f32 %v2488_v61, %v2487_v59  ;;  %v2363_v2 = vsel %vm2361_vm11, %v2358_v60, 0.0 }
0x16a4   :  { %v2490_v1 = vpop.f32.mrf.mxu0  ;;  %v2364_v45 = vadd.f32 %v2363_v2, %v2362_v5 }
0x16a5   :  { %v2359_v3 = vmul.f32 %v2489_v63, %v2350_v0 }
0x16a6   :  { %v2491_v4 = vpop.f32.mrf.mxu0 }
0x16a7   :  { %v2365_v7 = vsel %vm2361_vm11, %v2359_v3, 0.0  ;;  %v2492_v8 = vadd.f32 %v2491_v4, %v2490_v1 }
0x16a8   :  { %v2366_v41 = vadd.f32 %v2365_v7, %v2364_v45 }
0x16a9   :  { %v2360_v39 = vmul.f32 %v2492_v8, %v2355_v9 }
0x16ab   :  { %v2367_v53 = vsel %vm2361_vm11, %v2360_v39, 0.0 }
0x16ac   :  { %v2368_v6 = vadd.f32 %v2367_v53, %v2366_v41 }
0x16ae   :  { %v2369_v18 = vrot.slane %v2368_v6, 4 }
0x16b0   :  { %v2370_v19 = vadd.f32 %v2369_v18, %v2368_v6 }
0x16b2   :  { %v2371_v12 = vrot.slane %v2370_v19, 2 }
0x16b4   :  { %v2372_v46 = vadd.f32 %v2371_v12, %v2370_v19 }
0x16b6   :  { %v2373_v17 = vrot.slane %v2372_v46, 1 }
0x16b8   :  { %v2374_v44 = vadd.f32 %v2373_v17, %v2372_v46 }
0x16ba   :  { %v2385_v10 = vadd.f32 %v2384_v20, %v2374_v44 }
0x16bc   :  { %v2464_v21 = vmul.f32 -1.442695, %v2385_v10 }
0x16be   :  { %3006 = vpow2.f32 %v2464_v21 }
0x16cb   :  { %v3007_v14 = vpop.eup %3006 }
0x16cc   :  { %v2389_v13 = vadd.f32 1.0, %v3007_v14 }
0x16ce   :  { %3008 = vrcp.f32 %v2389_v13 }
0x16db   :  { %v3009_v49 = vpop.eup %3008 }
0x16dc   :  { %2393 = vst.msk [vmem:[#allocation3] sm:$0x1] %vm2392_vm12, %v3009_v49 }
0x16dd   :  { %3021 = shalt.err (!%p3018_p4)
}
0x16de   :  { %2403 = dma.vmem_to_hbm [thread:$0]  %s2401_s17, 16, %s4027_s8, [#allocation4]  }
0x16df   :  { %3030 = dma.done.wait [#allocation4], 16  }
0x16e0   :  { %3031 = vsyncadd [#allocation4], 4294967280 }
0x16e1   :  { %2407 = vsyncpa [#allocation4], 1 }

</bundles_post_ra>
